<compile_context>
chip_gen: v5e
topology: v5e:2x2
jax: 0.10.0
libtpu: 0.0.40
codegen_flags: <defaults>
</compile_context>

<pallas_src>
import math
from functools import partial

import jax
import jax.numpy as jnp
from jax.experimental import pallas as pl
from jax.experimental.pallas import tpu as pltpu

S = 3  # sequence length: [emb1, emb2, cls]


def _round_up(x, m):
    return (x + m - 1) // m * m


def _layer_norm(x, g, b, eps=1e-5):
    mu = jnp.mean(x, axis=-1, keepdims=True)
    xc = x - mu
    var = jnp.mean(xc * xc, axis=-1, keepdims=True)
    return xc * jax.lax.rsqrt(var + eps) * g + b


def _layer_kernel(x_ref, wqkv_ref, bqkv_ref, wo_ref, bo_ref,
                  ln1g_ref, ln1b_ref, w1_ref, b1_ref, w2_ref, b2_ref,
                  ln2g_ref, ln2b_ref, o_ref, x_sc, *, nheads):
    l = pl.program_id(1)
    nl = pl.num_programs(1)

    S_, TB, D = x_ref.shape            # (3, tb, D), position-major rows
    R = S_ * TB
    NH = nheads
    dh = D // NH
    scale = 1.0 / math.sqrt(dh)

    # ---- initialize the f32 activation carry for this batch tile
    @pl.when(l == 0)
    def _():
        x_sc[...] = x_ref[...].reshape(R, D).astype(jnp.float32)

    x = x_sc[...]                      # (R, D) f32 master copy

    # ---- fused QKV projection: one (R,D)@(D,3D) MXU matmul, bf16 in / f32 acc
    qkv = jnp.dot(x.astype(jnp.bfloat16), wqkv_ref[...],
                  preferred_element_type=jnp.float32) + bqkv_ref[...]
    q, k, v = qkv[:, :D], qkv[:, D:2 * D], qkv[:, 2 * D:]

    # per-position slabs: rows [0,TB) = emb1, [TB,2TB) = emb2, [2TB,3TB) = cls
    qs = [q[s * TB:(s + 1) * TB, :] for s in range(S_)]
    ks = [k[s * TB:(s + 1) * TB, :] for s in range(S_)]
    vs = [v[s * TB:(s + 1) * TB, :] for s in range(S_)]

    def head_scores(qq, kk):
        # elementwise Q*K over (TB, D), per-head segment sum -> (TB, NH)
        return (qq * kk).reshape(TB, NH, dh).sum(axis=-1) * scale

    # ---- lane-dense VPU attention over the 3x3 position pairs (no MXU)
    outs = []
    for sq in range(S_):
        sc = [head_scores(qs[sq], ks[sk]) for sk in range(S_)]
        m = sc[0]
        for c in sc[1:]:
            m = jnp.maximum(m, c)
        e = [jnp.exp(c - m) for c in sc]
        denom = e[0]
        for c in e[1:]:
            denom = denom + c
        inv = pl.reciprocal(denom, approx=True)          # EUP slot
        acc = jnp.zeros((TB, D), jnp.float32)
        for sk in range(S_):
            w = (e[sk] * inv)[:, :, None]                # (TB, NH, 1)
            wb = jnp.broadcast_to(w, (TB, NH, dh)).reshape(TB, D)
            acc = acc + wb * vs[sk]
        outs.append(acc)
    attn_in = jnp.concatenate(outs, axis=0)              # (R, D), sublane concat

    # ---- single (R,D)@(D,D) out-projection
    attn = jnp.dot(attn_in.astype(jnp.bfloat16), wo_ref[...],
                   preferred_element_type=jnp.float32) + bo_ref[...]

    # ---- residual + post-LayerNorm (f32)
    x1 = _layer_norm(x + attn, ln1g_ref[...], ln1b_ref[...])

    # ---- feed-forward: Linear -> ReLU -> Linear (bf16 in / f32 acc)
    h1 = jnp.maximum(jnp.dot(x1.astype(jnp.bfloat16), w1_ref[...],
                             preferred_element_type=jnp.float32) + b1_ref[...], 0.0)
    ff = jnp.dot(h1.astype(jnp.bfloat16), w2_ref[...],
                 preferred_element_type=jnp.float32) + b2_ref[...]
    x_new = _layer_norm(x1 + ff, ln2g_ref[...], ln2b_ref[...])

    x_sc[...] = x_new                                    # carry to next layer step

    # ---- write only the cls rows, only after the last layer
    @pl.when(l == nl - 1)
    def _():
        o_ref[...] = x_new[(S_ - 1) * TB:, :].astype(o_ref.dtype)


def encoder_stack(x, sp, *, nheads, num_layers, tb):
    """x: (S, B_pad, D) bf16, position-major.  Returns (B_pad, D) f32 cls output."""
    S_, B_pad, D = x.shape
    F = sp['w1'].shape[-1]
    L = num_layers
    nbt = B_pad // tb
    R = S_ * tb

    def wspec(shape):
        # per-layer block, streamed along the (innermost) layer grid axis
        return pl.BlockSpec((None,) + shape[1:],
                            lambda i, l: (l,) + (0,) * (len(shape) - 1))

    in_specs = [
        pl.BlockSpec((S_, tb, D), lambda i, l: (0, i, 0)),       # activations
        wspec((L, D, 3 * D)), wspec((L, 1, 3 * D)),              # wqkv, bqkv
        wspec((L, D, D)), wspec((L, 1, D)),                      # wo, bo
        wspec((L, 1, D)), wspec((L, 1, D)),                      # ln1 gamma/beta
        wspec((L, D, F)), wspec((L, 1, F)),                      # w1, b1
        wspec((L, F, D)), wspec((L, 1, D)),                      # w2, b2
        wspec((L, 1, D)), wspec((L, 1, D)),                      # ln2 gamma/beta
    ]
    out_specs = pl.BlockSpec((tb, D), lambda i, l: (i, 0))

    # --- VMEM budget: one layer's weights (double-buffered) + tiles + scratch
    per_layer_w = 2 * (D * 3 * D + D * D + 2 * D * F)            # bf16 weight bytes
    per_layer_small = 4 * (3 * D + 6 * D + F)                    # f32 biases / LN
    act_io = 2 * (S_ * tb * D * 2) + 2 * (tb * D * 4)            # x (bf16) + out (f32)
    carry = R * D * 4                                            # activation scratch
    temps = R * (3 * D + F + 6 * D) * 4                          # qkv / h1 / temporaries
    est = 2 * (per_layer_w + per_layer_small) + act_io + carry + temps
    try:
        cap = int(pltpu.get_tpu_info().vmem_capacity_bytes)
    except Exception:
        cap = 64 * 1024 * 1024
    vmem_limit = int(min(max(est, 32 * 1024 * 1024), cap - 12 * 1024 * 1024))

    # --- advisory cost estimate
    rows = S_ * B_pad
    flops = 2 * L * rows * D * (4 * D + 2 * F) + 2 * L * B_pad * 9 * D
    transcendentals = L * B_pad * (9 * nheads + 10)
    bytes_accessed = nbt * L * (per_layer_w + per_layer_small) + rows * D * 2 + B_pad * D * 4

    return pl.pallas_call(
        partial(_layer_kernel, nheads=nheads),
        out_shape=jax.ShapeDtypeStruct((B_pad, D), jnp.float32),
        grid=(nbt, L),
        in_specs=in_specs,
        out_specs=out_specs,
        scratch_shapes=[pltpu.VMEM((R, D), jnp.float32)],        # activation carry
        compiler_params=pltpu.CompilerParams(
            dimension_semantics=("parallel", "arbitrary"),
            vmem_limit_bytes=vmem_limit),
        cost_estimate=pl.CostEstimate(
            flops=int(flops), transcendentals=int(transcendentals),
            bytes_accessed=int(bytes_accessed)),
    )(x, sp['wqkv'], sp['bqkv'], sp['wo'], sp['bo'],
      sp['ln1g'], sp['ln1b'], sp['w1'], sp['b1'], sp['w2'], sp['b2'],
      sp['ln2g'], sp['ln2b'])


def cross_encoder(emb1, emb2, params, cls_token, nheads, *, tb=None):
    """emb1, emb2: (B, D) f32.  Returns (B, D) f32 (output at the cls position)."""
    B, D = emb1.shape
    assert D % nheads == 0
    L = params['wqkv'].shape[0]

    seq = jnp.concatenate(
        [emb1[:, None, :], emb2[:, None, :],
         jnp.broadcast_to(cls_token, (B, 1, D))], axis=1)        # (B, 3, D)

    # Batch tiling: aim for >=2 grid steps (v7x megacore) when B allows, cap the
    # tile so tb_rows = 3*tb stays MXU-friendly; pad B so tb | B_pad.  Zero-padded
    # rows are numerically safe (finite through LN/softmax) and discarded below.
    if tb is None:
        tb = min(256, _round_up(max(1, (B + 1) // 2), 8))
    tb = max(8, _round_up(int(tb), 8))
    B_pad = _round_up(B, tb)
    if B_pad != B:
        seq = jnp.pad(seq, ((0, B_pad - B), (0, 0), (0, 0)))

    # position-major layout (S, B_pad, D), bf16 for the per-step activation DMA
    x = jnp.transpose(seq, (1, 0, 2)).astype(jnp.bfloat16)
    out = encoder_stack(x, params, nheads=nheads, num_layers=L, tb=tb)
    return out[:B]


def init_params(key, d_model, num_layers, dim_feedforward=2048):
    # Deterministic synthetic init; shapes match nn.TransformerEncoderLayer defaults.
    # Weights stored bf16 (x @ W layout), biases / LayerNorm params f32, stacked
    # along a leading L axis so each layer is one streamed block.
    def nrm(k, shape):
        return (0.02 * jax.random.normal(k, shape, jnp.float32)).astype(jnp.bfloat16)

    wqkv, wo, w1, w2 = [], [], [], []
    for l in range(num_layers):
        ks = jax.random.split(jax.random.fold_in(key, l), 4)
        wqkv.append(nrm(ks[0], (d_model, 3 * d_model)))
        wo.append(nrm(ks[1], (d_model, d_model)))
        w1.append(nrm(ks[2], (d_model, dim_feedforward)))
        w2.append(nrm(ks[3], (dim_feedforward, d_model)))

    L, D, F = num_layers, d_model, dim_feedforward
    params = dict(
        wqkv=jnp.stack(wqkv), bqkv=jnp.zeros((L, 1, 3 * D), jnp.float32),
        wo=jnp.stack(wo), bo=jnp.zeros((L, 1, D), jnp.float32),
        ln1g=jnp.ones((L, 1, D), jnp.float32), ln1b=jnp.zeros((L, 1, D), jnp.float32),
        w1=jnp.stack(w1), b1=jnp.zeros((L, 1, F), jnp.float32),
        w2=jnp.stack(w2), b2=jnp.zeros((L, 1, D), jnp.float32),
        ln2g=jnp.ones((L, 1, D), jnp.float32), ln2b=jnp.zeros((L, 1, D), jnp.float32),
    )
    cls_token = jnp.zeros((1, 1, d_model), jnp.float32)          # torch.zeros init
    return params, cls_token


def cross_encoder_ref(emb1, emb2, params, cls_token, nheads):
    # Pure-JAX f32 reference (same bf16-rounded weights) for a correctness check.
    B, D = emb1.shape
    NH, dh = nheads, D // nheads
    x = jnp.concatenate([emb1[:, None, :], emb2[:, None, :],
                         jnp.broadcast_to(cls_token, (B, 1, D))], axis=1)
    L = params['wqkv'].shape[0]
    for l in range(L):
        xf = x.reshape(B * S, D)
        qkv = xf @ params['wqkv'][l].astype(jnp.float32) + params['bqkv'][l]
        q = qkv[:, :D].reshape(B, S, NH, dh).transpose(0, 2, 1, 3)
        k = qkv[:, D:2 * D].reshape(B, S, NH, dh).transpose(0, 2, 1, 3)
        v = qkv[:, 2 * D:].reshape(B, S, NH, dh).transpose(0, 2, 1, 3)
        sc = jnp.einsum('bhqd,bhkd->bhqk', q, k) / math.sqrt(dh)
        p = jax.nn.softmax(sc, axis=-1)
        o = jnp.einsum('bhqk,bhkd->bhqd', p, v).transpose(0, 2, 1, 3).reshape(B * S, D)
        attn = o @ params['wo'][l].astype(jnp.float32) + params['bo'][l]
        x1 = _layer_norm(xf + attn, params['ln1g'][l], params['ln1b'][l])
        h1 = jnp.maximum(x1 @ params['w1'][l].astype(jnp.float32) + params['b1'][l], 0.0)
        ff = h1 @ params['w2'][l].astype(jnp.float32) + params['b2'][l]
        x = _layer_norm(x1 + ff, params['ln2g'][l], params['ln2b'][l]).reshape(B, S, D)
    return x[:, -1, :]


if __name__ == "__main__":
    d_model, num_layers, nheads = 32, 2, 4
    B = 2

    key = jax.random.PRNGKey(0)
    k1, k2, kp = jax.random.split(key, 3)
    emb1 = jax.random.normal(k1, (B, d_model), jnp.float32)
    emb2 = jax.random.normal(k2, (B, d_model), jnp.float32)

    params, cls_token = init_params(kp, d_model, num_layers)

    out = cross_encoder(emb1, emb2, params, cls_token, nheads)
    out = jax.block_until_ready(out)
    assert out.shape == (B, d_model) and out.dtype == jnp.float32

    ref = cross_encoder_ref(emb1, emb2, params, cls_token, nheads)
    err = float(jnp.max(jnp.abs(out - ref)))
    assert bool(jnp.all(jnp.isfinite(out))) and err < 1e-1, f"max abs err {err}"
    print("KERNEL_OK")
</pallas_src>

<mosaic_0001>
module attributes {stable_mosaic.version = 11 : i64} {
  func.func @_layer_kernel(%arg0: i32, %arg1: i32, %arg2: memref<3x8x32xbf16, #tpu.memory_space<vmem>>, %arg3: memref<1x32x96xbf16, #tpu.memory_space<vmem>>, %arg4: memref<1x1x96xf32, #tpu.memory_space<vmem>>, %arg5: memref<1x32x32xbf16, #tpu.memory_space<vmem>>, %arg6: memref<1x1x32xf32, #tpu.memory_space<vmem>>, %arg7: memref<1x1x32xf32, #tpu.memory_space<vmem>>, %arg8: memref<1x1x32xf32, #tpu.memory_space<vmem>>, %arg9: memref<1x32x2048xbf16, #tpu.memory_space<vmem>>, %arg10: memref<1x1x2048xf32, #tpu.memory_space<vmem>>, %arg11: memref<1x2048x32xbf16, #tpu.memory_space<vmem>>, %arg12: memref<1x1x32xf32, #tpu.memory_space<vmem>>, %arg13: memref<1x1x32xf32, #tpu.memory_space<vmem>>, %arg14: memref<1x1x32xf32, #tpu.memory_space<vmem>>, %arg15: memref<8x32xf32, #tpu.memory_space<vmem>>, %arg16: memref<24x32xf32, #tpu.memory_space<vmem>>) attributes {dimension_semantics = [#tpu.dimension_semantics<parallel>, #tpu.dimension_semantics<arbitrary>], iteration_bounds = array<i64: 1, 2>, scalar_prefetch = 0 : i64, scratch_operands = 1 : i64, tpu.core_type = #tpu.core_type<tc>, window_params = [{transform_indices = @transform_0, window_bounds = array<i64: 3, 8, 32>}, {transform_indices = @transform_1, window_bounds = array<i64: 1, 32, 96>}, {transform_indices = @transform_2, window_bounds = array<i64: 1, 1, 96>}, {transform_indices = @transform_3, window_bounds = array<i64: 1, 32, 32>}, {transform_indices = @transform_4, window_bounds = array<i64: 1, 1, 32>}, {transform_indices = @transform_5, window_bounds = array<i64: 1, 1, 32>}, {transform_indices = @transform_6, window_bounds = array<i64: 1, 1, 32>}, {transform_indices = @transform_7, window_bounds = array<i64: 1, 32, 2048>}, {transform_indices = @transform_8, window_bounds = array<i64: 1, 1, 2048>}, {transform_indices = @transform_9, window_bounds = array<i64: 1, 2048, 32>}, {transform_indices = @transform_10, window_bounds = array<i64: 1, 1, 32>}, {transform_indices = @transform_11, window_bounds = array<i64: 1, 1, 32>}, {transform_indices = @transform_12, window_bounds = array<i64: 1, 1, 32>}, {transform_indices = @transform_13, window_bounds = array<i64: 8, 32>}]} {
    %c0_i32 = arith.constant 0 : i32
    %0 = arith.cmpi eq, %arg1, %c0_i32 : i32
    %1 = arith.extui %0 : i1 to i32
    %c0_i32_0 = arith.constant 0 : i32
    %2 = arith.cmpi ne, %1, %c0_i32_0 : i32
    scf.if %2 {
      %c0_76 = arith.constant 0 : index
      %c0_77 = arith.constant 0 : index
      %c0_78 = arith.constant 0 : index
      %249 = vector.load %arg2[%c0_76, %c0_77, %c0_78] : memref<3x8x32xbf16, #tpu.memory_space<vmem>>, vector<3x8x32xbf16>
      %250 = vector.shape_cast %249 : vector<3x8x32xbf16> to vector<24x32xbf16>
      %251 = arith.extf %250 : vector<24x32xbf16> to vector<24x32xf32>
      %c0_79 = arith.constant 0 : index
      %c0_80 = arith.constant 0 : index
      %252 = vector.load %arg16[%c0_79, %c0_80] : memref<24x32xf32, #tpu.memory_space<vmem>>, vector<24x32xf32>
      tpu.vector_store %arg16[%c0_79, %c0_80], %251 {strides = array<i32>} : memref<24x32xf32, #tpu.memory_space<vmem>>, vector<24x32xf32>,
    } else {
    }
    %c0 = arith.constant 0 : index
    %c0_1 = arith.constant 0 : index
    %3 = vector.load %arg16[%c0, %c0_1] : memref<24x32xf32, #tpu.memory_space<vmem>>, vector<24x32xf32>
    %4 = arith.truncf %3 : vector<24x32xf32> to vector<24x32xbf16>
    %c0_2 = arith.constant 0 : index
    %c0_3 = arith.constant 0 : index
    %c0_4 = arith.constant 0 : index
    %5 = vector.load %arg3[%c0_2, %c0_3, %c0_4] : memref<1x32x96xbf16, #tpu.memory_space<vmem>>, vector<1x32x96xbf16>
    %6 = vector.shape_cast %5 : vector<1x32x96xbf16> to vector<32x96xbf16>
    %cst = arith.constant dense<0.000000e+00> : vector<24x96xf32>
    %7 = tpu.matmul %4, %6, %cst {dimension_numbers = #tpu.dot_dimension_numbers<[1], [0], [0], [1], [0, 0, 1, 1], [], []>} : vector<24x32xbf16>, vector<32x96xbf16>, vector<24x96xf32> -> vector<24x96xf32>
    %c0_5 = arith.constant 0 : index
    %c0_6 = arith.constant 0 : index
    %c0_7 = arith.constant 0 : index
    %8 = vector.load %arg4[%c0_5, %c0_6, %c0_7] : memref<1x1x96xf32, #tpu.memory_space<vmem>>, vector<1x1x96xf32>
    %9 = vector.shape_cast %8 : vector<1x1x96xf32> to vector<1x96xf32>
    %10 = vector.broadcast %9 : vector<1x96xf32> to vector<24x96xf32>
    %11 = arith.addf %7, %10 : vector<24x96xf32>
    %12 = vector.extract_strided_slice %11 {offsets = [0, 0], sizes = [24, 32], strides = [1, 1]} : vector<24x96xf32> to vector<24x32xf32>
    %13 = vector.extract_strided_slice %11 {offsets = [0, 32], sizes = [24, 32], strides = [1, 1]} : vector<24x96xf32> to vector<24x32xf32>
    %14 = vector.extract_strided_slice %11 {offsets = [0, 64], sizes = [24, 32], strides = [1, 1]} : vector<24x96xf32> to vector<24x32xf32>
    %15 = vector.extract_strided_slice %12 {offsets = [0, 0], sizes = [8, 32], strides = [1, 1]} : vector<24x32xf32> to vector<8x32xf32>
    %16 = vector.extract_strided_slice %12 {offsets = [8, 0], sizes = [8, 32], strides = [1, 1]} : vector<24x32xf32> to vector<8x32xf32>
    %17 = vector.extract_strided_slice %12 {offsets = [16, 0], sizes = [8, 32], strides = [1, 1]} : vector<24x32xf32> to vector<8x32xf32>
    %18 = vector.extract_strided_slice %13 {offsets = [0, 0], sizes = [8, 32], strides = [1, 1]} : vector<24x32xf32> to vector<8x32xf32>
    %19 = vector.extract_strided_slice %13 {offsets = [8, 0], sizes = [8, 32], strides = [1, 1]} : vector<24x32xf32> to vector<8x32xf32>
    %20 = vector.extract_strided_slice %13 {offsets = [16, 0], sizes = [8, 32], strides = [1, 1]} : vector<24x32xf32> to vector<8x32xf32>
    %21 = vector.extract_strided_slice %14 {offsets = [0, 0], sizes = [8, 32], strides = [1, 1]} : vector<24x32xf32> to vector<8x32xf32>
    %22 = vector.extract_strided_slice %14 {offsets = [8, 0], sizes = [8, 32], strides = [1, 1]} : vector<24x32xf32> to vector<8x32xf32>
    %23 = vector.extract_strided_slice %14 {offsets = [16, 0], sizes = [8, 32], strides = [1, 1]} : vector<24x32xf32> to vector<8x32xf32>
    %24 = arith.mulf %15, %18 : vector<8x32xf32>
    %25 = vector.shape_cast %24 : vector<8x32xf32> to vector<8x4x8xf32>
    %cst_8 = arith.constant dense<0.000000e+00> : vector<8x4xf32>
    %26 = vector.multi_reduction <add>, %25, %cst_8 [2] : vector<8x4x8xf32> to vector<8x4xf32>
    %cst_9 = arith.constant 0.353553385 : f32
    %27 = vector.broadcast %cst_9 : f32 to vector<8x4xf32>
    %28 = arith.mulf %26, %27 : vector<8x4xf32>
    %29 = arith.mulf %15, %19 : vector<8x32xf32>
    %30 = vector.shape_cast %29 : vector<8x32xf32> to vector<8x4x8xf32>
    %cst_10 = arith.constant dense<0.000000e+00> : vector<8x4xf32>
    %31 = vector.multi_reduction <add>, %30, %cst_10 [2] : vector<8x4x8xf32> to vector<8x4xf32>
    %cst_11 = arith.constant 0.353553385 : f32
    %32 = vector.broadcast %cst_11 : f32 to vector<8x4xf32>
    %33 = arith.mulf %31, %32 : vector<8x4xf32>
    %34 = arith.mulf %15, %20 : vector<8x32xf32>
    %35 = vector.shape_cast %34 : vector<8x32xf32> to vector<8x4x8xf32>
    %cst_12 = arith.constant dense<0.000000e+00> : vector<8x4xf32>
    %36 = vector.multi_reduction <add>, %35, %cst_12 [2] : vector<8x4x8xf32> to vector<8x4xf32>
    %cst_13 = arith.constant 0.353553385 : f32
    %37 = vector.broadcast %cst_13 : f32 to vector<8x4xf32>
    %38 = arith.mulf %36, %37 : vector<8x4xf32>
    %39 = arith.maximumf %28, %33 : vector<8x4xf32>
    %40 = arith.maximumf %39, %38 : vector<8x4xf32>
    %41 = arith.subf %28, %40 : vector<8x4xf32>
    %42 = math.exp %41 : vector<8x4xf32>
    %43 = arith.subf %33, %40 : vector<8x4xf32>
    %44 = math.exp %43 : vector<8x4xf32>
    %45 = arith.subf %38, %40 : vector<8x4xf32>
    %46 = math.exp %45 : vector<8x4xf32>
    %47 = arith.addf %42, %44 : vector<8x4xf32>
    %48 = arith.addf %47, %46 : vector<8x4xf32>
    %49 = tpu.reciprocal %48 {approx = true} : vector<8x4xf32> -> vector<8x4xf32>
    %cst_14 = arith.constant 0.000000e+00 : f32
    %50 = vector.broadcast %cst_14 : f32 to vector<8x32xf32>
    %51 = arith.mulf %42, %49 : vector<8x4xf32>
    %52 = vector.shape_cast %51 : vector<8x4xf32> to vector<8x4x1xf32>
    %53 = vector.shape_cast %52 : vector<8x4x1xf32> to vector<8x4x1xf32>
    %54 = vector.broadcast %53 : vector<8x4x1xf32> to vector<8x4x8xf32>
    %55 = vector.shape_cast %54 : vector<8x4x8xf32> to vector<8x32xf32>
    %56 = arith.mulf %55, %21 : vector<8x32xf32>
    %57 = arith.addf %50, %56 : vector<8x32xf32>
    %58 = arith.mulf %44, %49 : vector<8x4xf32>
    %59 = vector.shape_cast %58 : vector<8x4xf32> to vector<8x4x1xf32>
    %60 = vector.shape_cast %59 : vector<8x4x1xf32> to vector<8x4x1xf32>
    %61 = vector.broadcast %60 : vector<8x4x1xf32> to vector<8x4x8xf32>
    %62 = vector.shape_cast %61 : vector<8x4x8xf32> to vector<8x32xf32>
    %63 = arith.mulf %62, %22 : vector<8x32xf32>
    %64 = arith.addf %57, %63 : vector<8x32xf32>
    %65 = arith.mulf %46, %49 : vector<8x4xf32>
    %66 = vector.shape_cast %65 : vector<8x4xf32> to vector<8x4x1xf32>
    %67 = vector.shape_cast %66 : vector<8x4x1xf32> to vector<8x4x1xf32>
    %68 = vector.broadcast %67 : vector<8x4x1xf32> to vector<8x4x8xf32>
    %69 = vector.shape_cast %68 : vector<8x4x8xf32> to vector<8x32xf32>
    %70 = arith.mulf %69, %23 : vector<8x32xf32>
    %71 = arith.addf %64, %70 : vector<8x32xf32>
    %72 = arith.mulf %16, %18 : vector<8x32xf32>
    %73 = vector.shape_cast %72 : vector<8x32xf32> to vector<8x4x8xf32>
    %cst_15 = arith.constant dense<0.000000e+00> : vector<8x4xf32>
    %74 = vector.multi_reduction <add>, %73, %cst_15 [2] : vector<8x4x8xf32> to vector<8x4xf32>
    %cst_16 = arith.constant 0.353553385 : f32
    %75 = vector.broadcast %cst_16 : f32 to vector<8x4xf32>
    %76 = arith.mulf %74, %75 : vector<8x4xf32>
    %77 = arith.mulf %16, %19 : vector<8x32xf32>
    %78 = vector.shape_cast %77 : vector<8x32xf32> to vector<8x4x8xf32>
    %cst_17 = arith.constant dense<0.000000e+00> : vector<8x4xf32>
    %79 = vector.multi_reduction <add>, %78, %cst_17 [2] : vector<8x4x8xf32> to vector<8x4xf32>
    %cst_18 = arith.constant 0.353553385 : f32
    %80 = vector.broadcast %cst_18 : f32 to vector<8x4xf32>
    %81 = arith.mulf %79, %80 : vector<8x4xf32>
    %82 = arith.mulf %16, %20 : vector<8x32xf32>
    %83 = vector.shape_cast %82 : vector<8x32xf32> to vector<8x4x8xf32>
    %cst_19 = arith.constant dense<0.000000e+00> : vector<8x4xf32>
    %84 = vector.multi_reduction <add>, %83, %cst_19 [2] : vector<8x4x8xf32> to vector<8x4xf32>
    %cst_20 = arith.constant 0.353553385 : f32
    %85 = vector.broadcast %cst_20 : f32 to vector<8x4xf32>
    %86 = arith.mulf %84, %85 : vector<8x4xf32>
    %87 = arith.maximumf %76, %81 : vector<8x4xf32>
    %88 = arith.maximumf %87, %86 : vector<8x4xf32>
    %89 = arith.subf %76, %88 : vector<8x4xf32>
    %90 = math.exp %89 : vector<8x4xf32>
    %91 = arith.subf %81, %88 : vector<8x4xf32>
    %92 = math.exp %91 : vector<8x4xf32>
    %93 = arith.subf %86, %88 : vector<8x4xf32>
    %94 = math.exp %93 : vector<8x4xf32>
    %95 = arith.addf %90, %92 : vector<8x4xf32>
    %96 = arith.addf %95, %94 : vector<8x4xf32>
    %97 = tpu.reciprocal %96 {approx = true} : vector<8x4xf32> -> vector<8x4xf32>
    %cst_21 = arith.constant 0.000000e+00 : f32
    %98 = vector.broadcast %cst_21 : f32 to vector<8x32xf32>
    %99 = arith.mulf %90, %97 : vector<8x4xf32>
    %100 = vector.shape_cast %99 : vector<8x4xf32> to vector<8x4x1xf32>
    %101 = vector.shape_cast %100 : vector<8x4x1xf32> to vector<8x4x1xf32>
    %102 = vector.broadcast %101 : vector<8x4x1xf32> to vector<8x4x8xf32>
    %103 = vector.shape_cast %102 : vector<8x4x8xf32> to vector<8x32xf32>
    %104 = arith.mulf %103, %21 : vector<8x32xf32>
    %105 = arith.addf %98, %104 : vector<8x32xf32>
    %106 = arith.mulf %92, %97 : vector<8x4xf32>
    %107 = vector.shape_cast %106 : vector<8x4xf32> to vector<8x4x1xf32>
    %108 = vector.shape_cast %107 : vector<8x4x1xf32> to vector<8x4x1xf32>
    %109 = vector.broadcast %108 : vector<8x4x1xf32> to vector<8x4x8xf32>
    %110 = vector.shape_cast %109 : vector<8x4x8xf32> to vector<8x32xf32>
    %111 = arith.mulf %110, %22 : vector<8x32xf32>
    %112 = arith.addf %105, %111 : vector<8x32xf32>
    %113 = arith.mulf %94, %97 : vector<8x4xf32>
    %114 = vector.shape_cast %113 : vector<8x4xf32> to vector<8x4x1xf32>
    %115 = vector.shape_cast %114 : vector<8x4x1xf32> to vector<8x4x1xf32>
    %116 = vector.broadcast %115 : vector<8x4x1xf32> to vector<8x4x8xf32>
    %117 = vector.shape_cast %116 : vector<8x4x8xf32> to vector<8x32xf32>
    %118 = arith.mulf %117, %23 : vector<8x32xf32>
    %119 = arith.addf %112, %118 : vector<8x32xf32>
    %120 = arith.mulf %17, %18 : vector<8x32xf32>
    %121 = vector.shape_cast %120 : vector<8x32xf32> to vector<8x4x8xf32>
    %cst_22 = arith.constant dense<0.000000e+00> : vector<8x4xf32>
    %122 = vector.multi_reduction <add>, %121, %cst_22 [2] : vector<8x4x8xf32> to vector<8x4xf32>
    %cst_23 = arith.constant 0.353553385 : f32
    %123 = vector.broadcast %cst_23 : f32 to vector<8x4xf32>
    %124 = arith.mulf %122, %123 : vector<8x4xf32>
    %125 = arith.mulf %17, %19 : vector<8x32xf32>
    %126 = vector.shape_cast %125 : vector<8x32xf32> to vector<8x4x8xf32>
    %cst_24 = arith.constant dense<0.000000e+00> : vector<8x4xf32>
    %127 = vector.multi_reduction <add>, %126, %cst_24 [2] : vector<8x4x8xf32> to vector<8x4xf32>
    %cst_25 = arith.constant 0.353553385 : f32
    %128 = vector.broadcast %cst_25 : f32 to vector<8x4xf32>
    %129 = arith.mulf %127, %128 : vector<8x4xf32>
    %130 = arith.mulf %17, %20 : vector<8x32xf32>
    %131 = vector.shape_cast %130 : vector<8x32xf32> to vector<8x4x8xf32>
    %cst_26 = arith.constant dense<0.000000e+00> : vector<8x4xf32>
    %132 = vector.multi_reduction <add>, %131, %cst_26 [2] : vector<8x4x8xf32> to vector<8x4xf32>
    %cst_27 = arith.constant 0.353553385 : f32
    %133 = vector.broadcast %cst_27 : f32 to vector<8x4xf32>
    %134 = arith.mulf %132, %133 : vector<8x4xf32>
    %135 = arith.maximumf %124, %129 : vector<8x4xf32>
    %136 = arith.maximumf %135, %134 : vector<8x4xf32>
    %137 = arith.subf %124, %136 : vector<8x4xf32>
    %138 = math.exp %137 : vector<8x4xf32>
    %139 = arith.subf %129, %136 : vector<8x4xf32>
    %140 = math.exp %139 : vector<8x4xf32>
    %141 = arith.subf %134, %136 : vector<8x4xf32>
    %142 = math.exp %141 : vector<8x4xf32>
    %143 = arith.addf %138, %140 : vector<8x4xf32>
    %144 = arith.addf %143, %142 : vector<8x4xf32>
    %145 = tpu.reciprocal %144 {approx = true} : vector<8x4xf32> -> vector<8x4xf32>
    %cst_28 = arith.constant 0.000000e+00 : f32
    %146 = vector.broadcast %cst_28 : f32 to vector<8x32xf32>
    %147 = arith.mulf %138, %145 : vector<8x4xf32>
    %148 = vector.shape_cast %147 : vector<8x4xf32> to vector<8x4x1xf32>
    %149 = vector.shape_cast %148 : vector<8x4x1xf32> to vector<8x4x1xf32>
    %150 = vector.broadcast %149 : vector<8x4x1xf32> to vector<8x4x8xf32>
    %151 = vector.shape_cast %150 : vector<8x4x8xf32> to vector<8x32xf32>
    %152 = arith.mulf %151, %21 : vector<8x32xf32>
    %153 = arith.addf %146, %152 : vector<8x32xf32>
    %154 = arith.mulf %140, %145 : vector<8x4xf32>
    %155 = vector.shape_cast %154 : vector<8x4xf32> to vector<8x4x1xf32>
    %156 = vector.shape_cast %155 : vector<8x4x1xf32> to vector<8x4x1xf32>
    %157 = vector.broadcast %156 : vector<8x4x1xf32> to vector<8x4x8xf32>
    %158 = vector.shape_cast %157 : vector<8x4x8xf32> to vector<8x32xf32>
    %159 = arith.mulf %158, %22 : vector<8x32xf32>
    %160 = arith.addf %153, %159 : vector<8x32xf32>
    %161 = arith.mulf %142, %145 : vector<8x4xf32>
    %162 = vector.shape_cast %161 : vector<8x4xf32> to vector<8x4x1xf32>
    %163 = vector.shape_cast %162 : vector<8x4x1xf32> to vector<8x4x1xf32>
    %164 = vector.broadcast %163 : vector<8x4x1xf32> to vector<8x4x8xf32>
    %165 = vector.shape_cast %164 : vector<8x4x8xf32> to vector<8x32xf32>
    %166 = arith.mulf %165, %23 : vector<8x32xf32>
    %167 = arith.addf %160, %166 : vector<8x32xf32>
    %168 = tpu.concatenate %71, %119, %167 in 0 : vector<8x32xf32>, vector<8x32xf32>, vector<8x32xf32> -> vector<24x32xf32>
    %169 = arith.truncf %168 : vector<24x32xf32> to vector<24x32xbf16>
    %c0_29 = arith.constant 0 : index
    %c0_30 = arith.constant 0 : index
    %c0_31 = arith.constant 0 : index
    %170 = vector.load %arg5[%c0_29, %c0_30, %c0_31] : memref<1x32x32xbf16, #tpu.memory_space<vmem>>, vector<1x32x32xbf16>
    %171 = vector.shape_cast %170 : vector<1x32x32xbf16> to vector<32x32xbf16>
    %cst_32 = arith.constant dense<0.000000e+00> : vector<24x32xf32>
    %172 = tpu.matmul %169, %171, %cst_32 {dimension_numbers = #tpu.dot_dimension_numbers<[1], [0], [0], [1], [0, 0, 1, 1], [], []>} : vector<24x32xbf16>, vector<32x32xbf16>, vector<24x32xf32> -> vector<24x32xf32>
    %c0_33 = arith.constant 0 : index
    %c0_34 = arith.constant 0 : index
    %c0_35 = arith.constant 0 : index
    %173 = vector.load %arg6[%c0_33, %c0_34, %c0_35] : memref<1x1x32xf32, #tpu.memory_space<vmem>>, vector<1x1x32xf32>
    %174 = vector.shape_cast %173 : vector<1x1x32xf32> to vector<1x32xf32>
    %175 = vector.broadcast %174 : vector<1x32xf32> to vector<24x32xf32>
    %176 = arith.addf %172, %175 : vector<24x32xf32>
    %177 = arith.addf %3, %176 : vector<24x32xf32>
    %c0_36 = arith.constant 0 : index
    %c0_37 = arith.constant 0 : index
    %c0_38 = arith.constant 0 : index
    %178 = vector.load %arg7[%c0_36, %c0_37, %c0_38] : memref<1x1x32xf32, #tpu.memory_space<vmem>>, vector<1x1x32xf32>
    %179 = vector.shape_cast %178 : vector<1x1x32xf32> to vector<1x32xf32>
    %c0_39 = arith.constant 0 : index
    %c0_40 = arith.constant 0 : index
    %c0_41 = arith.constant 0 : index
    %180 = vector.load %arg8[%c0_39, %c0_40, %c0_41] : memref<1x1x32xf32, #tpu.memory_space<vmem>>, vector<1x1x32xf32>
    %181 = vector.shape_cast %180 : vector<1x1x32xf32> to vector<1x32xf32>
    %cst_42 = arith.constant dense<0.000000e+00> : vector<24xf32>
    %182 = vector.multi_reduction <add>, %177, %cst_42 [1] : vector<24x32xf32> to vector<24xf32>
    %183 = vector.shape_cast %182 : vector<24xf32> to vector<24x1xf32>
    %cst_43 = arith.constant 3.200000e+01 : f32
    %184 = vector.broadcast %cst_43 : f32 to vector<24x1xf32>
    %185 = arith.divf %183, %184 : vector<24x1xf32>
    %186 = vector.broadcast %185 : vector<24x1xf32> to vector<24x32xf32>
    %187 = arith.subf %177, %186 : vector<24x32xf32>
    %188 = arith.mulf %187, %187 : vector<24x32xf32>
    %cst_44 = arith.constant dense<0.000000e+00> : vector<24xf32>
    %189 = vector.multi_reduction <add>, %188, %cst_44 [1] : vector<24x32xf32> to vector<24xf32>
    %190 = vector.shape_cast %189 : vector<24xf32> to vector<24x1xf32>
    %cst_45 = arith.constant 3.200000e+01 : f32
    %191 = vector.broadcast %cst_45 : f32 to vector<24x1xf32>
    %192 = arith.divf %190, %191 : vector<24x1xf32>
    %cst_46 = arith.constant 9.99999974E-6 : f32
    %193 = vector.broadcast %cst_46 : f32 to vector<24x1xf32>
    %194 = arith.addf %192, %193 : vector<24x1xf32>
    %195 = math.rsqrt %194 : vector<24x1xf32>
    %196 = vector.broadcast %195 : vector<24x1xf32> to vector<24x32xf32>
    %197 = arith.mulf %187, %196 : vector<24x32xf32>
    %198 = vector.broadcast %179 : vector<1x32xf32> to vector<24x32xf32>
    %199 = arith.mulf %197, %198 : vector<24x32xf32>
    %200 = vector.broadcast %181 : vector<1x32xf32> to vector<24x32xf32>
    %201 = arith.addf %199, %200 : vector<24x32xf32>
    %202 = arith.truncf %201 : vector<24x32xf32> to vector<24x32xbf16>
    %c0_47 = arith.constant 0 : index
    %c0_48 = arith.constant 0 : index
    %c0_49 = arith.constant 0 : index
    %203 = vector.load %arg9[%c0_47, %c0_48, %c0_49] : memref<1x32x2048xbf16, #tpu.memory_space<vmem>>, vector<1x32x2048xbf16>
    %204 = vector.shape_cast %203 : vector<1x32x2048xbf16> to vector<32x2048xbf16>
    %cst_50 = arith.constant dense<0.000000e+00> : vector<24x2048xf32>
    %205 = tpu.matmul %202, %204, %cst_50 {dimension_numbers = #tpu.dot_dimension_numbers<[1], [0], [0], [1], [0, 0, 1, 1], [], []>} : vector<24x32xbf16>, vector<32x2048xbf16>, vector<24x2048xf32> -> vector<24x2048xf32>
    %c0_51 = arith.constant 0 : index
    %c0_52 = arith.constant 0 : index
    %c0_53 = arith.constant 0 : index
    %206 = vector.load %arg10[%c0_51, %c0_52, %c0_53] : memref<1x1x2048xf32, #tpu.memory_space<vmem>>, vector<1x1x2048xf32>
    %207 = vector.shape_cast %206 : vector<1x1x2048xf32> to vector<1x2048xf32>
    %208 = vector.broadcast %207 : vector<1x2048xf32> to vector<24x2048xf32>
    %209 = arith.addf %205, %208 : vector<24x2048xf32>
    %cst_54 = arith.constant 0.000000e+00 : f32
    %210 = vector.broadcast %cst_54 : f32 to vector<24x2048xf32>
    %211 = arith.maximumf %209, %210 : vector<24x2048xf32>
    %212 = arith.truncf %211 : vector<24x2048xf32> to vector<24x2048xbf16>
    %c0_55 = arith.constant 0 : index
    %c0_56 = arith.constant 0 : index
    %c0_57 = arith.constant 0 : index
    %213 = vector.load %arg11[%c0_55, %c0_56, %c0_57] : memref<1x2048x32xbf16, #tpu.memory_space<vmem>>, vector<1x2048x32xbf16>
    %214 = vector.shape_cast %213 : vector<1x2048x32xbf16> to vector<2048x32xbf16>
    %cst_58 = arith.constant dense<0.000000e+00> : vector<24x32xf32>
    %215 = tpu.matmul %212, %214, %cst_58 {dimension_numbers = #tpu.dot_dimension_numbers<[1], [0], [0], [1], [0, 0, 1, 1], [], []>} : vector<24x2048xbf16>, vector<2048x32xbf16>, vector<24x32xf32> -> vector<24x32xf32>
    %c0_59 = arith.constant 0 : index
    %c0_60 = arith.constant 0 : index
    %c0_61 = arith.constant 0 : index
    %216 = vector.load %arg12[%c0_59, %c0_60, %c0_61] : memref<1x1x32xf32, #tpu.memory_space<vmem>>, vector<1x1x32xf32>
    %217 = vector.shape_cast %216 : vector<1x1x32xf32> to vector<1x32xf32>
    %218 = vector.broadcast %217 : vector<1x32xf32> to vector<24x32xf32>
    %219 = arith.addf %215, %218 : vector<24x32xf32>
    %220 = arith.addf %201, %219 : vector<24x32xf32>
    %c0_62 = arith.constant 0 : index
    %c0_63 = arith.constant 0 : index
    %c0_64 = arith.constant 0 : index
    %221 = vector.load %arg13[%c0_62, %c0_63, %c0_64] : memref<1x1x32xf32, #tpu.memory_space<vmem>>, vector<1x1x32xf32>
    %222 = vector.shape_cast %221 : vector<1x1x32xf32> to vector<1x32xf32>
    %c0_65 = arith.constant 0 : index
    %c0_66 = arith.constant 0 : index
    %c0_67 = arith.constant 0 : index
    %223 = vector.load %arg14[%c0_65, %c0_66, %c0_67] : memref<1x1x32xf32, #tpu.memory_space<vmem>>, vector<1x1x32xf32>
    %224 = vector.shape_cast %223 : vector<1x1x32xf32> to vector<1x32xf32>
    %cst_68 = arith.constant dense<0.000000e+00> : vector<24xf32>
    %225 = vector.multi_reduction <add>, %220, %cst_68 [1] : vector<24x32xf32> to vector<24xf32>
    %226 = vector.shape_cast %225 : vector<24xf32> to vector<24x1xf32>
    %cst_69 = arith.constant 3.200000e+01 : f32
    %227 = vector.broadcast %cst_69 : f32 to vector<24x1xf32>
    %228 = arith.divf %226, %227 : vector<24x1xf32>
    %229 = vector.broadcast %228 : vector<24x1xf32> to vector<24x32xf32>
    %230 = arith.subf %220, %229 : vector<24x32xf32>
    %231 = arith.mulf %230, %230 : vector<24x32xf32>
    %cst_70 = arith.constant dense<0.000000e+00> : vector<24xf32>
    %232 = vector.multi_reduction <add>, %231, %cst_70 [1] : vector<24x32xf32> to vector<24xf32>
    %233 = vector.shape_cast %232 : vector<24xf32> to vector<24x1xf32>
    %cst_71 = arith.constant 3.200000e+01 : f32
    %234 = vector.broadcast %cst_71 : f32 to vector<24x1xf32>
    %235 = arith.divf %233, %234 : vector<24x1xf32>
    %cst_72 = arith.constant 9.99999974E-6 : f32
    %236 = vector.broadcast %cst_72 : f32 to vector<24x1xf32>
    %237 = arith.addf %235, %236 : vector<24x1xf32>
    %238 = math.rsqrt %237 : vector<24x1xf32>
    %239 = vector.broadcast %238 : vector<24x1xf32> to vector<24x32xf32>
    %240 = arith.mulf %230, %239 : vector<24x32xf32>
    %241 = vector.broadcast %222 : vector<1x32xf32> to vector<24x32xf32>
    %242 = arith.mulf %240, %241 : vector<24x32xf32>
    %243 = vector.broadcast %224 : vector<1x32xf32> to vector<24x32xf32>
    %244 = arith.addf %242, %243 : vector<24x32xf32>
    %c0_73 = arith.constant 0 : index
    %c0_74 = arith.constant 0 : index
    %245 = vector.load %arg16[%c0_73, %c0_74] : memref<24x32xf32, #tpu.memory_space<vmem>>, vector<24x32xf32>
    tpu.vector_store %arg16[%c0_73, %c0_74], %244 {strides = array<i32>} : memref<24x32xf32, #tpu.memory_space<vmem>>, vector<24x32xf32>,
    %c1_i32 = arith.constant 1 : i32
    %246 = arith.cmpi eq, %arg1, %c1_i32 : i32
    %247 = arith.extui %246 : i1 to i32
    %c0_i32_75 = arith.constant 0 : i32
    %248 = arith.cmpi ne, %247, %c0_i32_75 : i32
    scf.if %248 {
      %249 = vector.extract_strided_slice %244 {offsets = [16, 0], sizes = [8, 32], strides = [1, 1]} : vector<24x32xf32> to vector<8x32xf32>
      %c0_76 = arith.constant 0 : index
      %c0_77 = arith.constant 0 : index
      %250 = vector.load %arg15[%c0_76, %c0_77] : memref<8x32xf32, #tpu.memory_space<vmem>>, vector<8x32xf32>
      tpu.vector_store %arg15[%c0_76, %c0_77], %249 {strides = array<i32>} : memref<8x32xf32, #tpu.memory_space<vmem>>, vector<8x32xf32>,
    } else {
    }
    return
  }
  func.func @transform_0(%arg0: i32, %arg1: i32) -> (i32, i32, i32) {
    %c0_i32 = arith.constant 0 : i32
    %c0_i32_0 = arith.constant 0 : i32
    %c0_i32_1 = arith.constant 0 : i32
    return %c0_i32, %arg0, %c0_i32_0 : i32, i32, i32
  }
  func.func @transform_1(%arg0: i32, %arg1: i32) -> (i32, i32, i32) {
    %c0_i32 = arith.constant 0 : i32
    %c0_i32_0 = arith.constant 0 : i32
    %c0_i32_1 = arith.constant 0 : i32
    return %arg1, %c0_i32, %c0_i32_0 : i32, i32, i32
  }
  func.func @transform_2(%arg0: i32, %arg1: i32) -> (i32, i32, i32) {
    %c0_i32 = arith.constant 0 : i32
    %c0_i32_0 = arith.constant 0 : i32
    %c0_i32_1 = arith.constant 0 : i32
    return %arg1, %c0_i32, %c0_i32_0 : i32, i32, i32
  }
  func.func @transform_3(%arg0: i32, %arg1: i32) -> (i32, i32, i32) {
    %c0_i32 = arith.constant 0 : i32
    %c0_i32_0 = arith.constant 0 : i32
    %c0_i32_1 = arith.constant 0 : i32
    return %arg1, %c0_i32, %c0_i32_0 : i32, i32, i32
  }
  func.func @transform_4(%arg0: i32, %arg1: i32) -> (i32, i32, i32) {
    %c0_i32 = arith.constant 0 : i32
    %c0_i32_0 = arith.constant 0 : i32
    %c0_i32_1 = arith.constant 0 : i32
    return %arg1, %c0_i32, %c0_i32_0 : i32, i32, i32
  }
  func.func @transform_5(%arg0: i32, %arg1: i32) -> (i32, i32, i32) {
    %c0_i32 = arith.constant 0 : i32
    %c0_i32_0 = arith.constant 0 : i32
    %c0_i32_1 = arith.constant 0 : i32
    return %arg1, %c0_i32, %c0_i32_0 : i32, i32, i32
  }
  func.func @transform_6(%arg0: i32, %arg1: i32) -> (i32, i32, i32) {
    %c0_i32 = arith.constant 0 : i32
    %c0_i32_0 = arith.constant 0 : i32
    %c0_i32_1 = arith.constant 0 : i32
    return %arg1, %c0_i32, %c0_i32_0 : i32, i32, i32
  }
  func.func @transform_7(%arg0: i32, %arg1: i32) -> (i32, i32, i32) {
    %c0_i32 = arith.constant 0 : i32
    %c0_i32_0 = arith.constant 0 : i32
    %c0_i32_1 = arith.constant 0 : i32
    return %arg1, %c0_i32, %c0_i32_0 : i32, i32, i32
  }
  func.func @transform_8(%arg0: i32, %arg1: i32) -> (i32, i32, i32) {
    %c0_i32 = arith.constant 0 : i32
    %c0_i32_0 = arith.constant 0 : i32
    %c0_i32_1 = arith.constant 0 : i32
    return %arg1, %c0_i32, %c0_i32_0 : i32, i32, i32
  }
  func.func @transform_9(%arg0: i32, %arg1: i32) -> (i32, i32, i32) {
    %c0_i32 = arith.constant 0 : i32
    %c0_i32_0 = arith.constant 0 : i32
    %c0_i32_1 = arith.constant 0 : i32
    return %arg1, %c0_i32, %c0_i32_0 : i32, i32, i32
  }
  func.func @transform_10(%arg0: i32, %arg1: i32) -> (i32, i32, i32) {
    %c0_i32 = arith.constant 0 : i32
    %c0_i32_0 = arith.constant 0 : i32
    %c0_i32_1 = arith.constant 0 : i32
    return %arg1, %c0_i32, %c0_i32_0 : i32, i32, i32
  }
  func.func @transform_11(%arg0: i32, %arg1: i32) -> (i32, i32, i32) {
    %c0_i32 = arith.constant 0 : i32
    %c0_i32_0 = arith.constant 0 : i32
    %c0_i32_1 = arith.constant 0 : i32
    return %arg1, %c0_i32, %c0_i32_0 : i32, i32, i32
  }
  func.func @transform_12(%arg0: i32, %arg1: i32) -> (i32, i32, i32) {
    %c0_i32 = arith.constant 0 : i32
    %c0_i32_0 = arith.constant 0 : i32
    %c0_i32_1 = arith.constant 0 : i32
    return %arg1, %c0_i32, %c0_i32_0 : i32, i32, i32
  }
  func.func @transform_13(%arg0: i32, %arg1: i32) -> (i32, i32) {
    %c0_i32 = arith.constant 0 : i32
    %c0_i32_0 = arith.constant 0 : i32
    return %arg0, %c0_i32 : i32, i32
  }
}

</mosaic_0001>

<bundles_post_ra>
// kernel: tpu_custom_call.1
= control target key start
LH: loop header
LB: loop body
LE: loop exit
PB: predicated region body
PF: predicated region fallthrough
CT: control target
= control target key end

     0   :  { %s8585_s0 = inlined_call_operand.vmem [shape: bf16[3,8,32], index: 0, kind: input, shape index: {}]   ;;  %s8586_s1 = inlined_call_operand.vmem [shape: bf16[2,32,96], index: 1, kind: input, shape index: {}]   ;;  %s8587_s2 = inlined_call_operand.vmem [shape: f32[2,1,96], index: 2, kind: input, shape index: {}]   ;;  %s8588_s3 = inlined_call_operand.vmem [shape: bf16[2,32,32], index: 3, kind: input, shape index: {}]   ;;  %s8589_s4 = inlined_call_operand.vmem [shape: f32[2,1,32], index: 4, kind: input, shape index: {}]   ;;  %s8590_s5 = inlined_call_operand.vmem [shape: f32[2,1,32], index: 5, kind: input, shape index: {}]   ;;  %s8591_s6 = inlined_call_operand.vmem [shape: f32[2,1,32], index: 6, kind: input, shape index: {}]   ;;  %s8592_s7 = inlined_call_operand.vmem [shape: bf16[2,32,2048], index: 7, kind: input, shape index: {}]   ;;  %s8593_s8 = inlined_call_operand.vmem [shape: f32[2,1,2048], index: 8, kind: input, shape index: {}]   ;;  %s8594_s9 = inlined_call_operand.vmem [shape: bf16[2,2048,32], index: 9, kind: input, shape index: {}]   ;;  %s8595_s10 = inlined_call_operand.vmem [shape: f32[2,1,32], index: 10, kind: input, shape index: {}]   ;;  %s8596_s11 = inlined_call_operand.vmem [shape: f32[2,1,32], index: 11, kind: input, shape index: {}]   ;;  %s8597_s12 = inlined_call_operand.vmem [shape: f32[2,1,32], index: 12, kind: input, shape index: {}]   ;;  %s8598_s13 = inlined_call_operand.hbm [shape: f32[8,32], index: 13, kind: output, shape index: {}]  }
   0x1   :  { %8613 = sst [smem:[#allocation30_spill]] %s8585_s0 }
   0x2   :  { %8614 = sst [smem:[#allocation31_spill]] %s8586_s1 }
   0x3   :  { %8615 = sst [smem:[#allocation32_spill]] %s8588_s3 }
   0x4   :  { %8616 = sst [smem:[#allocation33_spill]] %s8598_s13 }
   0x5   :  { %18 = vsyncpa [#allocation4], 0  ;;  %s6301_s25 = smov 0   ;;  %s6303_s26 = smov 0  }
   0x6   :  { %s6305_s27 = smov 0  }
   0x7 LB: > { %8617 = sst [smem:[#allocation6_spill]] %s6213_s26  ;;  %s33_s29 = sadd.s32 1, %s6213_s26  ;;  %s6217_s27 = sphi %s6305_s27, %s24_s27   ;;  %s6213_s26 = sphi %s6303_s26, %s8699_s26   ;;  %s6209_s25 = sphi %s6301_s25, %s8698_s25  }
   0x8   : > { %8618 = sst [smem:[#allocation7_spill]] %s6217_s27  ;;  %p34_p0 = scmp.ge.s32.totalorder %s33_s29, 2 }
   0x9   : > { %p5021_p1 = scmp.ge.s32.totalorder %s6217_s27, 1  ;;  %p504_p2 = scmp.lt.s32.totalorder %s6217_s27, 3 }
   0xa   : > { %s8701_s29 = smov (%p34_p0, %s33_s29), 0 }
   0xb   : > { %8619 = sst [smem:[#allocation8_spill]] %s8701_s29  ;;  %p505_p3 = pnand %p5021_p1, %p504_p2 }
   0xd   : > { %508 = sbr.rel (%p505_p3) target bundleno = 2069 (0x815), region = 72 }
  0x12   : > { %p591_p4 = scmp.lt.s32.totalorder %s6209_s25, 1  ;;  %s8620_s1 = sld [smem:[#allocation31_spill]] }
  0x13   : > { %s8621_s3 = sld [smem:[#allocation32_spill]]  ;;  %p5031_p5 = scmp.ne.s32.totalorder %s6209_s25, 0 }
  0x14   : > { %s6324_s30 = scalar_select %p591_p4, %s6209_s25, 1 }
  0x15   : > { %s8622_s29 = sld [smem:[#allocation30_spill]] (!%p5031_p5) }
  0x16   : > { %s5729_s14 = sshll.u32 %s6324_s30, 4  ;;  %s5731_s17 = sshll.u32 %s6324_s30, 8 }
  0x17   : > { %s5732_s28 = sshll.u32 %s6324_s30, 10  ;;  %s629_s13 = scalar_lea.vmem %s8595_s10, %s6324_s30 }
  0x18   : > { %s595_s20 = scalar_lea.vmem %s8620_s1, %s5729_s14  ;;  %s6355_s1 = scalar_lea.vmem %s8592_s7, %s5731_s17 }
  0x19   : > { %s6337_s23 = scalar_lea.vmem %s8621_s3, %s5729_s14  ;;  %s6360_s3 = scalar_lea.vmem %s8593_s8, %s5729_s14 }
  0x1a   : > { %s6370_s0 = scalar_lea.vmem %s8594_s9, %s5732_s28  ;;  %s632_s17 = scalar_lea.vmem %s8596_s11, %s6324_s30 }
  0x1b   : > { %s635_s21 = scalar_lea.vmem %s8597_s12, %s6324_s30  ;;  %640 = sbr.rel (%p5031_p5) target bundleno = 38 (0x26), region = 76 }
  0x20   : > { %v5898_v0 = vld [vmem:[%s8622_s29] sm:$0xff]   ;;  %vm647_vm0 = vcmask 261120   ;;  %v643_v1 = vld [vmem:[%s8622_s29 + $0x8] sm:$0xf] }
  0x21   : > { %v5899_v2 = vunpack.c.l.bf16 %v5898_v0  ;;  %v5900_v3 = vunpack.c.h.bf16 %v5898_v0  ;;  %v646_v4 = vunpack.c.l.bf16 %v643_v1 }
  0x23   : > { %648 = vst.msk [vmem:[#allocation2] sm:$0xff] %vm647_vm0, %v5899_v2 }
  0x24   : > { %649 = vst.msk [vmem:[#allocation2 + $0x8] sm:$0xff] %vm647_vm0, %v5900_v3 }
  0x25   : > { %650 = vst.msk [vmem:[#allocation2 + $0x10] sm:$0xff] %vm647_vm0, %v646_v4 }
  0x26 PF: > { %v5734_v5 = vld [vmem:[%s595_s20 + $0x8] sm:$0xff]  ;;  %v5733_v6 = vld [vmem:[%s595_s20] sm:$0xff]  ;;  %vm676_vm1 = vcmask 261120   ;;  %s8623_s26 = scalar_lea.vmem %s8587_s2, %s6324_s30  ;;  %s6219_s20 = smov 64   ;;  %v6224_v38 = vmov 1983009808  }
  0x27   : > { %689 = vmatpush.bf16.msra.mxu0 %v5734_v5  ;;  %5901 = vmatpush.bf16.msra.mxu2 %v5734_v5  ;;  %v5947_v12 = vld [vmem:[%s8623_s26] ss:$0 sm:$0xff]  ;;  %s6220_s15 = smov 96   ;;  %s6221_s18 = smov 112   ;;  %v722_v39 = vunpack.c.l.s4 %v6224_v38  ;;  %vm717_vm2 = vcmask 1047556   ;;  %vm773_vm3 = vcmask 60416  }
  0x28   : > { %s6222_s19 = smov 104   ;;  %s6223_s14 = smov 120   ;;  %v6225_v47 = vmov 1934713408   ;;  %vm1200_vm4 = vcmask 64512   ;;  %vm1202_vm5 = vcmask 130048  }
  0x29   : > { %v6460_v42 = vunpack.c.0.s8 %v722_v39  ;;  %v746_v48 = vunpack.c.l.s4 %v6225_v47  ;;  %s6226_s22 = smov 16   ;;  %s6227_s24 = smov 24   ;;  %vm1204_vm6 = vcmask 195584  }
  0x2a   : > { %v651_v7 = vld [vmem:[#allocation2] sm:$0xff]  ;;  %s6228_s27 = smov 8   ;;  %s8689_s28 = scalar_lea.vmem %s8589_s4, %s6324_s30 }
  0x2b   : > { %v652_v8 = vld [vmem:[#allocation2 + $0x8] sm:$0xff]  ;;  %690 = vmatpush.bf16.msra.mxu0 %v5733_v6  ;;  %5902 = vmatpush.bf16.msra.mxu2 %v5733_v6  ;;  %v6472_v52 = vunpack.c.0.s8 %v746_v48  ;;  %p5724_p6 = scmp.ne.s32.totalorder %s6209_s25, 1 }
  0x2c   : > { %v653_v9 = vld [vmem:[#allocation2 + $0x10] sm:$0xff]  ;;  %v654_v10 = vpack.c.bf16 %v652_v8, %v651_v7 }
  0x2d   : > { %v655_v11 = vpack.c.bf16 %v653_v9, %v653_v9 }
  0x2e   : > { %5040 = vmatmul.msk.bf16.vlgmr.msra.gmra.mxu0 %vm676_vm1, %v654_v10 }
  0x2f   : > { %5041 = vmatmul.msk.bf16.vlgmr.msra.gmra.mxu2 %vm676_vm1, %v655_v11 }
  0xab   : > { %v692_v13 = vpop.f32.mrf.mxu0 }
  0xac   : > { %v693_v14 = vadd.f32 %v5947_v12, %v692_v13 }
  0xae   : > { %1206 = vrot.lane.b32.xlu1 %v693_v14, %s6219_s20  ;;  %702 = vrot.lane.b32.xlu0 %v693_v14, %s6220_s15 }
  0xb2   : > { %v697_v15 = vpop.f32.mrf.mxu2 }
  0xb3   : > { %v698_v16 = vadd.f32 %v5947_v12, %v697_v15  ;;  %v694_v17 = vpop.f32.mrf.mxu0 }
  0xb4   : > { %v695_v18 = vadd.f32 %v5947_v12, %v694_v17 }
  0xb6   : > { %910 = vrot.lane.b32.xlu1 %v698_v16, %s6220_s15  ;;  %807 = vrot.lane.b32.xlu0 %v695_v18, %s6220_s15  ;;  %s8690_s15 = scalar_lea.vmem %s8590_s5, %s6324_s30 }
  0xba   : > { %v699_v19 = vpop.f32.mrf.mxu2 }
  0xbe   : > { %1290 = vrot.lane.b32.xlu0 %v695_v18, %s6219_s20  ;;  %1374 = vrot.lane.b32.xlu1 %v698_v16, %s6219_s20 }
 0x120   : > { %v6394_v20 = vpop.permute.xlu1 %1206  ;;  %v703_v21 = vpop.permute.xlu0 %702 }
 0x121   : > { %8624 = vst [vmem:[#allocation9_spill] sm:$0xff] %v6394_v20  ;;  %v6396_v22 = vmul.f32 %v703_v21, %v693_v14  ;;  %v6398_v23 = vmul.f32 %v703_v21, %v695_v18  ;;  %v6400_v24 = vmul.f32 %v703_v21, %v698_v16 }
 0x123   : > { %2036 = vrot.lane.b32.xlu0 %v6400_v24, %s6221_s18  ;;  %1384 = vrot.lane.b32.xlu2 %v6398_v23, %s6221_s18  ;;  %v2044_v41 = vrot.slane %v6400_v24, 4  ;;  %v719_v59 = vrot.slane %v6396_v22, 4  ;;  %v1392_v3 = vrot.slane %v6398_v23, 4 }
 0x124   : > { %710 = vrot.lane.b32.xlu1 %v6396_v22, %s6221_s18 }
 0x128   : > { %v911_v25 = vpop.permute.xlu1 %910  ;;  %v808_v29 = vpop.permute.xlu0 %807 }
 0x129   : > { %v6408_v26 = vmul.f32 %v911_v25, %v693_v14  ;;  %v6414_v27 = vmul.f32 %v911_v25, %v695_v18  ;;  %v6423_v28 = vmul.f32 %v911_v25, %v698_v16  ;;  %v6428_v30 = vmul.f32 %v808_v29, %v693_v14 }
 0x12a   : > { %v6430_v31 = vmul.f32 %v808_v29, %v695_v18  ;;  %v6437_v32 = vmul.f32 %v808_v29, %v698_v16 }
 0x12b   : > { %918 = vrot.lane.b32.xlu0 %v6408_v26, %s6221_s18  ;;  %2039 = vrot.lane.b32.xlu2 %v6400_v24, %s6222_s19 }
 0x12c   : > { %713 = vrot.lane.b32.xlu1 %v6396_v22, %s6222_s19 }
 0x130   : > { %v6452_v35 = vpop.permute.xlu0 %1290  ;;  %v6454_v36 = vpop.permute.xlu1 %1374 }
 0x131   : > { %8625 = vst [vmem:[#allocation10_spill] sm:$0xff] %v6452_v35 }
 0x132   : > { %8626 = vst [vmem:[#allocation11_spill] sm:$0xff] %v6454_v36 }
 0x133   : > { %1582 = vrot.lane.b32.xlu0 %v6414_v27, %s6221_s18  ;;  %2033 = vrot.lane.b32.xlu2 %v6400_v24, %s6223_s14 }
 0x134   : > { %1387 = vrot.lane.b32.xlu1 %v6398_v23, %s6222_s19 }
 0x13b   : > { %921 = vrot.lane.b32.xlu0 %v6408_v26, %s6222_s19  ;;  %1579 = vrot.lane.b32.xlu2 %v6414_v27, %s6223_s14 }
 0x13c   : > { %707 = vrot.lane.b32.xlu1 %v6396_v22, %s6223_s14 }
 0x143   : > { %1585 = vrot.lane.b32.xlu0 %v6414_v27, %s6222_s19  ;;  %2231 = vrot.lane.b32.xlu2 %v6423_v28, %s6223_s14 }
 0x144   : > { %1381 = vrot.lane.b32.xlu1 %v6398_v23, %s6223_s14 }
 0x14b   : > { %1483 = vrot.lane.b32.xlu0 %v6430_v31, %s6221_s18  ;;  %815 = vrot.lane.b32.xlu2 %v6428_v30, %s6221_s18 }
 0x14c   : > { %915 = vrot.lane.b32.xlu1 %v6408_v26, %s6223_s14 }
 0x153   : > { %2138 = vrot.lane.b32.xlu0 %v6437_v32, %s6222_s19  ;;  %818 = vrot.lane.b32.xlu2 %v6428_v30, %s6222_s19 }
 0x154   : > { %2234 = vrot.lane.b32.xlu1 %v6423_v28, %s6221_s18 }
 0x15b   : > { %2132 = vrot.lane.b32.xlu0 %v6437_v32, %s6223_s14  ;;  %1486 = vrot.lane.b32.xlu2 %v6430_v31, %s6222_s19 }
 0x15c   : > { %2237 = vrot.lane.b32.xlu1 %v6423_v28, %s6222_s19 }
 0x163   : > { %812 = vrot.lane.b32.xlu2 %v6428_v30, %s6223_s14 }
 0x164   : > { %2135 = vrot.lane.b32.xlu1 %v6437_v32, %s6221_s18 }
 0x16b   : > { %1480 = vrot.lane.b32.xlu2 %v6430_v31, %s6223_s14  ;;  %s8693_s14 = scalar_lea.vmem %s8591_s6, %s6324_s30 }
 0x17d   : > { %v1385_v33 = vpop.permute.xlu2 %1384 }
 0x17e   : > { %v1390_v62 = vrot.slane %v1385_v33, 4  ;;  %v1393_v5 = vsel %vm717_vm2, %v1385_v33, %v1392_v3 }
 0x17f   : > { %v1401_v12 = vperm.slane %v1393_v5, %v6460_v42 }
 0x180   : > { %v1391_v2 = vsel %vm717_vm2, %v1390_v62, %v6398_v23 }
 0x181   : > { %v1397_v8 = vperm.slane %v1391_v2, %v6460_v42  ;;  %v1428_v38 = vrot.slane %v1401_v12, 4 }
 0x183   : > { %v1416_v21 = vrot.slane %v1397_v8, 4 }
 0x185   : > { %v6450_v34 = vpop.permute.xlu2 %2039 }
 0x18d   : > { %v6456_v37 = vpop.permute.xlu2 %2033 }
 0x18e   : > { %v2056_v40 = vrot.slane %v6456_v37, 4 }
 0x190   : > { %v2057_v44 = vsel %vm717_vm2, %v6450_v34, %v2056_v40 }
 0x191   : > { %v6469_v50 = vperm.slane %v2057_v44, %v6460_v42 }
 0x195   : > { %v2037_v43 = vpop.permute.xlu0 %2036  ;;  %v6481_v57 = vpop.permute.xlu2 %1579 }
 0x196   : > { %v711_v45 = vpop.permute.xlu1 %710  ;;  %v2045_v46 = vsel %vm717_vm2, %v2037_v43, %v2044_v41  ;;  %v2042_v10 = vrot.slane %v2037_v43, 4 }
 0x197   : > { %v6466_v49 = vperm.slane %v2045_v46, %v6460_v42  ;;  %v720_v60 = vsel %vm717_vm2, %v711_v45, %v719_v59  ;;  %v716_v9 = vrot.slane %v711_v45, 4  ;;  %v2054_v46 = vrot.slane %v6450_v34, 4 }
 0x198   : > { %v728_v63 = vperm.slane %v720_v60, %v6460_v42  ;;  %v2043_v25 = vsel %vm717_vm2, %v2042_v10, %v6400_v24 }
 0x199   : > { %v2080_v51 = vrot.slane %v6466_v49, 4  ;;  %v718_v23 = vsel %vm717_vm2, %v716_v9, %v6396_v22  ;;  %v2049_v22 = vperm.slane %v2043_v25, %v6460_v42 }
 0x19a   : > { %v755_v6 = vrot.slane %v728_v63, 4  ;;  %v724_v45 = vperm.slane %v718_v23, %v6460_v42 }
 0x19b   : > { %v2081_v53 = vsel %vm717_vm2, %v6469_v50, %v2080_v51  ;;  %v2068_v62 = vrot.slane %v2049_v22, 4 }
 0x19c   : > { %v6477_v54 = vperm.slane %v2081_v53, %v6472_v52  ;;  %v743_v60 = vrot.slane %v724_v45, 4 }
 0x19d   : > { %v6485_v61 = vpop.permute.xlu2 %2231 }
 0x19e   : > { %v714_v55 = vpop.permute.xlu1 %713  ;;  %v2116_v56 = vsel %vm773_vm3, %v6477_v54, 0.0 }
 0x19f   : > { %2117 = vadd.xlane.f32.xlu1 %v2116_v56  ;;  %v729_v29 = vrot.slane %v714_v55, 4  ;;  %v2055_v56 = vsel %vm717_vm2, %v2054_v46, %v6456_v37 }
 0x1a0   : > { %v2061_v2 = vperm.slane %v2055_v56, %v6460_v42 }
 0x1a2   : > { %v2069_v5 = vsel %vm717_vm2, %v2061_v2, %v2068_v62 }
 0x1a5   : > { %v6497_v14 = vpop.permute.xlu2 %815 }
 0x1a6   : > { %v1388_v58 = vpop.permute.xlu1 %1387 }
 0x1a7   : > { %v1402_v13 = vrot.slane %v1388_v58, 4 }
 0x1ad   : > { %v6529_v59 = vpop.permute.xlu2 %818 }
 0x1ae   : > { %v708_v0 = vpop.permute.xlu1 %707 }
 0x1af   : > { %v731_v1 = vrot.slane %v708_v0, 4  ;;  %v730_v40 = vsel %vm717_vm2, %v729_v29, %v708_v0 }
 0x1b0   : > { %v736_v53 = vperm.slane %v730_v40, %v6460_v42 }
 0x1b1   : > { %v732_v4 = vsel %vm717_vm2, %v714_v55, %v731_v1 }
 0x1b2   : > { %v740_v7 = vperm.slane %v732_v4, %v6460_v42  ;;  %v744_v37 = vsel %vm717_vm2, %v736_v53, %v743_v60  ;;  %v741_v23 = vrot.slane %v736_v53, 4 }
 0x1b4   : > { %v756_v11 = vsel %vm717_vm2, %v740_v7, %v755_v6  ;;  %v753_v51 = vrot.slane %v740_v7, 4  ;;  %v6543_v6 = vpop.permute.xlu0 %918  ;;  %v6546_v7 = vperm.slane %v744_v37, %v6472_v52 }
 0x1b5   : > { %v6500_v15 = vperm.slane %v756_v11, %v6472_v52 }
 0x1b6   : > { %v1382_v16 = vpop.permute.xlu1 %1381  ;;  %v754_v1 = vsel %vm717_vm2, %v753_v51, %v728_v63  ;;  %v780_v10 = vsel %vm773_vm3, %v6546_v7, 0.0 }
 0x1b7   : > { %v1403_v17 = vsel %vm717_vm2, %v1402_v13, %v1382_v16  ;;  %v1404_v18 = vrot.slane %v1382_v16, 4  ;;  %v792_v19 = vsel %vm773_vm3, %v6500_v15, 0.0  ;;  %v6540_v4 = vperm.slane %v754_v1, %v6472_v52  ;;  %v6556_v13 = vpop.permute.xlu2 %1486 }
 0x1b8   : > { %v1409_v33 = vperm.slane %v1403_v17, %v6460_v42  ;;  %793 = vadd.xlane.f32.xlu0 %v792_v19  ;;  %v2096_v16 = vrot.slane %v6477_v54, 4  ;;  %v2078_v17 = vrot.slane %v6469_v50, 4 }
 0x1b9   : > { %v1405_v39 = vsel %vm717_vm2, %v1388_v58, %v1404_v18  ;;  %v786_v9 = vsel %vm773_vm3, %v6540_v4, 0.0 }
 0x1ba   : > { %v1413_v41 = vperm.slane %v1405_v39, %v6460_v42  ;;  %v1414_v43 = vrot.slane %v1409_v33, 4  ;;  %v1417_v44 = vsel %vm717_vm2, %v1409_v33, %v1416_v21  ;;  %v2079_v21 = vsel %vm717_vm2, %v2078_v17, %v6466_v49 }
 0x1bb   : > { %v1425_v24 = vperm.slane %v1417_v44, %v6472_v52  ;;  %v2097_v25 = vsel %vm717_vm2, 0.0, %v2096_v16  ;;  %v6569_v29 = vperm.slane %v2079_v21, %v6472_v52  ;;  %v742_v33 = vsel %vm717_vm2, %v741_v23, %v724_v45 }
 0x1bc   : > { %v1429_v47 = vsel %vm717_vm2, %v1413_v41, %v1428_v38  ;;  %v1415_v48 = vsel %vm717_vm2, %v1414_v43, %v1397_v8  ;;  %v1426_v63 = vrot.slane %v1413_v41, 4  ;;  %v6549_v8 = vperm.slane %v2069_v5, %v6472_v52 }
 0x1bd   : > { %v6522_v55 = vperm.slane %v1429_v47, %v6472_v52  ;;  %v6527_v58 = vperm.slane %v1415_v48, %v6472_v52  ;;  %v1452_v34 = vsel %vm773_vm3, %v1425_v24, 0.0  ;;  %v2119_v50 = vsel %vm773_vm3, %v2097_v25, 0.0 }
 0x1be   : > { %v1427_v11 = vsel %vm717_vm2, %v1426_v63, %v1401_v12  ;;  %v2104_v18 = vsel %vm773_vm3, %v6549_v8, 0.0  ;;  %v6566_v12 = vpop.permute.xlu0 %1582  ;;  %v2066_v38 = vrot.slane %v2061_v2, 4  ;;  %v1440_v39 = vrot.slane %v1425_v24, 4  ;;  %v6575_v40 = vpop.permute.xlu1 %915 }
 0x1bf   : > { %v1464_v0 = vsel %vm773_vm3, %v6522_v55, 0.0  ;;  %v1446_v3 = vsel %vm773_vm3, %v6527_v58, 0.0  ;;  %v1433_v19 = vperm.slane %v1427_v11, %v6472_v52  ;;  %v821_v49 = vrot.slane %v6497_v14, 4  ;;  %v6579_v43 = vpop.permute.xlu2 %812 }
 0x1c0   : > { %1453 = vadd.xlane.f32.xlu0 %v1452_v34  ;;  %1465 = vadd.xlane.f32.xlu2 %v1464_v0  ;;  %v2110_v41 = vsel %vm773_vm3, %v6569_v29, 0.0  ;;  %v748_v44 = vperm.slane %v742_v33, %v6472_v52  ;;  %v2067_v46 = vsel %vm717_vm2, %v2066_v38, %v2049_v22  ;;  %v833_v47 = vrot.slane %v6529_v59, 4 }
 0x1c1   : > { %1447 = vadd.xlane.f32.xlu1 %v1446_v3  ;;  %v1458_v54 = vsel %vm773_vm3, %v1433_v19, 0.0  ;;  %v1441_v45 = vsel %vm717_vm2, 0.0, %v1440_v39  ;;  %v822_v24 = vsel %vm717_vm2, %v821_v49, %v6428_v30  ;;  %v2073_v51 = vperm.slane %v2067_v46, %v6472_v52 }
 0x1c2   : > { %v834_v48 = vsel %vm717_vm2, %v833_v47, %v6579_v43  ;;  %v774_v53 = vsel %vm773_vm3, %v748_v44, 0.0  ;;  %v1455_v34 = vsel %vm773_vm3, %v1441_v45, 0.0  ;;  %v771_v22 = vrot.slane %v6500_v15, 4 }
 0x1c3   : > { %v828_v60 = vperm.slane %v822_v24, %v6460_v42  ;;  %v840_v62 = vperm.slane %v834_v48, %v6460_v42  ;;  %v1438_v0 = vrot.slane %v6527_v58, 4  ;;  %v2098_v1 = vsel %vm773_vm3, %v2073_v51, 0.0 }
 0x1c4   : > { %v1444_v2 = vrot.slane %v6522_v55, 4  ;;  %v772_v3 = vsel %vm717_vm2, 0.0, %v771_v22  ;;  %v767_v55 = vrot.slane %v6546_v7, 4  ;;  %v1442_v16 = vrot.slane %v1433_v19, 4 }
 0x1c5   : > { %v845_v5 = vrot.slane %v840_v62, 4  ;;  %v1439_v63 = vsel %vm717_vm2, 0.0, %v1438_v0  ;;  %v847_v15 = vrot.slane %v828_v60, 4  ;;  %v765_v23 = vrot.slane %v748_v44, 4 }
 0x1c6   : > { %v6591_v56 = vpop.permute.xlu0 %921  ;;  %v6600_v37 = vpop.permute.xlu1 %2234  ;;  %v1449_v58 = vsel %vm773_vm3, %v1439_v63, 0.0  ;;  %v768_v25 = vsel %vm717_vm2, 0.0, %v767_v55  ;;  %v2254_v7 = vrot.slane %v6485_v61, 4  ;;  %v823_v49 = vrot.slane %v6428_v30, 4 }
 0x1c7   : > { %v6607_v11 = vsel %vm717_vm2, %v840_v62, %v847_v15  ;;  %v6612_v17 = vsel %vm717_vm2, %v845_v5, %v828_v60  ;;  %v783_v38 = vsel %vm773_vm3, %v768_v25, 0.0  ;;  %v766_v39 = vsel %vm717_vm2, 0.0, %v765_v23 }
 0x1c8   : > { %787 = vadd.xlane.f32.xlu0 %v786_v9  ;;  %781 = vadd.xlane.f32.xlu2 %v780_v10  ;;  %v795_v9 = vsel %vm773_vm3, %v772_v3, 0.0  ;;  %v1445_v10 = vsel %vm717_vm2, 0.0, %v1444_v2  ;;  %v2090_v46 = vrot.slane %v2073_v51, 4  ;;  %v2092_v45 = vrot.slane %v6549_v8, 4 }
 0x1c9   : > { %2105 = vadd.xlane.f32.xlu1 %v2104_v18  ;;  %v1467_v21 = vsel %vm773_vm3, %v1445_v10, 0.0  ;;  %v824_v24 = vsel %vm717_vm2, %v6497_v14, %v823_v49  ;;  %v777_v30 = vsel %vm773_vm3, %v766_v39, 0.0  ;;  %v1590_v51 = vrot.slane %v6414_v27, 4 }
 0x1ca   : > { %v1491_v22 = vrot.slane %v6430_v31, 4  ;;  %v2091_v62 = vsel %vm717_vm2, 0.0, %v2090_v46  ;;  %v1602_v0 = vrot.slane %v6481_v57, 4  ;;  %v936_v3 = vrot.slane %v6591_v56, 4 }
 0x1cb   : > { %v938_v5 = vrot.slane %v6575_v40, 4  ;;  %v924_v25 = vrot.slane %v6543_v6, 4 }
 0x1cc   : > { %v937_v55 = vsel %vm717_vm2, %v936_v3, %v6575_v40  ;;  %v1588_v40 = vrot.slane %v6566_v12, 4 }
 0x1cd   : > { %v943_v39 = vperm.slane %v937_v55, %v6460_v42 }
 0x1ce   : > { %v6614_v18 = vpop.permute.xlu0 %1585  ;;  %v6620_v33 = vpop.permute.xlu1 %2237 }
 0x1cf   : > { %v2255_v47 = vsel %vm717_vm2, %v6620_v33, %v2254_v7  ;;  %v1603_v46 = vsel %vm717_vm2, %v6614_v18, %v1602_v0 }
 0x1d0   : > { %1459 = vadd.xlane.f32.xlu0 %v1458_v54  ;;  %2120 = vadd.xlane.f32.xlu2 %v2119_v50  ;;  %v2242_v54 = vrot.slane %v6423_v28, 4  ;;  %v1443_v50 = vsel %vm717_vm2, 0.0, %v1442_v16  ;;  %v6650_v60 = vperm.slane %v2255_v47, %v6460_v42 }
 0x1d1   : > { %2111 = vadd.xlane.f32.xlu1 %v2110_v41  ;;  %v835_v41 = vrot.slane %v6579_v43, 4  ;;  %v1461_v44 = vsel %vm773_vm3, %v1443_v50, 0.0  ;;  %v926_v43 = vrot.slane %v6408_v26, 4 }
 0x1d2   : > { %v2243_v19 = vsel %vm717_vm2, %v6600_v37, %v2242_v54 }
 0x1d3   : > { %v6636_v48 = vperm.slane %v2243_v19, %v6460_v42  ;;  %v836_v8 = vsel %vm717_vm2, %v6529_v59, %v835_v41  ;;  %v927_v59 = vsel %vm717_vm2, %v6543_v6, %v926_v43  ;;  %v939_v19 = vsel %vm717_vm2, %v6591_v56, %v938_v5 }
 0x1d4   : > { %v6665_v15 = vperm.slane %v836_v8, %v6460_v42  ;;  %v6679_v54 = vperm.slane %v927_v59, %v6460_v42  ;;  %v1591_v6 = vsel %vm717_vm2, %v6566_v12, %v1590_v51  ;;  %v1600_v56 = vrot.slane %v6614_v18, 4 }
 0x1d5   : > { %v2278_v63 = vrot.slane %v6636_v48, 4  ;;  %v6706_v47 = vperm.slane %v939_v19, %v6460_v42  ;;  %v1589_v18 = vsel %vm717_vm2, %v1588_v40, %v6414_v27 }
 0x1d6   : > { %v6647_v14 = vpop.permute.xlu0 %1483  ;;  %v962_v51 = vrot.slane %v6679_v54, 4 }
 0x1d7   : > { %v2279_v23 = vsel %vm717_vm2, %v6650_v60, %v2278_v63 }
 0x1d8   : > { %775 = vadd.xlane.f32.xlu0 %v774_v53  ;;  %1456 = vadd.xlane.f32.xlu2 %v1455_v34  ;;  %v6638_v53 = vpop.permute.xlu2 %1480  ;;  %v769_v34 = vrot.slane %v6540_v4, 4  ;;  %v2093_v4 = vsel %vm717_vm2, 0.0, %v2092_v45  ;;  %v6697_v41 = vperm.slane %v2279_v23, %v6472_v52  ;;  %v925_v45 = vsel %vm717_vm2, %v924_v25, %v6408_v26 }
 0x1d9   : > { %2099 = vadd.xlane.f32.xlu1 %v2098_v1  ;;  %v6655_v1 = vperm.slane %v824_v24, %v6460_v42  ;;  %v1503_v2 = vrot.slane %v6638_v53, 4  ;;  %v2107_v16 = vsel %vm773_vm3, %v2093_v4, 0.0  ;;  %v1599_v24 = vperm.slane %v1591_v6, %v6460_v42 }
 0x1da   : > { %v770_v10 = vsel %vm717_vm2, 0.0, %v769_v34  ;;  %v948_v34 = vrot.slane %v943_v39, 4  ;;  %v2314_v8 = vsel %vm773_vm3, %v6697_v41, 0.0  ;;  %v931_v0 = vperm.slane %v925_v45, %v6460_v42 }
 0x1db   : > { %v859_v50 = vrot.slane %v6655_v1, 4  ;;  %v1504_v7 = vsel %vm717_vm2, %v6556_v13, %v1503_v2  ;;  %v1601_v2 = vsel %vm717_vm2, %v1600_v56, %v6481_v57  ;;  %v963_v27 = vsel %vm717_vm2, %v6706_v47, %v962_v51 }
 0x1dc   : > { %v1595_v4 = vperm.slane %v1589_v18, %v6460_v42  ;;  %v1626_v59 = vrot.slane %v1599_v24, 4  ;;  %v949_v5 = vsel %vm717_vm2, %v948_v34, %v931_v0  ;;  %v6739_v57 = vperm.slane %v963_v27, %v6472_v52  ;;  %v2136_v18 = vpop.permute.xlu1 %2135 }
 0x1dd   : > { %v860_v49 = vsel %vm717_vm2, %v6665_v15, %v859_v50  ;;  %v950_v56 = vrot.slane %v931_v0, 4  ;;  %v2240_v51 = vrot.slane %v6600_v37, 4  ;;  %v2294_v34 = vrot.slane %v6697_v41, 4 }
 0x1de   : > { %v6714_v43 = vperm.slane %v860_v49, %v6472_v52  ;;  %v1614_v55 = vrot.slane %v1595_v4, 4  ;;  %v998_v23 = vsel %vm773_vm3, %v6739_v57, 0.0  ;;  %v960_v0 = vrot.slane %v6706_v47, 4 }
 0x1df   : > { %v951_v45 = vsel %vm717_vm2, %v943_v39, %v950_v56  ;;  %v2295_v41 = vsel %vm717_vm2, 0.0, %v2294_v34  ;;  %v2276_v34 = vrot.slane %v6650_v60, 4 }
 0x1e0   : > { %796 = vadd.xlane.f32.xlu0 %v795_v9  ;;  %1450 = vadd.xlane.f32.xlu2 %v1449_v58  ;;  %v1492_v9 = vsel %vm717_vm2, %v6647_v14, %v1491_v22  ;;  %v2101_v58 = vsel %vm773_vm3, %v2091_v62, 0.0  ;;  %v1611_v22 = vperm.slane %v1603_v46, %v6460_v42  ;;  %v895_v3 = vsel %vm773_vm3, %v6714_v43, 0.0 }
 0x1e1   : > { %1468 = vadd.xlane.f32.xlu1 %v1467_v21  ;;  %v2094_v21 = vrot.slane %v6569_v29, 4  ;;  %v6688_v29 = vperm.slane %v1492_v9, %v6460_v42  ;;  %v1607_v9 = vperm.slane %v1601_v2, %v6460_v42  ;;  %v2241_v2 = vsel %vm717_vm2, %v2240_v51, %v6423_v28 }
 0x1e2   : > { %v961_v28 = vsel %vm717_vm2, %v960_v0, %v6679_v54  ;;  %v2277_v60 = vsel %vm717_vm2, %v2276_v34, %v6636_v48  ;;  %v1501_v48 = vrot.slane %v6556_v13, 4 }
 0x1e3   : > { %v2095_v12 = vsel %vm717_vm2, 0.0, %v2094_v21  ;;  %v1615_v25 = vsel %vm717_vm2, %v1607_v9, %v1614_v55 }
 0x1e4   : > { %v2113_v26 = vsel %vm773_vm3, %v2095_v12, 0.0  ;;  %v6756_v19 = vperm.slane %v1615_v25, %v6472_v52 }
 0x1e6   : > { %v1650_v49 = vsel %vm773_vm3, %v6756_v19, 0.0 }
 0x1e8   : > { %784 = vadd.xlane.f32.xlu0 %v783_v38  ;;  %1462 = vadd.xlane.f32.xlu2 %v1461_v44  ;;  %v789_v38 = vsel %vm773_vm3, %v770_v10, 0.0  ;;  %v6700_v44 = vperm.slane %v1504_v7, %v6460_v42  ;;  %v1627_v10 = vsel %vm717_vm2, %v1611_v22, %v1626_v59  ;;  %v6753_v7 = vpop.permute.xlu0 %2138  ;;  %v857_v59 = vrot.slane %v6665_v15, 4 }
 0x1e9   : > { %778 = vadd.xlane.f32.xlu1 %v777_v30  ;;  %v1527_v30 = vrot.slane %v6688_v29, 4  ;;  %v1635_v21 = vperm.slane %v1627_v10, %v6472_v52  ;;  %v2247_v10 = vperm.slane %v2241_v2, %v6460_v42  ;;  %v2317_v15 = vsel %vm773_vm3, %v2295_v41, 0.0 }
 0x1ea   : > { %v858_v55 = vsel %vm717_vm2, %v857_v59, %v6655_v1  ;;  %v1489_v2 = vrot.slane %v6647_v14, 4  ;;  %v6862_v59 = vperm.slane %v2277_v60, %v6472_v52 }
 0x1eb   : > { %v1528_v62 = vsel %vm717_vm2, %v6700_v44, %v1527_v30  ;;  %v1642_v40 = vrot.slane %v1635_v21, 4  ;;  %v1662_v46 = vsel %vm773_vm3, %v1635_v21, 0.0  ;;  %v2141_v21 = vrot.slane %v2136_v18, 4 }
 0x1ec   : > { %v6735_v63 = vperm.slane %v1528_v62, %v6472_v52  ;;  %v2252_v62 = vrot.slane %v6620_v33, 4  ;;  %v6808_v25 = vperm.slane %v858_v55, %v6472_v52 }
 0x1ed   : > { %v1643_v6 = vsel %vm717_vm2, 0.0, %v1642_v40 }
 0x1ee   : > { %v1665_v30 = vsel %vm773_vm3, %v1643_v6, 0.0  ;;  %v2253_v47 = vsel %vm717_vm2, %v2252_v62, %v6485_v61  ;;  %v2142_v6 = vsel %vm717_vm2, %v2141_v21, %v6437_v32 }
 0x1ef   : > { %v2259_v61 = vperm.slane %v2253_v47, %v6460_v42  ;;  %v978_v47 = vrot.slane %v6739_v57, 4  ;;  %v6887_v57 = vperm.slane %v6607_v11, %v6472_v52 }
 0x1f0   : > { %2102 = vadd.xlane.f32.xlu0 %v2101_v58  ;;  %2108 = vadd.xlane.f32.xlu2 %v2107_v16  ;;  %v6743_v58 = vperm.slane %v949_v5, %v6472_v52  ;;  %v1563_v16 = vsel %vm773_vm3, %v6735_v63, 0.0  ;;  %v2133_v39 = vpop.permute.xlu0 %2132 }
 0x1f1   : > { %790 = vadd.xlane.f32.xlu1 %v789_v38  ;;  %v1624_v38 = vrot.slane %v1611_v22, 4  ;;  %v2143_v22 = vrot.slane %v6437_v32, 4 }
 0x1f2   : > { %v980_v50 = vsel %vm773_vm3, %v6743_v58, 0.0 }
 0x1f3   : > { %v1625_v12 = vsel %vm717_vm2, %v1624_v38, %v1599_v24  ;;  %v1612_v24 = vrot.slane %v1607_v9, 4  ;;  %v2144_v37 = vsel %vm717_vm2, %v2136_v18, %v2143_v22  ;;  %v1525_v38 = vrot.slane %v6700_v44, 4 }
 0x1f4   : > { %v6789_v9 = vperm.slane %v2144_v37, %v6460_v42  ;;  %v2264_v18 = vrot.slane %v2259_v61, 4 }
 0x1f5   : > { %v1613_v33 = vsel %vm717_vm2, %v1612_v24, %v1595_v4  ;;  %v1526_v32 = vsel %vm717_vm2, %v1525_v38, %v6688_v29 }
 0x1f6   : > { %v6798_v4 = vperm.slane %v1613_v33, %v6472_v52  ;;  %v2179_v54 = vrot.slane %v6789_v9, 4  ;;  %v6840_v24 = vperm.slane %v1526_v32, %v6472_v52  ;;  %v2308_v33 = vsel %vm773_vm3, %v6862_v59, 0.0 }
 0x1f8   : > { %2315 = vadd.xlane.f32.xlu0 %v2314_v8  ;;  %2114 = vadd.xlane.f32.xlu2 %v2113_v26  ;;  %v6768_v8 = vperm.slane %v1625_v12, %v6472_v52  ;;  %v6772_v26 = vperm.slane %v951_v45, %v6472_v52  ;;  %v1644_v40 = vsel %vm773_vm3, %v6798_v4, 0.0  ;;  %v889_v12 = vsel %vm773_vm3, %v6808_v25, 0.0 }
 0x1f9   : > { %896 = vadd.xlane.f32.xlu1 %v895_v3  ;;  %v2155_v3 = vrot.slane %v2133_v39, 4  ;;  %v6826_v45 = vperm.slane %v2142_v6, %v6460_v42  ;;  %v1543_v6 = vrot.slane %v6735_v63, 4 }
 0x1fa   : > { %v1656_v27 = vsel %vm773_vm3, %v6768_v8, 0.0  ;;  %v986_v5 = vsel %vm773_vm3, %v6772_v26, 0.0 }
 0x1fb   : > { %v2167_v0 = vrot.slane %v6826_v45, 4 }
 0x200   : > { %1564 = vadd.xlane.f32.xlu0 %v1563_v16  ;;  %999 = vadd.xlane.f32.xlu2 %v998_v23  ;;  %v2156_v16 = vsel %vm717_vm2, %v6753_v7, %v2155_v3  ;;  %v6804_v23 = vperm.slane %v961_v28, %v6472_v52  ;;  %v1502_v28 = vsel %vm717_vm2, %v1501_v48, %v6638_v53  ;;  %v1638_v48 = vrot.slane %v6756_v19, 4 }
 0x201   : > { %981 = vadd.xlane.f32.xlu1 %v980_v50  ;;  %v2266_v50 = vrot.slane %v2247_v10, 4  ;;  %v6811_v1 = vperm.slane %v2156_v16, %v6460_v42  ;;  %v1508_v55 = vperm.slane %v1502_v28, %v6460_v42 }
 0x202   : > { %v1639_v28 = vsel %vm717_vm2, 0.0, %v1638_v48 }
 0x203   : > { %v2267_v56 = vsel %vm717_vm2, %v2259_v61, %v2266_v50  ;;  %v979_v61 = vsel %vm717_vm2, 0.0, %v978_v47  ;;  %v883_v50 = vsel %vm773_vm3, %v6887_v57, 0.0 }
 0x204   : > { %v6829_v44 = vperm.slane %v2267_v56, %v6472_v52  ;;  %v1001_v21 = vsel %vm773_vm3, %v979_v61, 0.0 }
 0x206   : > { %v2302_v62 = vsel %vm773_vm3, %v6829_v44, 0.0 }
 0x208   : > { %1651 = vadd.xlane.f32.xlu0 %v1650_v49  ;;  %1663 = vadd.xlane.f32.xlu2 %v1662_v46  ;;  %v992_v49 = vsel %vm773_vm3, %v6804_v23, 0.0  ;;  %v2180_v46 = vsel %vm717_vm2, %v6811_v1, %v2179_v54 }
 0x209   : > { %1666 = vadd.xlane.f32.xlu1 %v1665_v30  ;;  %v2153_v30 = vrot.slane %v6753_v7, 4  ;;  %v6835_v51 = vperm.slane %v2180_v46, %v6472_v52  ;;  %v2265_v7 = vsel %vm717_vm2, %v2264_v18, %v2247_v10  ;;  %v6907_v46 = vperm.slane %v6612_v17, %v6472_v52 }
 0x20a   : > { %v6857_v41 = vperm.slane %v2265_v7, %v6472_v52  ;;  %v2177_v18 = vrot.slane %v6811_v1, 4  ;;  %v972_v1 = vrot.slane %v6743_v58, 4 }
 0x20b   : > { %v2154_v22 = vsel %vm717_vm2, %v2153_v30, %v2133_v39  ;;  %v2215_v29 = vsel %vm773_vm3, %v6835_v51, 0.0  ;;  %v1557_v39 = vsel %vm773_vm3, %v6840_v24, 0.0  ;;  %v1544_v30 = vsel %vm717_vm2, 0.0, %v1543_v6 }
 0x20c   : > { %v6849_v37 = vperm.slane %v2154_v22, %v6460_v42  ;;  %v2296_v14 = vsel %vm773_vm3, %v6857_v41, 0.0  ;;  %v877_v63 = vsel %vm773_vm3, %v6907_v46, 0.0  ;;  %v2178_v17 = vsel %vm717_vm2, %v2177_v18, %v6789_v9 }
 0x20d   : > { %v1566_v22 = vsel %vm773_vm3, %v1544_v30, 0.0  ;;  %v6930_v7 = vperm.slane %v2178_v17, %v6472_v52  ;;  %v2290_v6 = vrot.slane %v6829_v44, 4  ;;  %v871_v30 = vrot.slane %v6887_v57, 4 }
 0x20e   : > { %v2165_v60 = vrot.slane %v6849_v37, 4  ;;  %v2195_v57 = vrot.slane %v6835_v51, 4 }
 0x20f   : > { %v872_v44 = vsel %vm717_vm2, 0.0, %v871_v30 }
 0x210   : > { %1657 = vadd.xlane.f32.xlu0 %v1656_v27  ;;  %987 = vadd.xlane.f32.xlu2 %v986_v5  ;;  %v2168_v27 = vsel %vm717_vm2, %v6849_v37, %v2167_v0  ;;  %v1490_v5 = vsel %vm717_vm2, %v1489_v2, %v6430_v31  ;;  %v973_v2 = vsel %vm717_vm2, 0.0, %v972_v1  ;;  %v2166_v58 = vsel %vm717_vm2, %v2165_v60, %v6826_v45 }
 0x211   : > { %2318 = vadd.xlane.f32.xlu1 %v2317_v15  ;;  %v6865_v3 = vperm.slane %v2168_v27, %v6472_v52  ;;  %v1496_v10 = vperm.slane %v1490_v5, %v6460_v42  ;;  %v974_v15 = vrot.slane %v6772_v26, 4  ;;  %v2209_v27 = vsel %vm773_vm3, %v6930_v7, 0.0 }
 0x212   : > { %v6889_v53 = vpop.xlane.xlu1 %2117  ;;  %v983_v5 = vsel %vm773_vm3, %v973_v2, 0.0  ;;  %v873_v1 = vrot.slane %v6808_v25, 4  ;;  %v886_v60 = vsel %vm773_vm3, %v872_v44, 0.0  ;;  %v869_v2 = vrot.slane %v6907_v46, 4 }
 0x213   : > { %v2203_v13 = vsel %vm773_vm3, %v6865_v3, 0.0  ;;  %v1515_v16 = vrot.slane %v1496_v10, 4  ;;  %v975_v54 = vsel %vm717_vm2, 0.0, %v974_v15  ;;  %v875_v15 = vrot.slane %v6714_v43, 4 }
 0x214   : > { %v2196_v48 = vsel %vm717_vm2, 0.0, %v2195_v57  ;;  %v870_v25 = vsel %vm717_vm2, 0.0, %v869_v2  ;;  %v2288_v46 = vrot.slane %v6857_v41, 4 }
 0x215   : > { %v1516_v26 = vsel %vm717_vm2, %v1508_v55, %v1515_v16  ;;  %v2292_v16 = vrot.slane %v6862_v59, 4  ;;  %v976_v59 = vrot.slane %v6804_v23, 4  ;;  %v2218_v51 = vsel %vm773_vm3, %v2196_v48, 0.0 }
 0x216   : > { %v6900_v11 = vperm.slane %v1516_v26, %v6472_v52 }
 0x217   : > { %v2293_v43 = vsel %vm717_vm2, 0.0, %v2292_v16 }
 0x218   : > { %1645 = vadd.xlane.f32.xlu0 %v1644_v40  ;;  %993 = vadd.xlane.f32.xlu2 %v992_v49  ;;  %v989_v40 = vsel %vm773_vm3, %v975_v54, 0.0  ;;  %v1513_v49 = vrot.slane %v1508_v55, 4  ;;  %v1551_v32 = vsel %vm773_vm3, %v6900_v11, 0.0  ;;  %v876_v54 = vsel %vm717_vm2, 0.0, %v875_v15 }
 0x219   : > { %890 = vadd.xlane.f32.xlu1 %v889_v12 }
 0x21a   : > { %v1514_v34 = vsel %vm717_vm2, %v1513_v49, %v1496_v10  ;;  %v2311_v49 = vsel %vm773_vm3, %v2293_v43, 0.0 }
 0x21b   : > { %v6924_v0 = vperm.slane %v1514_v34, %v6472_v52  ;;  %v977_v34 = vsel %vm717_vm2, 0.0, %v976_v59 }
 0x21c   : > { %v995_v23 = vsel %vm773_vm3, %v977_v34, 0.0 }
 0x21d   : > { %v1545_v9 = vsel %vm773_vm3, %v6924_v0, 0.0 }
 0x220   : > { %2303 = vadd.xlane.f32.xlu0 %v2302_v62  ;;  %2216 = vadd.xlane.f32.xlu2 %v2215_v29 }
 0x221   : > { %1558 = vadd.xlane.f32.xlu1 %v1557_v39 }
 0x228   : > { %2297 = vadd.xlane.f32.xlu0 %v2296_v14  ;;  %2309 = vadd.xlane.f32.xlu2 %v2308_v33  ;;  %v1640_v14 = vrot.slane %v6768_v8, 4  ;;  %v6948_v33 = vperm.slane %v2166_v58, %v6472_v52  ;;  %v1636_v8 = vrot.slane %v6798_v4, 4  ;;  %v874_v58 = vsel %vm717_vm2, 0.0, %v873_v1 }
 0x229   : > { %2204 = vadd.xlane.f32.xlu1 %v2203_v13  ;;  %v1653_v13 = vsel %vm773_vm3, %v1639_v28, 0.0  ;;  %v2191_v28 = vrot.slane %v6865_v3, 4 }
 0x22a   : > { %v1641_v45 = vsel %vm717_vm2, 0.0, %v1640_v14  ;;  %v2197_v19 = vsel %vm773_vm3, %v6948_v33, 0.0  ;;  %v892_v14 = vsel %vm773_vm3, %v874_v58, 0.0 }
 0x22b   : > { %v6880_v31 = vpop.xlane.xlu0 %793  ;;  %v1659_v55 = vsel %vm773_vm3, %v1641_v45, 0.0  ;;  %v880_v45 = vsel %vm773_vm3, %v870_v25, 0.0 }
 0x230   : > { %1002 = vadd.xlane.f32.xlu0 %v1001_v21  ;;  %884 = vadd.xlane.f32.xlu2 %v883_v50  ;;  %v1637_v50 = vsel %vm717_vm2, 0.0, %v1636_v8  ;;  %v2192_v8 = vsel %vm717_vm2, 0.0, %v2191_v28 }
 0x231   : > { %990 = vadd.xlane.f32.xlu1 %v989_v40  ;;  %v898_v40 = vsel %vm773_vm3, %v876_v54, 0.0  ;;  %v1647_v4 = vsel %vm773_vm3, %v1637_v50, 0.0  ;;  %v2206_v54 = vsel %vm773_vm3, %v2192_v8, 0.0  ;;  %v2189_v50 = vrot.slane %v6948_v33, 4 }
 0x233   : > { %v6897_v38 = vpop.xlane.xlu0 %1453  ;;  %v6903_v56 = vpop.xlane.xlu2 %1465  ;;  %v2190_v59 = vsel %vm717_vm2, 0.0, %v2189_v50 }
 0x234   : > { %v6909_v12 = vpop.xlane.xlu1 %1447  ;;  %v1476_v57 = vmul.f32 0.35355338, %v6903_v56 }
 0x238   : > { %1552 = vadd.xlane.f32.xlu0 %v1551_v32  ;;  %878 = vadd.xlane.f32.xlu2 %v877_v63  ;;  %v2291_v63 = vsel %vm717_vm2, 0.0, %v2290_v6 }
 0x239   : > { %1567 = vadd.xlane.f32.xlu1 %v1566_v22  ;;  %v2305_v22 = vsel %vm773_vm3, %v2291_v63, 0.0  ;;  %v804_v63 = vmul.f32 0.35355338, %v6880_v31 }
 0x23b   : > { %v6921_v62 = vpop.xlane.xlu0 %787  ;;  %v6927_v29 = vpop.xlane.xlu2 %781 }
 0x23c   : > { %v6933_v39 = vpop.xlane.xlu1 %2105 }
 0x240   : > { %1546 = vadd.xlane.f32.xlu0 %v1545_v9  ;;  %2210 = vadd.xlane.f32.xlu2 %v2209_v27 }
 0x241   : > { %984 = vadd.xlane.f32.xlu1 %v983_v5 }
 0x243   : > { %v6944_v37 = vpop.xlane.xlu0 %1459  ;;  %v6950_v47 = vpop.xlane.xlu2 %2120 }
 0x244   : > { %v6953_v10 = vpop.xlane.xlu1 %2111 }
 0x248   : > { %2198 = vadd.xlane.f32.xlu0 %v2197_v19  ;;  %1654 = vadd.xlane.f32.xlu2 %v1653_v13  ;;  %v1541_v13 = vrot.slane %v6840_v24, 4  ;;  %v1539_v24 = vrot.slane %v6900_v11, 4  ;;  %v2200_v11 = vsel %vm773_vm3, %v2190_v59, 0.0 }
 0x249   : > { %1660 = vadd.xlane.f32.xlu1 %v1659_v55  ;;  %v2289_v55 = vsel %vm717_vm2, 0.0, %v2288_v46 }
 0x24a   : > { %v1542_v3 = vsel %vm717_vm2, 0.0, %v1541_v13  ;;  %v2299_v41 = vsel %vm773_vm3, %v2289_v55, 0.0 }
 0x24b   : > { %v6962_v61 = vpop.xlane.xlu0 %775  ;;  %v6965_v21 = vpop.xlane.xlu2 %1456  ;;  %v1560_v43 = vsel %vm773_vm3, %v1542_v3, 0.0 }
 0x24c   : > { %v6969_v26 = vpop.xlane.xlu1 %2099 }
 0x250   : > { %899 = vadd.xlane.f32.xlu0 %v898_v40  ;;  %1648 = vadd.xlane.f32.xlu2 %v1647_v4  ;;  %v2193_v4 = vrot.slane %v6930_v7, 4  ;;  %v1537_v7 = vrot.slane %v6924_v0, 4 }
 0x251   : > { %2312 = vadd.xlane.f32.xlu1 %v2311_v49  ;;  %v1540_v49 = vsel %vm717_vm2, 0.0, %v1539_v24 }
 0x252   : > { %v2194_v34 = vsel %vm717_vm2, 0.0, %v2193_v4  ;;  %v1554_v44 = vsel %vm773_vm3, %v1540_v49, 0.0  ;;  %v1538_v58 = vsel %vm717_vm2, 0.0, %v1537_v7 }
 0x253   : > { %v6977_v32 = vpop.xlane.xlu0 %796  ;;  %v6980_v18 = vpop.xlane.xlu2 %1450 }
 0x254   : > { %v6984_v17 = vpop.xlane.xlu1 %1468 }
 0x258   : > { %2306 = vadd.xlane.f32.xlu0 %v2305_v22  ;;  %996 = vadd.xlane.f32.xlu2 %v995_v23  ;;  %v2212_v23 = vsel %vm773_vm3, %v2194_v34, 0.0 }
 0x259   : > { %887 = vadd.xlane.f32.xlu1 %v886_v60 }
 0x25b   : > { %v6992_v9 = vpop.xlane.xlu0 %784  ;;  %v6995_v27 = vpop.xlane.xlu2 %1462 }
 0x25c   : > { %v6999_v5 = vpop.xlane.xlu1 %778 }
 0x260   : > { %893 = vadd.xlane.f32.xlu0 %v892_v14  ;;  %2219 = vadd.xlane.f32.xlu2 %v2218_v51  ;;  %v1548_v51 = vsel %vm773_vm3, %v1538_v58, 0.0 }
 0x261   : > { %881 = vadd.xlane.f32.xlu1 %v880_v45 }
 0x263   : > { %v7007_v19 = vpop.xlane.xlu0 %2102  ;;  %v7010_v15 = vpop.xlane.xlu2 %2108 }
 0x264   : > { %v7014_v16 = vpop.xlane.xlu1 %790 }
 0x268   : > { %2207 = vadd.xlane.f32.xlu0 %v2206_v54  ;;  %2300 = vadd.xlane.f32.xlu2 %v2299_v41 }
 0x269   : > { %1561 = vadd.xlane.f32.xlu1 %v1560_v43 }
 0x26b   : > { %v7022_v40 = vpop.xlane.xlu0 %2315  ;;  %v7025_v6 = vpop.xlane.xlu2 %2114 }
 0x26c   : > { %v897_v30 = vpop.xlane.xlu1 %896 }
 0x26d   : > { %v907_v33 = vmul.f32 0.35355338, %v897_v30 }
 0x26f   : > { %v1018_v22 = vmax.f32 %v804_v63, %v907_v33 }
 0x270   : > { %2201 = vadd.xlane.f32.xlu0 %v2200_v11  ;;  %1555 = vadd.xlane.f32.xlu2 %v1554_v44 }
 0x271   : > { %2213 = vadd.xlane.f32.xlu1 %v2212_v23 }
 0x273   : > { %v1565_v1 = vpop.xlane.xlu0 %1564  ;;  %v1000_v60 = vpop.xlane.xlu2 %999 }
 0x274   : > { %v1575_v31 = vmul.f32 0.35355338, %v1565_v1  ;;  %v1010_v2 = vmul.f32 0.35355338, %v1000_v60  ;;  %v7037_v48 = vpop.xlane.xlu1 %981 }
 0x276   : > { %v1682_v25 = vmax.f32 %v1476_v57, %v1575_v31  ;;  %v1026_v14 = vmax.f32 %v1018_v22, %v1010_v2 }
 0x278   : > { %v1034_v28 = vsub.f32 %v804_v63, %v1026_v14  ;;  %v1058_v46 = vsub.f32 %v907_v33, %v1026_v14  ;;  %v1082_v0 = vsub.f32 %v1010_v2, %v1026_v14  ;;  %1549 = vadd.xlane.f32.xlu2 %v1548_v51 }
 0x27a   : > { %v1048_v45 = vmul.f32 1.442695, %v1034_v28  ;;  %v1072_v13 = vmul.f32 1.442695, %v1058_v46  ;;  %v1096_v8 = vmul.f32 1.442695, %v1082_v0 }
 0x27b   : > { %v1664_v55 = vpop.xlane.xlu2 %1663  ;;  %v7040_v3 = vpop.xlane.xlu0 %1651 }
 0x27c   : > { %5954 = vpow2.f32 %v1048_v45  ;;  %v1674_v56 = vmul.f32 0.35355338, %v1664_v55  ;;  %v7042_v54 = vpop.xlane.xlu1 %1666 }
 0x27d   : > { %5956 = vpow2.f32 %v1072_v13 }
 0x27e   : > { %v1690_v41 = vmax.f32 %v1682_v25, %v1674_v56  ;;  %5958 = vpow2.f32 %v1096_v8  ;;  %v802_v25 = vmul.f32 0.35355338, %v6921_v62 }
 0x280   : > { %v1698_v50 = vsub.f32 %v1476_v57, %v1690_v41  ;;  %v1722_v24 = vsub.f32 %v1575_v31, %v1690_v41  ;;  %v1746_v43 = vsub.f32 %v1674_v56, %v1690_v41 }
 0x282   : > { %v5955_v4 = vpop.eup %5954  ;;  %v1712_v59 = vmul.f32 1.442695, %v1698_v50  ;;  %v1736_v49 = vmul.f32 1.442695, %v1722_v24  ;;  %v1760_v63 = vmul.f32 1.442695, %v1746_v43 }
 0x283   : > { %v5957_v30 = vpop.eup %5956  ;;  %v7044_v33 = vpop.xlane.xlu2 %987 }
 0x284   : > { %v1106_v34 = vadd.f32 %v5957_v30, %v5955_v4  ;;  %5960 = vpow2.f32 %v1712_v59  ;;  %v5959_v11 = vpop.eup %5958  ;;  %v7046_v44 = vpop.xlane.xlu1 %2318 }
 0x285   : > { %5962 = vpow2.f32 %v1736_v49  ;;  %v1658_v7 = vpop.xlane.xlu0 %1657 }
 0x286   : > { %v1114_v22 = vadd.f32 %v5959_v11, %v1106_v34  ;;  %5964 = vpow2.f32 %v1760_v63 }
 0x288   : > { %5966 = vrcp.f32 %v1114_v22  ;;  %v2128_v22 = vmul.f32 0.35355338, %v6889_v53 }
 0x28a   : > { %v5961_v23 = vpop.eup %5960 }
 0x28b   : > { %v5963_v1 = vpop.eup %5962  ;;  %v994_v31 = vpop.xlane.xlu2 %993 }
 0x28c   : > { %v1770_v57 = vadd.f32 %v5963_v1, %v5961_v23  ;;  %v5965_v60 = vpop.eup %5964  ;;  %v891_v2 = vpop.xlane.xlu1 %890  ;;  %v1008_v45 = vmul.f32 0.35355338, %v994_v31 }
 0x28d   : > { %v905_v51 = vmul.f32 0.35355338, %v891_v2  ;;  %v7055_v8 = vpop.xlane.xlu0 %1645  ;;  %v2326_v2 = vmul.f32 0.35355338, %v7022_v40 }
 0x28e   : > { %v5967_v58 = vpop.eup %5966  ;;  %v1778_v14 = vadd.f32 %v5965_v60, %v1770_v57  ;;  %v1474_v57 = vmul.f32 0.35355338, %v6944_v37 }
 0x28f   : > { %v7049_v28 = vmul.f32 %v5967_v58, %v5955_v4  ;;  %v7051_v46 = vmul.f32 %v5967_v58, %v5957_v30  ;;  %v7053_v0 = vmul.f32 %v5967_v58, %v5959_v11  ;;  %v1016_v13 = vmax.f32 %v802_v25, %v905_v51 }
 0x290   : > { %5968 = vrcp.f32 %v1778_v14  ;;  %v1672_v58 = vmul.f32 0.35355338, %v1658_v7 }
 0x291   : > { %8627 = vst [vmem:[#allocation12_spill] sm:$0xff] %v7053_v0  ;;  %v1024_v55 = vmax.f32 %v1016_v13, %v1008_v45 }
 0x293   : > { %v1032_v56 = vsub.f32 %v802_v25, %v1024_v55  ;;  %v1056_v41 = vsub.f32 %v905_v51, %v1024_v55  ;;  %v1080_v50 = vsub.f32 %v1008_v45, %v1024_v55  ;;  %v2217_v11 = vpop.xlane.xlu2 %2216 }
 0x294   : > { %v1559_v24 = vpop.xlane.xlu1 %1558  ;;  %v2227_v31 = vmul.f32 0.35355338, %v2217_v11  ;;  %v7073_v11 = vmul.f32 0.35355338, %v6897_v38  ;;  %v7084_v38 = vmul.f32 0.35355338, %v6950_v47 }
 0x295   : > { %v1044_v62 = vmul.f32 1.442695, %v1032_v56  ;;  %v1068_v59 = vmul.f32 1.442695, %v1056_v41  ;;  %v1092_v49 = vmul.f32 1.442695, %v1080_v50 }
 0x296   : > { %v5969_v43 = vpop.eup %5968  ;;  %v1573_v34 = vmul.f32 0.35355338, %v1559_v24  ;;  %v2334_v14 = vmax.f32 %v2128_v22, %v2227_v31  ;;  %v2124_v41 = vmul.f32 0.35355338, %v6933_v39  ;;  %v7099_v47 = vmul.f32 0.35355338, %v6977_v32 }
 0x297   : > { %v7057_v4 = vmul.f32 %v5969_v43, %v5961_v23  ;;  %v7059_v30 = vmul.f32 %v5969_v43, %v5963_v1  ;;  %v7061_v63 = vmul.f32 %v5969_v43, %v5965_v60  ;;  %5970 = vpow2.f32 %v1044_v62  ;;  %v2304_v23 = vpop.xlane.xlu0 %2303 }
 0x298   : > { %5972 = vpow2.f32 %v1068_v59  ;;  %v1680_v25 = vmax.f32 %v1474_v57, %v1573_v34  ;;  %v2342_v51 = vmax.f32 %v2334_v14, %v2326_v2  ;;  %v7114_v32 = vmul.f32 0.35355338, %v6995_v27 }
 0x299   : > { %5974 = vpow2.f32 %v1092_v49 }
 0x29a   : > { %v1688_v1 = vmax.f32 %v1680_v25, %v1672_v58  ;;  %v2350_v56 = vsub.f32 %v2128_v22, %v2342_v51  ;;  %v2374_v50 = vsub.f32 %v2227_v31, %v2342_v51  ;;  %v2398_v24 = vsub.f32 %v2326_v2, %v2342_v51 }
 0x29b   : > { %v7069_v40 = vpop.xlane.xlu2 %2309  ;;  %v7076_v22 = vmul.f32 0.35355338, %v6909_v12  ;;  %v7081_v25 = vmul.f32 0.35355338, %v6927_v29  ;;  %v7093_v29 = vmul.f32 0.35355338, %v6969_v26 }
 0x29c   : > { %v2205_v60 = vpop.xlane.xlu1 %2204  ;;  %v1696_v13 = vsub.f32 %v1474_v57, %v1688_v1  ;;  %v1720_v55 = vsub.f32 %v1573_v34, %v1688_v1  ;;  %v1744_v53 = vsub.f32 %v1672_v58, %v1688_v1  ;;  %v2322_v34 = vmul.f32 0.35355338, %v2304_v23 }
 0x29d   : > { %v7066_v45 = vpop.eup %5970  ;;  %v2223_v7 = vmul.f32 0.35355338, %v2205_v60  ;;  %v2364_v31 = vmul.f32 1.442695, %v2350_v56  ;;  %v2388_v14 = vmul.f32 1.442695, %v2374_v50 }
 0x29e   : > { %v5973_v37 = vpop.eup %5972  ;;  %v1708_v62 = vmul.f32 1.442695, %v1696_v13  ;;  %v1732_v59 = vmul.f32 1.442695, %v1720_v55  ;;  %v1756_v57 = vmul.f32 1.442695, %v1744_v53 }
 0x29f   : > { %v1104_v43 = vadd.f32 %v5973_v37, %v7066_v45  ;;  %v5975_v49 = vpop.eup %5974  ;;  %v2330_v58 = vmax.f32 %v2124_v41, %v2223_v7  ;;  %v7078_v2 = vpop.xlane.xlu0 %2297  ;;  %v7087_v23 = vmul.f32 0.35355338, %v6953_v10  ;;  %v2412_v12 = vmul.f32 1.442695, %v2398_v24 }
 0x2a0   : > { %5976 = vpow2.f32 %v1708_v62  ;;  %v7090_v55 = vmul.f32 0.35355338, %v6965_v21  ;;  %v7096_v53 = vmul.f32 0.35355338, %v6962_v61  ;;  %v7104_v24 = vmul.f32 0.35355338, %v6980_v18 }
 0x2a1   : > { %v1112_v39 = vadd.f32 %v5975_v49, %v1104_v43  ;;  %5978 = vpow2.f32 %v1732_v59  ;;  %v2338_v1 = vmax.f32 %v2330_v58, %v2322_v34  ;;  %v7111_v43 = vmul.f32 0.35355338, %v6984_v17 }
 0x2a2   : > { %v7117_v62 = vmul.f32 0.35355338, %v6992_v9  ;;  %v1006_v18 = vmul.f32 0.35355338, %v7044_v33  ;;  %v7132_v33 = vmul.f32 0.35355338, %v6999_v5 }
 0x2a3   : > { %5980 = vrcp.f32 %v1112_v39  ;;  %v2346_v51 = vsub.f32 %v2124_v41, %v2338_v1  ;;  %v2370_v60 = vsub.f32 %v2223_v7, %v2338_v1  ;;  %v2394_v13 = vsub.f32 %v2322_v34, %v2338_v1  ;;  %v885_v50 = vpop.xlane.xlu2 %884 }
 0x2a4   : > { %5982 = vpow2.f32 %v1756_v57  ;;  %v903_v26 = vmul.f32 0.35355338, %v885_v50  ;;  %v7106_v7 = vpop.xlane.xlu1 %990  ;;  %v1231_v39 = vrot.slane %v7051_v46, 4  ;;  %v7141_v46 = vmul.f32 0.35355338, %v7007_v19 }
 0x2a5   : > { %5984 = vpow2.f32 %v2364_v31  ;;  %v2356_v10 = vmul.f32 1.442695, %v2346_v51  ;;  %v2380_v56 = vmul.f32 1.442695, %v2370_v60  ;;  %v2404_v21 = vmul.f32 1.442695, %v2394_v13 }
 0x2a6   : > { %5986 = vpow2.f32 %v2388_v14  ;;  %v7101_v41 = vpop.eup %5976  ;;  %v1014_v34 = vmax.f32 %v7081_v25, %v903_v26  ;;  %v7135_v60 = vmul.f32 0.35355338, %v7010_v15  ;;  %v7138_v13 = vmul.f32 0.35355338, %v7014_v16 }
 0x2a7   : > { %5988 = vpow2.f32 %v2412_v12  ;;  %v7108_v61 = vpop.eup %5978  ;;  %v7123_v58 = vpop.xlane.xlu0 %1002  ;;  %v7151_v15 = vmul.f32 0.35355338, %v7025_v6  ;;  %v1144_v16 = vrot.slane %v7049_v28, 4  ;;  %v1004_v19 = vmul.f32 0.35355338, %v7037_v48 }
 0x2a8   : > { %5990 = vpow2.f32 %v2356_v10  ;;  %v1768_v57 = vadd.f32 %v7108_v61, %v7101_v41  ;;  %v1022_v12 = vmax.f32 %v1014_v34, %v1006_v18  ;;  %v1675_v48 = vmul.f32 0.35355338, %v7042_v54 }
 0x2a9   : > { %v5981_v59 = vpop.eup %5980  ;;  %5992 = vpow2.f32 %v2380_v56 }
 0x2aa   : > { %v5983_v17 = vpop.eup %5982  ;;  %v1128_v27 = vmul.f32 %v5981_v59, %v7066_v45  ;;  %v1215_v31 = vmul.f32 %v5981_v59, %v5973_v37  ;;  %v7127_v9 = vmul.f32 %v5981_v59, %v5975_v49  ;;  %5994 = vpow2.f32 %v2404_v21 }
 0x2ab   : > { %v7129_v14 = vpop.eup %5984  ;;  %v1776_v1 = vadd.f32 %v5983_v17, %v1768_v57  ;;  %v1030_v49 = vsub.f32 %v7081_v25, %v1022_v12  ;;  %v1054_v10 = vsub.f32 %v903_v26, %v1022_v12  ;;  %v1078_v50 = vsub.f32 %v1006_v18, %v1022_v12  ;;  %v879_v21 = vpop.xlane.xlu2 %878 }
 0x2ac   : > { %8628 = vst [vmem:[#allocation13_spill] sm:$0xff] %v7127_v9  ;;  %v5987_v51 = vpop.eup %5986  ;;  %v7144_v45 = vsel %vm717_vm2, %v1231_v39, %v1215_v31  ;;  %v901_v31 = vmul.f32 0.35355338, %v879_v21  ;;  %v7156_v25 = vmul.f32 0.35355338, %v7040_v3  ;;  %v7160_v6 = vsel %vm717_vm2, %v1144_v16, %v1128_v27 }
 0x2ad   : > { %v5989_v37 = vpop.eup %5988  ;;  %5996 = vrcp.f32 %v1776_v1  ;;  %v2422_v5 = vadd.f32 %v5987_v51, %v7129_v14  ;;  %v1040_v34 = vmul.f32 1.442695, %v1030_v49  ;;  %v1064_v39 = vmul.f32 1.442695, %v1054_v10  ;;  %v1568_v1 = vpop.xlane.xlu1 %1567 }
 0x2ae   : > { %v7148_v56 = vpop.eup %5990  ;;  %v1576_v36 = vmul.f32 0.35355338, %v1568_v1  ;;  %v1088_v18 = vmul.f32 1.442695, %v1078_v50  ;;  %v1012_v12 = vmax.f32 %v7096_v53, %v901_v31  ;;  %v1889_v1 = vrot.slane %v7059_v30, 4 }
 0x2af   : > { %v5993_v59 = vpop.eup %5992  ;;  %v2430_v57 = vadd.f32 %v5989_v37, %v2422_v5  ;;  %v1553_v5 = vpop.xlane.xlu0 %1552  ;;  %v7169_v27 = vmul.f32 0.35355338, %v7046_v44  ;;  %v7179_v30 = vmul.f32 0.35355338, %v7055_v8  ;;  %v8635_v9 = vrot.slane %v7057_v4, 4 }
 0x2b0   : > { %v2418_v26 = vadd.f32 %v5993_v59, %v7148_v56  ;;  %v5995_v28 = vpop.eup %5994  ;;  %v1683_v10 = vmax.f32 %v7111_v43, %v1576_v36  ;;  %v7165_v3 = vmul.f32 0.35355338, %v1553_v5  ;;  %v1020_v16 = vmax.f32 %v1012_v12, %v1004_v19 }
 0x2b1   : > { %5998 = vrcp.f32 %v2430_v57 }
 0x2b2   : > { %v2426_v49 = vadd.f32 %v5995_v28, %v2418_v26  ;;  %6000 = vpow2.f32 %v1040_v34  ;;  %v1028_v34 = vsub.f32 %v7096_v53, %v1020_v16  ;;  %v1052_v26 = vsub.f32 %v901_v31, %v1020_v16 }
 0x2b3   : > { %v5997_v21 = vpop.eup %5996  ;;  %6002 = vpow2.f32 %v1064_v39  ;;  %v1076_v5 = vsub.f32 %v1004_v19, %v1020_v16  ;;  %v1691_v39 = vmax.f32 %v1683_v10, %v1675_v48 }
 0x2b4   : > { %v7172_v54 = vmul.f32 %v5997_v21, %v7101_v41  ;;  %v1873_v50 = vmul.f32 %v5997_v21, %v7108_v61  ;;  %v7175_v57 = vmul.f32 %v5997_v21, %v5983_v17  ;;  %6004 = vrcp.f32 %v2426_v49  ;;  %v2211_v49 = vpop.xlane.xlu2 %2210 }
 0x2b5   : > { %6006 = vpow2.f32 %v1088_v18  ;;  %v1678_v41 = vmax.f32 %v7073_v11, %v7165_v3  ;;  %v1036_v61 = vmul.f32 1.442695, %v1028_v34  ;;  %v1060_v17 = vmul.f32 1.442695, %v1052_v26  ;;  %v7197_v34 = vpop.xlane.xlu1 %984 }
 0x2b6   : > { %v7182_v44 = vsel %vm717_vm2, %v1889_v1, %v1873_v50  ;;  %v1084_v21 = vmul.f32 1.442695, %v1076_v5  ;;  %v1699_v31 = vsub.f32 %v7111_v43, %v1691_v39  ;;  %v1723_v1 = vsub.f32 %v1576_v36, %v1691_v39 }
 0x2b7   : > { %v5999_v12 = vpop.eup %5998  ;;  %6008 = vpow2.f32 %v1036_v61  ;;  %v1747_v16 = vsub.f32 %v1675_v48, %v1691_v39  ;;  %v1686_v50 = vmax.f32 %v1678_v41, %v7156_v25  ;;  %v1547_v26 = vpop.xlane.xlu0 %1546  ;;  %v7211_v39 = vmul.f32 0.35355338, %v7069_v40 }
 0x2b8   : > { %v7186_v18 = vpop.eup %6000  ;;  %v7189_v53 = vmul.f32 %v5999_v12, %v7129_v14  ;;  %v7191_v19 = vmul.f32 %v5999_v12, %v5987_v51  ;;  %v7193_v8 = vmul.f32 %v5999_v12, %v5989_v37  ;;  %6010 = vpow2.f32 %v1060_v17 }
 0x2b9   : > { %v6003_v10 = vpop.eup %6002  ;;  %v1714_v61 = vmul.f32 1.442695, %v1699_v31  ;;  %v1738_v35 = vmul.f32 1.442695, %v1723_v1  ;;  %v7214_v14 = vmul.f32 0.35355338, %v7078_v2  ;;  %6012 = vpow2.f32 %v1084_v21 }
 0x2ba   : > { %8629 = vst [vmem:[#allocation14_spill] sm:$0xff] %v7189_v53  ;;  %v6005_v5 = vpop.eup %6004  ;;  %v1102_v37 = vadd.f32 %v6003_v10, %v7186_v18  ;;  %v1762_v51 = vmul.f32 1.442695, %v1747_v16  ;;  %v1742_v40 = vsub.f32 %v7156_v25, %v1686_v50  ;;  %v2225_v31 = vmul.f32 0.35355338, %v2211_v49 }
 0x2bb   : > { %8630 = vst [vmem:[#allocation15_spill] sm:$0xff] %v7191_v19  ;;  %v6007_v12 = vpop.eup %6006  ;;  %v7204_v43 = vmul.f32 %v6005_v5, %v7148_v56  ;;  %v7206_v36 = vmul.f32 %v6005_v5, %v5993_v59  ;;  %v7208_v48 = vmul.f32 %v6005_v5, %v5995_v28  ;;  %v7218_v56 = vperm.slane %v7144_v45, %v6460_v42 }
 0x2bc   : > { %8631 = vst [vmem:[#allocation16_spill] sm:$0xff] %v7193_v8  ;;  %v1110_v41 = vadd.f32 %v6007_v12, %v1102_v37  ;;  %v1694_v59 = vsub.f32 %v7073_v11, %v1686_v50  ;;  %v1718_v28 = vsub.f32 %v7165_v3, %v1686_v50  ;;  %v1569_v1 = vmul.f32 0.35355338, %v1547_v26  ;;  %v7236_v49 = vpop.xlane.xlu2 %1654 }
 0x2bd   : > { %8632 = vst [vmem:[#allocation17_spill] sm:$0xff] %v7204_v43  ;;  %v7223_v17 = vpop.eup %6008  ;;  %v7227_v2 = vperm.slane %v7160_v6, %v6460_v42  ;;  %v1752_v16 = vmul.f32 1.442695, %v1742_v40  ;;  %v7232_v11 = vmul.f32 0.35355338, %v7106_v7  ;;  %v2332_v25 = vmax.f32 %v7087_v23, %v2225_v31  ;;  %v7238_v50 = vpop.xlane.xlu1 %1660 }
 0x2be   : > { %8633 = vst [vmem:[#allocation18_spill] sm:$0xff] %v7208_v48  ;;  %6014 = vrcp.f32 %v1110_v41  ;;  %v1704_v21 = vmul.f32 1.442695, %v1694_v59  ;;  %v1728_v45 = vmul.f32 1.442695, %v1718_v28  ;;  %v7229_v5 = vpop.eup %6010  ;;  %v1676_v3 = vmax.f32 %v7076_v22, %v1569_v1 }
 0x2bf   : > { %6016 = vpow2.f32 %v1714_v61  ;;  %v7241_v6 = vmul.f32 0.35355338, %v7123_v58  ;;  %v2199_v26 = vpop.xlane.xlu0 %2198  ;;  %v6013_v37 = vpop.eup %6012  ;;  %v1809_v43 = vsel %vm717_vm2, %v8635_v9, %v7172_v54 }
 0x2c0   : > { %6018 = vpow2.f32 %v1738_v35  ;;  %v1100_v35 = vadd.f32 %v7229_v5, %v7223_v17  ;;  %v1684_v41 = vmax.f32 %v1676_v3, %v7179_v30  ;;  %v2221_v40 = vmul.f32 0.35355338, %v2199_v26 }
 0x2c1   : > { %6020 = vpow2.f32 %v1762_v51  ;;  %v2340_v51 = vmax.f32 %v2332_v25, %v7211_v39 }
 0x2c2   : > { %6022 = vpow2.f32 %v1704_v21  ;;  %v1108_v58 = vadd.f32 %v6013_v37, %v1100_v35  ;;  %v1716_v53 = vsub.f32 %v1569_v1, %v1684_v41  ;;  %v1740_v26 = vsub.f32 %v7179_v30, %v1684_v41 }
 0x2c3   : > { %6024 = vpow2.f32 %v1728_v45  ;;  %v2348_v25 = vsub.f32 %v7087_v23, %v2340_v51  ;;  %v2372_v61 = vsub.f32 %v2225_v31, %v2340_v51  ;;  %v2396_v28 = vsub.f32 %v7211_v39, %v2340_v51 }
 0x2c4   : > { %v6015_v59 = vpop.eup %6014  ;;  %6026 = vpow2.f32 %v1752_v16  ;;  %v1692_v16 = vsub.f32 %v7076_v22, %v1684_v41  ;;  %v7276_v8 = vpop.xlane.xlu2 %1648 }
 0x2c5   : > { %v7250_v20 = vpop.eup %6016  ;;  %v7253_v21 = vmul.f32 %v6015_v59, %v7186_v18  ;;  %v7255_v7 = vmul.f32 %v6015_v59, %v6003_v10  ;;  %v7257_v45 = vmul.f32 %v6015_v59, %v6007_v12  ;;  %6028 = vrcp.f32 %v1108_v58  ;;  %v7278_v10 = vpop.xlane.xlu1 %2312 }
 0x2c6   : > { %v7260_v3 = vpop.eup %6018  ;;  %v2360_v58 = vmul.f32 1.442695, %v2348_v25  ;;  %v2384_v31 = vmul.f32 1.442695, %v2372_v61  ;;  %v2408_v51 = vmul.f32 1.442695, %v2396_v28  ;;  %v2328_v18 = vmax.f32 %v7093_v29, %v2221_v40 }
 0x2c7   : > { %8634 = vst [vmem:[#allocation19_spill] sm:$0xff] %v7257_v45  ;;  %v6021_v35 = vpop.eup %6020  ;;  %v1771_v12 = vadd.f32 %v7260_v3, %v7250_v20  ;;  %v1700_v1 = vmul.f32 1.442695, %v1692_v16  ;;  %v900_v61 = vpop.xlane.xlu0 %899  ;;  %v1748_v28 = vmul.f32 1.442695, %v1740_v26 }
 0x2c8   : > { %v7269_v59 = vpop.eup %6022  ;;  %6030 = vpow2.f32 %v2360_v58  ;;  %v2336_v30 = vmax.f32 %v2328_v18, %v7214_v14  ;;  %v908_v0 = vmul.f32 0.35355338, %v900_v61 }
 0x2c9   : > { %v7272_v39 = vpop.eup %6024  ;;  %v1779_v22 = vadd.f32 %v6021_v35, %v1771_v12  ;;  %v1724_v12 = vmul.f32 1.442695, %v1716_v53 }
 0x2ca   : > { %v6027_v19 = vpop.eup %6026  ;;  %v1766_v25 = vadd.f32 %v7272_v39, %v7269_v59  ;;  %v2344_v53 = vsub.f32 %v7093_v29, %v2336_v30  ;;  %v2368_v26 = vsub.f32 %v2221_v40, %v2336_v30  ;;  %v2392_v18 = vsub.f32 %v7214_v14, %v2336_v30 }
 0x2cb   : > { %6032 = vrcp.f32 %v1779_v22  ;;  %v6029_v41 = vpop.eup %6028  ;;  %v1219_v22 = vrot.slane %v7255_v7, 4  ;;  %v1019_v4 = vmax.f32 %v7099_v47, %v908_v0 }
 0x2cc   : > { %v1774_v23 = vadd.f32 %v6027_v19, %v1766_v25  ;;  %6034 = vpow2.f32 %v2384_v31  ;;  %v1124_v48 = vmul.f32 %v6029_v41, %v7223_v17  ;;  %v1211_v58 = vmul.f32 %v6029_v41, %v7229_v5  ;;  %v997_v40 = vpop.xlane.xlu2 %996 }
 0x2cd   : > { %v7290_v16 = vmul.f32 %v6029_v41, %v6013_v37  ;;  %6036 = vpow2.f32 %v2408_v51  ;;  %v1132_v31 = vrot.slane %v7253_v21, 4  ;;  %v2352_v54 = vmul.f32 1.442695, %v2344_v53 }
 0x2ce   : > { %6038 = vrcp.f32 %v1774_v23  ;;  %v7297_v9 = vpop.eup %6030  ;;  %v2376_v17 = vmul.f32 1.442695, %v2368_v26  ;;  %v2400_v5 = vmul.f32 1.442695, %v2392_v18  ;;  %v1027_v29 = vmax.f32 %v1019_v4, %v7241_v6  ;;  %v888_v23 = vpop.xlane.xlu1 %887 }
 0x2cf   : > { %8636 = vst [vmem:[#allocation20_spill] sm:$0xff] %v7290_v16  ;;  %6040 = vpow2.f32 %v1700_v1  ;;  %v7301_v14 = vsel %vm717_vm2, %v1219_v22, %v1211_v58  ;;  %v7304_v7 = vsel %vm717_vm2, %v1132_v31, %v1124_v48  ;;  %v7316_v61 = vpop.xlane.xlu0 %2306 }
 0x2d0   : > { %6042 = vpow2.f32 %v1724_v12  ;;  %v1035_v48 = vsub.f32 %v7099_v47, %v1027_v29  ;;  %v1059_v30 = vsub.f32 %v908_v0, %v1027_v29 }
 0x2d1   : > { %v6033_v37 = vpop.eup %6032  ;;  %6044 = vpow2.f32 %v1748_v28 }
 0x2d2   : > { %v7306_v21 = vpop.eup %6034  ;;  %v7309_v51 = vmul.f32 %v6033_v37, %v7250_v20  ;;  %v7312_v25 = vmul.f32 %v6033_v37, %v7260_v3  ;;  %v7314_v1 = vmul.f32 %v6033_v37, %v6021_v35  ;;  %6046 = vpow2.f32 %v2352_v54 }
 0x2d3   : > { %v6037_v12 = vpop.eup %6036  ;;  %v2420_v28 = vadd.f32 %v7306_v21, %v7297_v9  ;;  %6048 = vpow2.f32 %v2376_v17  ;;  %v7322_v20 = vmul.f32 0.35355338, %v7197_v34  ;;  %v7325_v3 = vmul.f32 0.35355338, %v7236_v49 }
 0x2d4   : > { %8637 = vst [vmem:[#allocation21_spill] sm:$0xff] %v7312_v25  ;;  %v6039_v41 = vpop.eup %6038  ;;  %v7328_v35 = vmul.f32 0.35355338, %v7238_v50  ;;  %6050 = vpow2.f32 %v2400_v5  ;;  %v1050_v18 = vmul.f32 1.442695, %v1035_v48  ;;  %v1083_v50 = vsub.f32 %v7241_v6, %v1027_v29 }
 0x2d5   : > { %v7330_v58 = vpop.eup %6040  ;;  %v7333_v53 = vmul.f32 %v6039_v41, %v7269_v59  ;;  %v7336_v26 = vmul.f32 %v6039_v41, %v7272_v39  ;;  %v7338_v0 = vmul.f32 %v6039_v41, %v6027_v19  ;;  %v2428_v47 = vadd.f32 %v6037_v12, %v2420_v28 }
 0x2d6   : > { %v7340_v34 = vpop.eup %6042  ;;  %v1074_v31 = vmul.f32 1.442695, %v1059_v30  ;;  %v7347_v59 = vmul.f32 0.35355338, %v7276_v8  ;;  %v7350_v39 = vmul.f32 0.35355338, %v7278_v10  ;;  %v7353_v19 = vperm.slane %v1809_v43, %v6460_v42  ;;  %v2220_v10 = vpop.xlane.xlu2 %2219 }
 0x2d7   : > { %v7344_v22 = vpop.eup %6044  ;;  %6052 = vrcp.f32 %v2428_v47  ;;  %v1764_v54 = vadd.f32 %v7340_v34, %v7330_v58  ;;  %v1098_v17 = vmul.f32 1.442695, %v1083_v50  ;;  %v904_v6 = vmul.f32 0.35355338, %v888_v23  ;;  %v882_v28 = vpop.xlane.xlu1 %881 }
 0x2d8   : > { %v7355_v4 = vpop.eup %6046  ;;  %6054 = vpow2.f32 %v1050_v18  ;;  %v894_v47 = vpop.xlane.xlu0 %893  ;;  %v2228_v23 = vmul.f32 0.35355338, %v2220_v10  ;;  %v902_v18 = vmul.f32 0.35355338, %v882_v28  ;;  %v8638_v49 = vrot.slane %v7061_v63, 4 }
 0x2d9   : > { %v6049_v5 = vpop.eup %6048  ;;  %6056 = vpow2.f32 %v1074_v31  ;;  %v1772_v48 = vadd.f32 %v7344_v22, %v1764_v54  ;;  %v1015_v41 = vmax.f32 %v7117_v62, %v904_v6  ;;  %v7365_v50 = vmul.f32 0.35355338, %v894_v47 }
 0x2da   : > { %v6051_v43 = vpop.eup %6050  ;;  %v2416_v30 = vadd.f32 %v6049_v5, %v7355_v4  ;;  %6058 = vpow2.f32 %v1098_v17  ;;  %v7371_v31 = vsel %vm717_vm2, %v8638_v49, %v7175_v57  ;;  %v7373_v29 = vmul.f32 0.35355338, %v997_v40 }
 0x2db   : > { %6060 = vrcp.f32 %v1772_v48  ;;  %v1023_v54 = vmax.f32 %v1015_v41, %v7232_v11  ;;  %v2335_v10 = vmax.f32 %v7084_v38, %v2228_v23  ;;  %v1013_v28 = vmax.f32 %v7132_v33, %v902_v18 }
 0x2dc   : > { %v2424_v8 = vadd.f32 %v6051_v43, %v2416_v30  ;;  %v1017_v47 = vmax.f32 %v7138_v13, %v7365_v50 }
 0x2dd   : > { %v6053_v17 = vpop.eup %6052  ;;  %v1031_v30 = vsub.f32 %v7117_v62, %v1023_v54  ;;  %v1055_v41 = vsub.f32 %v904_v6, %v1023_v54  ;;  %v1079_v37 = vsub.f32 %v7232_v11, %v1023_v54  ;;  %v2343_v45 = vmax.f32 %v2335_v10, %v7169_v27 }
 0x2de   : > { %v7381_v63 = vpop.eup %6054  ;;  %v7384_v57 = vmul.f32 %v6053_v17, %v7297_v9  ;;  %v7387_v40 = vmul.f32 %v6053_v17, %v7306_v21  ;;  %v7389_v49 = vmul.f32 %v6053_v17, %v6037_v12  ;;  %6062 = vrcp.f32 %v2424_v8 }
 0x2df   : > { %v7391_v48 = vpop.eup %6056  ;;  %v1021_v12 = vmax.f32 %v1013_v28, %v7322_v20  ;;  %v1025_v8 = vmax.f32 %v1017_v47, %v7373_v29  ;;  %v1042_v17 = vmul.f32 1.442695, %v1031_v30  ;;  %v2351_v62 = vsub.f32 %v7084_v38, %v2343_v45  ;;  %v1562_v38 = vpop.xlane.xlu1 %1561 }
 0x2e0   : > { %8639 = vst [vmem:[#allocation22_spill] sm:$0xff] %v7384_v57  ;;  %v7396_v16 = vpop.eup %6058  ;;  %v1107_v21 = vadd.f32 %v7391_v48, %v7381_v63  ;;  %v2375_v54 = vsub.f32 %v2228_v23, %v2343_v45  ;;  %v2399_v10 = vsub.f32 %v7169_v27, %v2343_v45  ;;  %v2301_v57 = vpop.xlane.xlu2 %2300 }
 0x2e1   : > { %8640 = vst [vmem:[#allocation23_spill] sm:$0xff] %v7387_v40  ;;  %v1090_v40 = vmul.f32 1.442695, %v1079_v37  ;;  %v6061_v6 = vpop.eup %6060  ;;  %v1029_v9 = vsub.f32 %v7132_v33, %v1021_v12  ;;  %6064 = vpow2.f32 %v1042_v17  ;;  %v2366_v30 = vmul.f32 1.442695, %v2351_v62 }
 0x2e2   : > { %8641 = vst [vmem:[#allocation24_spill] sm:$0xff] %v7389_v49  ;;  %v1066_v49 = vmul.f32 1.442695, %v1055_v41  ;;  %v1115_v11 = vadd.f32 %v7396_v16, %v1107_v21  ;;  %v7408_v25 = vmul.f32 %v6061_v6, %v7330_v58  ;;  %v7411_v28 = vmul.f32 %v6061_v6, %v7340_v34 }
 0x2e3   : > { %v7414_v47 = vmul.f32 %v6061_v6, %v7344_v22  ;;  %v2390_v23 = vmul.f32 1.442695, %v2375_v54  ;;  %v2414_v41 = vmul.f32 1.442695, %v2399_v10  ;;  %v1038_v58 = vmul.f32 1.442695, %v1029_v9  ;;  %v2208_v6 = vpop.xlane.xlu0 %2207 }
 0x2e4   : > { %v6063_v37 = vpop.eup %6062  ;;  %6066 = vrcp.f32 %v1115_v11  ;;  %v1053_v34 = vsub.f32 %v902_v18, %v1021_v12  ;;  %v1077_v22 = vsub.f32 %v7322_v20, %v1021_v12  ;;  %v8643_v21 = vrot.slane %v7206_v36, 4 }
 0x2e5   : > { %v7417_v27 = vmul.f32 %v6063_v37, %v7355_v4  ;;  %v2521_v33 = vmul.f32 %v6063_v37, %v6049_v5  ;;  %v7419_v45 = vmul.f32 %v6063_v37, %v6051_v43  ;;  %6068 = vpow2.f32 %v1066_v49 }
 0x2e6   : > { %6070 = vpow2.f32 %v1090_v40  ;;  %v1033_v62 = vsub.f32 %v7138_v13, %v1025_v8  ;;  %v1057_v4 = vsub.f32 %v7365_v50, %v1025_v8  ;;  %v1062_v5 = vmul.f32 1.442695, %v1053_v34 }
 0x2e7   : > { %8642 = vst [vmem:[#allocation25_spill] sm:$0xff] %v7419_v45  ;;  %v7425_v17 = vsel %vm717_vm2, %v8643_v21, %v2521_v33  ;;  %6072 = vpow2.f32 %v2366_v30  ;;  %v1086_v43 = vmul.f32 1.442695, %v1077_v22  ;;  %v1081_v40 = vsub.f32 %v7373_v29, %v1025_v8  ;;  %v7430_v49 = vpop.eup %6064 }
 0x2e8   : > { %6074 = vpow2.f32 %v2390_v23  ;;  %v1046_v20 = vmul.f32 1.442695, %v1033_v62  ;;  %v7434_v36 = vperm.slane %v7301_v14, %v6460_v42  ;;  %v7438_v18 = vperm.slane %v7304_v7, %v6460_v42  ;;  %v1556_v37 = vpop.xlane.xlu2 %1555  ;;  %v2214_v23 = vpop.xlane.xlu1 %2213 }
 0x2e9   : > { %6076 = vpow2.f32 %v2414_v41  ;;  %v1070_v50 = vmul.f32 1.442695, %v1057_v4  ;;  %v1574_v9 = vmul.f32 0.35355338, %v1562_v38  ;;  %v7440_v12 = vmul.f32 0.35355338, %v2208_v6 }
 0x2ea   : > { %v6067_v13 = vpop.eup %6066  ;;  %6078 = vpow2.f32 %v1038_v58  ;;  %v7446_v8 = vmul.f32 0.35355338, %v7316_v61  ;;  %v1094_v14 = vmul.f32 1.442695, %v1081_v40  ;;  %v7464_v6 = vmul.f32 0.35355338, %v2301_v57 }
 0x2eb   : > { %v7442_v11 = vpop.eup %6068  ;;  %6080 = vpow2.f32 %v1062_v5  ;;  %v1681_v10 = vmax.f32 %v7114_v32, %v1574_v9  ;;  %v2331_v38 = vmax.f32 %v7135_v60, %v7440_v12  ;;  %v1572_v5 = vmul.f32 0.35355338, %v1556_v37 }
 0x2ec   : > { %v7448_v54 = vpop.eup %6070  ;;  %v1103_v7 = vadd.f32 %v7442_v11, %v7430_v49  ;;  %6082 = vpow2.f32 %v1086_v43 }
 0x2ed   : > { %v7455_v30 = vpop.eup %6072  ;;  %6084 = vpow2.f32 %v1046_v20  ;;  %v1689_v22 = vmax.f32 %v1681_v10, %v7328_v35  ;;  %v2339_v21 = vmax.f32 %v2331_v38, %v7446_v8  ;;  %v7473_v10 = vmul.f32 %v6067_v13, %v7381_v63 }
 0x2ee   : > { %v6075_v58 = vpop.eup %6074  ;;  %v1111_v34 = vadd.f32 %v7448_v54, %v1103_v7  ;;  %6086 = vpow2.f32 %v1070_v50  ;;  %v7470_v7 = vmul.f32 0.35355338, %v2214_v23 }
 0x2ef   : > { %v6077_v62 = vpop.eup %6076  ;;  %v2423_v4 = vadd.f32 %v6075_v58, %v7455_v30  ;;  %6088 = vpow2.f32 %v1094_v14  ;;  %v1697_v40 = vsub.f32 %v7114_v32, %v1689_v22  ;;  %v1721_v20 = vsub.f32 %v1574_v9, %v1689_v22 }
 0x2f0   : > { %v7466_v43 = vpop.eup %6078  ;;  %v1745_v33 = vsub.f32 %v7328_v35, %v1689_v22  ;;  %v2347_v29 = vsub.f32 %v7135_v60, %v2339_v21  ;;  %v2395_v57 = vsub.f32 %v7446_v8, %v2339_v21  ;;  %6090 = vrcp.f32 %v1111_v34 }
 0x2f1   : > { %v6081_v50 = vpop.eup %6080  ;;  %v2431_v38 = vadd.f32 %v6077_v62, %v2423_v4  ;;  %v1710_v32 = vmul.f32 1.442695, %v1697_v40  ;;  %v1734_v9 = vmul.f32 1.442695, %v1721_v20  ;;  %v7483_v35 = vmul.f32 %v6067_v13, %v7391_v48  ;;  %v2202_v4 = vpop.xlane.xlu0 %2201 }
 0x2f2   : > { %v7477_v14 = vpop.eup %6082  ;;  %v1101_v37 = vadd.f32 %v6081_v50, %v7466_v43  ;;  %v1758_v63 = vmul.f32 1.442695, %v1745_v33  ;;  %v2371_v23 = vsub.f32 %v7440_v12, %v2339_v21  ;;  %v1679_v8 = vmax.f32 %v7090_v55, %v1572_v5 }
 0x2f3   : > { %v7480_v41 = vpop.eup %6084  ;;  %6092 = vrcp.f32 %v2431_v38  ;;  %v2333_v34 = vmax.f32 %v7151_v15, %v7470_v7  ;;  %v7493_v20 = vmul.f32 %v6067_v13, %v7396_v16  ;;  %v2358_v33 = vmul.f32 1.442695, %v2347_v29  ;;  %v1550_v38 = vpop.xlane.xlu2 %1549 }
 0x2f4   : > { %v6087_v22 = vpop.eup %6086  ;;  %v1109_v60 = vadd.f32 %v7477_v14, %v1101_v37  ;;  %6094 = vpow2.f32 %v1710_v32  ;;  %v1687_v12 = vmax.f32 %v1679_v8, %v7325_v3  ;;  %v8644_v37 = vrot.slane %v7333_v53, 4 }
 0x2f5   : > { %v7490_v40 = vpop.eup %6088  ;;  %v1105_v48 = vadd.f32 %v6087_v22, %v7480_v41  ;;  %6096 = vpow2.f32 %v1734_v9  ;;  %v2341_v21 = vmax.f32 %v2333_v34, %v7350_v39  ;;  %v2382_v16 = vmul.f32 1.442695, %v2371_v23 }
 0x2f6   : > { %6098 = vrcp.f32 %v1109_v60  ;;  %v7502_v32 = vsel %vm717_vm2, %v8644_v37, %v7408_v25  ;;  %v2406_v13 = vmul.f32 1.442695, %v2395_v57  ;;  %v7505_v45 = vmul.f32 0.35355338, %v2202_v4  ;;  %v7507_v9 = vpop.eup %6090 }
 0x2f7   : > { %v1113_v61 = vadd.f32 %v7490_v40, %v1105_v48  ;;  %6100 = vpow2.f32 %v1758_v63  ;;  %v1695_v29 = vsub.f32 %v7090_v55, %v1687_v12  ;;  %v1719_v60 = vsub.f32 %v1572_v5, %v1687_v12 }
 0x2f8   : > { %v1743_v8 = vsub.f32 %v7325_v3, %v1687_v12  ;;  %v2349_v53 = vsub.f32 %v7151_v15, %v2341_v21  ;;  %v2373_v25 = vsub.f32 %v7470_v7, %v2341_v21  ;;  %v7513_v37 = vmul.f32 0.35355338, %v1550_v38 }
 0x2f9   : > { %v6093_v34 = vpop.eup %6092  ;;  %6102 = vrcp.f32 %v1113_v61  ;;  %v1706_v3 = vmul.f32 1.442695, %v1695_v29  ;;  %v1730_v61 = vmul.f32 1.442695, %v1719_v60  ;;  %v1150_v7 = vrot.slane %v7473_v10, 4 }
 0x2fa   : > { %v7515_v23 = vpop.eup %6094  ;;  %v7518_v57 = vmul.f32 %v6093_v34, %v7455_v30  ;;  %v7520_v4 = vmul.f32 %v6093_v34, %v6075_v58  ;;  %v7522_v63 = vmul.f32 %v6093_v34, %v6077_v62  ;;  %6104 = vpow2.f32 %v2358_v33 }
 0x2fb   : > { %v7524_v55 = vpop.eup %6096  ;;  %6106 = vpow2.f32 %v2382_v16  ;;  %v1754_v15 = vmul.f32 1.442695, %v1743_v8  ;;  %v1214_v48 = vmul.f32 %v7507_v9, %v7442_v11  ;;  %v1237_v58 = vrot.slane %v7483_v35, 4 }
 0x2fc   : > { %8645 = vst [vmem:[#allocation26_spill] sm:$0xff] %v7522_v63  ;;  %v7526_v5 = vpop.eup %6098  ;;  %v1769_v30 = vadd.f32 %v7524_v55, %v7515_v23  ;;  %6108 = vpow2.f32 %v2406_v13  ;;  %v2362_v38 = vmul.f32 1.442695, %v2349_v53  ;;  %v2386_v16 = vmul.f32 1.442695, %v2373_v25 }
 0x2fd   : > { %v1212_v33 = vmul.f32 %v7526_v5, %v6081_v50  ;;  %6110 = vpow2.f32 %v1706_v3  ;;  %v7536_v12 = vpop.eup %6100  ;;  %v2397_v29 = vsub.f32 %v7350_v39, %v2341_v21  ;;  %v2329_v35 = vmax.f32 %v7141_v46, %v7505_v45 }
 0x2fe   : > { %6112 = vpow2.f32 %v1730_v61  ;;  %v1777_v11 = vadd.f32 %v7536_v12, %v1769_v30  ;;  %v1677_v13 = vmax.f32 %v7104_v24, %v7513_v37  ;;  %v1127_v8 = vmul.f32 %v7507_v9, %v7430_v49 }
 0x2ff   : > { %v7539_v60 = vpop.eup %6102  ;;  %6114 = vpow2.f32 %v1754_v15  ;;  %v1225_v34 = vrot.slane %v1214_v48, 4  ;;  %v2410_v21 = vmul.f32 1.442695, %v2397_v29  ;;  %v2337_v25 = vmax.f32 %v2329_v35, %v7464_v6 }
 0x300   : > { %v7546_v50 = vpop.eup %6104  ;;  %v1216_v53 = vmul.f32 %v7539_v60, %v6087_v22  ;;  %6116 = vpow2.f32 %v2362_v38  ;;  %v1685_v3 = vmax.f32 %v1677_v13, %v7347_v59 }
 0x301   : > { %v6107_v39 = vpop.eup %6106  ;;  %6118 = vrcp.f32 %v1777_v11  ;;  %v1226_v30 = vsel %vm717_vm2, %v1225_v34, %v1212_v33  ;;  %v2345_v22 = vsub.f32 %v7141_v46, %v2337_v25  ;;  %v2369_v48 = vsub.f32 %v7505_v45, %v2337_v25 }
 0x302   : > { %v6109_v61 = vpop.eup %6108  ;;  %v2419_v15 = vadd.f32 %v6107_v39, %v7546_v50  ;;  %6120 = vpow2.f32 %v2386_v16  ;;  %v1238_v62 = vsel %vm717_vm2, %v1237_v58, %v1216_v53  ;;  %v2393_v38 = vsub.f32 %v7464_v6, %v2337_v25 }
 0x303   : > { %v7556_v49 = vpop.eup %6110  ;;  %6122 = vpow2.f32 %v2410_v21  ;;  %v1693_v35 = vsub.f32 %v7104_v24, %v1685_v3  ;;  %v1717_v16 = vsub.f32 %v7513_v37, %v1685_v3  ;;  %v1741_v33 = vsub.f32 %v7347_v59, %v1685_v3 }
 0x304   : > { %v7561_v29 = vpop.eup %6112  ;;  %v2427_v11 = vadd.f32 %v6109_v61, %v2419_v15  ;;  %v7570_v58 = vmul.f32 %v7507_v9, %v7448_v54  ;;  %v2354_v45 = vmul.f32 1.442695, %v2345_v22  ;;  %v2378_v6 = vmul.f32 1.442695, %v2369_v48 }
 0x305   : > { %v7566_v13 = vpop.eup %6114  ;;  %v1767_v46 = vadd.f32 %v7561_v29, %v7556_v49  ;;  %v1129_v24 = vmul.f32 %v7539_v60, %v7480_v41  ;;  %v2402_v37 = vmul.f32 1.442695, %v2393_v38  ;;  %v1702_v53 = vmul.f32 1.442695, %v1693_v35 }
 0x306   : > { %v7574_v34 = vpop.eup %6116  ;;  %6124 = vrcp.f32 %v2427_v11  ;;  %v7580_v54 = vperm.slane %v1226_v30, %v6460_v42  ;;  %v7583_v9 = vperm.slane %v1238_v62, %v6460_v42  ;;  %v1125_v3 = vmul.f32 %v7526_v5, %v7466_v43 }
 0x307   : > { %v6119_v59 = vpop.eup %6118  ;;  %v1775_v21 = vadd.f32 %v7566_v13, %v1767_v46  ;;  %6126 = vpow2.f32 %v2354_v45  ;;  %v1726_v15 = vmul.f32 1.442695, %v1717_v16  ;;  %v1750_v41 = vmul.f32 1.442695, %v1741_v33 }
 0x308   : > { %v6121_v25 = vpop.eup %6120  ;;  %6128 = vpow2.f32 %v2378_v6  ;;  %v8646_v38 = vrot.slane %v7434_v36, 4  ;;  %v8647_v11 = vrot.slane %v7218_v56, 4  ;;  %v1793_v35 = vmul.f32 %v6119_v59, %v7515_v23 }
 0x309   : > { %v6123_v22 = vpop.eup %6122  ;;  %6130 = vrcp.f32 %v1775_v21  ;;  %v2421_v48 = vadd.f32 %v6121_v25, %v7574_v34  ;;  %v1138_v16 = vrot.slane %v1127_v8, 4  ;;  %v1151_v45 = vsel %vm717_vm2, %v1150_v7, %v1129_v24 }
 0x30a   : > { %v1246_v30 = vsel %vm717_vm2, %v7580_v54, %v8646_v38  ;;  %v1258_v62 = vsel %vm717_vm2, %v7583_v9, %v8647_v11  ;;  %6132 = vpow2.f32 %v2402_v37  ;;  %v7609_v37 = vperm.slane %v1151_v45, %v6460_v42 }
 0x30b   : > { %v7598_v43 = vperm.slane %v1258_v62, %v6472_v52  ;;  %v2429_v33 = vadd.f32 %v6123_v22, %v2421_v48  ;;  %6134 = vpow2.f32 %v1702_v53  ;;  %v7601_v46 = vperm.slane %v1246_v30, %v6472_v52 }
 0x30c   : > { %v6125_v6 = vpop.eup %6124  ;;  %6136 = vpow2.f32 %v1726_v15  ;;  %v1139_v23 = vsel %vm717_vm2, %v1138_v16, %v1125_v3  ;;  %v8649_v3 = vrot.slane %v7227_v2, 4  ;;  %v1300_v62 = vmul.f32 %v7539_v60, %v7490_v40 }
 0x30d   : > { %v1271_v21 = vrot.slane %v7598_v43, 4  ;;  %v7611_v38 = vpop.eup %6126  ;;  %v7614_v8 = vmul.f32 %v6125_v6, %v7546_v50  ;;  %v7616_v53 = vmul.f32 %v6125_v6, %v6107_v39  ;;  %v7618_v48 = vmul.f32 %v6125_v6, %v6109_v61  ;;  %v8664_v39 = vld [vmem:[#allocation12_spill] sm:$0xff] }
 0x30e   : > { %6138 = vrcp.f32 %v2429_v33  ;;  %v7620_v10 = vpop.eup %6128  ;;  %v7625_v24 = vperm.slane %v1139_v23, %v6460_v42  ;;  %v1171_v50 = vsel %vm717_vm2, %v7609_v37, %v8649_v3  ;;  %v7634_v61 = vmul.f32 %v7526_v5, %v7477_v14 }
 0x30f   : > { %8648 = vst [vmem:[#allocation27_spill] sm:$0xff] %v7618_v48  ;;  %6140 = vpow2.f32 %v1750_v41  ;;  %v1272_v7 = vsel %vm717_vm2, %v1271_v21, %v7601_v46  ;;  %v6131_v15 = vpop.eup %6130  ;;  %v2417_v41 = vadd.f32 %v7620_v10, %v7611_v38  ;;  %v1179_v30 = vperm.slane %v1171_v50, %v6472_v52 }
 0x310   : > { %1280 = vrot.lane.b32.xlu1 %v1272_v7, %s6226_s22  ;;  %v7640_v11 = vpop.eup %6132  ;;  %v1874_v16 = vmul.f32 %v6119_v59, %v7524_v55  ;;  %v7646_v33 = vmul.f32 %v6131_v15, %v7556_v49  ;;  %v8650_v14 = vrot.slane %v7438_v18, 4  ;;  %v7653_v6 = vmul.f32 %v6131_v15, %v7561_v29 }
 0x311   : > { %v6135_v45 = vpop.eup %6134  ;;  %v1184_v23 = vrot.slane %v1179_v30, 4  ;;  %v8651_v7 = vrot.slane %v7309_v51, 4  ;;  %v1955_v60 = vmul.f32 %v6119_v59, %v7536_v12  ;;  %v7661_v49 = vmul.f32 %v6131_v15, %v7566_v13 }
 0x312   : > { %v1159_v5 = vsel %vm717_vm2, %v7625_v24, %v8650_v14  ;;  %v6137_v55 = vpop.eup %6136  ;;  %v7665_v3 = vperm.slane %v7502_v32, %v6460_v42  ;;  %v2425_v14 = vadd.f32 %v7640_v11, %v2417_v41  ;;  %v8655_v41 = vrot.slane %v7353_v19, 4 }
 0x313   : > { %v1167_v21 = vperm.slane %v1159_v5, %v6472_v52  ;;  %v1815_v40 = vsel %vm717_vm2, %v8651_v7, %v1793_v35  ;;  %v1765_v5 = vadd.f32 %v6137_v55, %v6135_v45  ;;  %v8652_v35 = vrot.slane %v7338_v0, 4 }
 0x314   : > { %v7668_v29 = vperm.slane %v1815_v40, %v6460_v42  ;;  %v6139_v50 = vpop.eup %6138  ;;  %v1883_v7 = vrot.slane %v7653_v6, 4  ;;  %v7706_v6 = vperm.slane %v7182_v44, %v6460_v42 }
 0x315   : > { %v1185_v51 = vsel %vm717_vm2, %v1184_v23, %v1167_v21  ;;  %v1959_v12 = vsel %vm717_vm2, %v8652_v35, %v7414_v47  ;;  %v6141_v13 = vpop.eup %6140  ;;  %v7677_v59 = vmul.f32 %v6139_v50, %v7574_v34  ;;  %v7679_v32 = vmul.f32 %v6139_v50, %v6121_v25 }
 0x316   : > { %v7681_v15 = vmul.f32 %v6139_v50, %v6123_v22  ;;  %1193 = vrot.lane.b32.xlu2 %v1185_v51, %s6226_s22  ;;  %v1835_v23 = vsel %vm717_vm2, %v7668_v29, %v8655_v41  ;;  %v1773_v0 = vadd.f32 %v6141_v13, %v1765_v5  ;;  %v1802_v47 = vrot.slane %v7646_v33, 4 }
 0x317   : > { %8653 = vst [vmem:[#allocation28_spill] sm:$0xff] %v7679_v32  ;;  %v7691_v40 = vperm.slane %v1835_v23, %v6472_v52  ;;  %v7695_v34 = vperm.slane %v7371_v31, %v6460_v42  ;;  %v8656_v25 = vrot.slane %v7314_v1, 4  ;;  %v8657_v50 = vrot.slane %v7336_v26, 4  ;;  %v8658_v26 = vld [vmem:[#allocation21_spill] sm:$0xff] }
 0x318   : > { %8654 = vst [vmem:[#allocation29_spill] sm:$0xff] %v7681_v15  ;;  %6142 = vrcp.f32 %v1773_v0  ;;  %v1822_v33 = vrot.slane %v7665_v3, 4  ;;  %v7710_v5 = vperm.slane %v1959_v12, %v6460_v42  ;;  %v1915_v44 = vrot.slane %v7706_v6, 4  ;;  %v8660_v0 = vld [vmem:[#allocation20_spill] sm:$0xff] }
 0x319   : > { %v1977_v22 = vsel %vm717_vm2, %v8656_v25, %v1955_v60  ;;  %v1878_v51 = vsel %vm717_vm2, %v8657_v50, %v7411_v28  ;;  %v1996_v1 = vrot.slane %v7695_v34, 4  ;;  %v8659_v28 = vrot.slane %v8658_v26, 4  ;;  %v8661_v25 = vld [vmem:[#allocation19_spill] sm:$0xff] }
 0x31a   : > { %v7713_v31 = vperm.slane %v1977_v22, %v6460_v42  ;;  %v7717_v60 = vperm.slane %v1878_v51, %v6460_v42  ;;  %v1273_v12 = vrot.slane %v7601_v46, 4  ;;  %v1186_v23 = vrot.slane %v1167_v21, 4 }
 0x31b   : > { %v1896_v35 = vsel %vm717_vm2, %v8659_v28, %v1874_v16  ;;  %v8662_v22 = vrot.slane %v8661_v25, 4  ;;  %6144 = vrcp.f32 %v2425_v14  ;;  %v1848_v51 = vrot.slane %v7691_v40, 4 }
 0x31c   : > { %v7724_v41 = vperm.slane %v1896_v35, %v6460_v42  ;;  %v1964_v26 = vrot.slane %v7661_v49, 4  ;;  %v1997_v16 = vsel %vm717_vm2, %v7713_v31, %v1996_v1  ;;  %v1984_v28 = vrot.slane %v7710_v5, 4 }
 0x31d   : > { %v1304_v50 = vsel %vm717_vm2, %v8662_v22, %v8660_v0  ;;  %v7737_v35 = vperm.slane %v1997_v16, %v6472_v52  ;;  %v7743_v21 = vsel %vm717_vm2, %v7598_v43, %v1273_v12  ;;  %v1903_v14 = vrot.slane %v7717_v60, 4 }
 0x31e   : > { %v1916_v46 = vsel %vm717_vm2, %v7724_v41, %v1915_v44  ;;  %v7748_v49 = vsel %vm717_vm2, %v1179_v30, %v1186_v23  ;;  %v7751_v1 = vperm.slane %v1304_v50, %v6460_v42  ;;  %v6143_v25 = vpop.eup %6142  ;;  %v1309_v16 = vrot.slane %v7570_v58, 4  ;;  %v8663_v44 = vld [vmem:[#allocation13_spill] sm:$0xff] }
 0x31f   : > { %v1924_v0 = vperm.slane %v1916_v46, %v6472_v52  ;;  %v2010_v22 = vrot.slane %v7737_v35, 4  ;;  %v8665_v15 = vrot.slane %v8664_v39, 4  ;;  %v8666_v12 = vrot.slane %v7493_v20, 4 }
 0x320   : > { %v1789_v63 = vmul.f32 %v6143_v25, %v6135_v45  ;;  %v1870_v30 = vmul.f32 %v6143_v25, %v6137_v55  ;;  %v1951_v23 = vmul.f32 %v6143_v25, %v6141_v13  ;;  %v1310_v50 = vsel %vm717_vm2, %v1309_v16, %v7634_v61 }
 0x321   : > { %v1316_v43 = vsel %vm717_vm2, %v8665_v15, %v8663_v44  ;;  %v1322_v46 = vsel %vm717_vm2, %v8666_v12, %v1300_v62  ;;  %v1929_v48 = vrot.slane %v1924_v0, 4  ;;  %v1329_v39 = vrot.slane %v7751_v1, 4  ;;  %v7771_v15 = vpop.eup %6144 }
 0x322   : > { %v7765_v32 = vperm.slane %v1316_v43, %v6460_v42  ;;  %v7768_v58 = vperm.slane %v1322_v46, %v6460_v42  ;;  %v1803_v20 = vsel %vm717_vm2, %v1802_v47, %v1789_v63  ;;  %v1965_v62 = vsel %vm717_vm2, %v1964_v26, %v1951_v23 }
 0x323   : > { %v1884_v45 = vsel %vm717_vm2, %v1883_v7, %v1870_v30  ;;  %v1314_v55 = vperm.slane %v1310_v50, %v6460_v42  ;;  %v1807_v61 = vperm.slane %v1803_v20, %v6460_v42  ;;  %v7779_v13 = vperm.slane %v1965_v62, %v6460_v42 }
 0x324   : > { %v7782_v25 = vperm.slane %v1884_v45, %v6460_v42  ;;  %v1341_v16 = vrot.slane %v7765_v32, 4  ;;  %v1832_v63 = vrot.slane %v7668_v29, 4  ;;  %v1156_v47 = vrot.slane %v7625_v24, 4 }
 0x325   : > { %v1330_v44 = vsel %vm717_vm2, %v1314_v55, %v1329_v39  ;;  %v1168_v7 = vrot.slane %v7609_v37, 4  ;;  %v1823_v26 = vsel %vm717_vm2, %v1807_v61, %v1822_v33  ;;  %v1985_v43 = vsel %vm717_vm2, %v7779_v13, %v1984_v28 }
 0x326   : > { %v1904_v12 = vsel %vm717_vm2, %v7782_v25, %v1903_v14  ;;  %v1338_v46 = vperm.slane %v1330_v44, %v6472_v52  ;;  %v1831_v30 = vperm.slane %v1823_v26, %v6472_v52  ;;  %v1993_v23 = vperm.slane %v1985_v43, %v6472_v52 }
 0x327   : > { %v1912_v29 = vperm.slane %v1904_v12, %v6472_v52  ;;  %v1342_v24 = vsel %vm717_vm2, %v7768_v58, %v1341_v16  ;;  %v1820_v50 = vrot.slane %v1807_v61, 4  ;;  %v1833_v28 = vsel %vm717_vm2, %v1832_v63, %v7353_v19 }
 0x328   : > { %v1350_v37 = vperm.slane %v1342_v24, %v6472_v52  ;;  %v1357_v33 = vrot.slane %v1338_v46, 4  ;;  %v1849_v14 = vsel %vm717_vm2, %v1848_v51, %v1831_v30  ;;  %v2011_v39 = vsel %vm717_vm2, %v2010_v22, %v1993_v23 }
 0x329   : > { %v1930_v20 = vsel %vm717_vm2, %v1929_v48, %v1912_v29  ;;  %v1931_v62 = vrot.slane %v1912_v29, 4  ;;  %1857 = vrot.lane.b32.xlu0 %v1849_v14, %s6226_s22  ;;  %2019 = vrot.lane.b32.xlu1 %v2011_v39, %s6226_s22  ;;  %v1850_v16 = vrot.slane %v1831_v30, 4  ;;  %v2012_v44 = vrot.slane %v1993_v23, 4 }
 0x32a   : > { %v1355_v45 = vrot.slane %v1350_v37, 4  ;;  %v7809_v26 = vsel %vm717_vm2, %v1350_v37, %v1357_v33  ;;  %v2547_v61 = vrot.slane %v7520_v4, 4  ;;  %1938 = vrot.lane.b32.xlu2 %v1930_v20, %s6226_s22  ;;  %v1821_v48 = vsel %vm717_vm2, %v1820_v50, %v7665_v3  ;;  %v8667_v37 = vld [vmem:[#allocation17_spill] sm:$0xff] }
 0x32b   : > { %v7814_v19 = vsel %vm717_vm2, %v1924_v0, %v1931_v62  ;;  %v1157_v51 = vsel %vm717_vm2, %v1156_v47, %v7438_v18  ;;  %v1851_v63 = vsel %vm717_vm2, %v7691_v40, %v1850_v16  ;;  %v7825_v43 = vsel %vm717_vm2, %v7737_v35, %v2012_v44 }
 0x32c   : > { %v1356_v22 = vsel %vm717_vm2, %v1355_v45, %v1338_v46  ;;  %v7828_v12 = vperm.slane %v1821_v48, %v6472_v52  ;;  %v7831_v0 = vperm.slane %v1833_v28, %v6472_v52  ;;  %v7834_v3 = vperm.slane %v1157_v51, %v6472_v52  ;;  %v8669_v28 = vld [vmem:[#allocation22_spill] sm:$0xff] }
 0x32d   : > { %v1169_v18 = vsel %vm717_vm2, %v1168_v7, %v7227_v2  ;;  %v1243_v47 = vrot.slane %v7580_v54, 4  ;;  %v1255_v35 = vrot.slane %v7583_v9, 4  ;;  %v1327_v30 = vrot.slane %v1314_v55, 4 }
 0x32e   : > { %v1846_v40 = vrot.slane %v7828_v12, 4  ;;  %v7841_v46 = vperm.slane %v1169_v18, %v6472_v52  ;;  %v1182_v23 = vrot.slane %v7834_v3, 4  ;;  %v1339_v24 = vrot.slane %v7768_v58, 4 }
 0x32f   : > { %v1244_v29 = vsel %vm717_vm2, %v1243_v47, %v7434_v36  ;;  %v8668_v2 = vrot.slane %v8667_v37, 4  ;;  %v2535_v7 = vrot.slane %v7616_v53, 4  ;;  %v1256_v55 = vsel %vm717_vm2, %v1255_v35, %v7218_v56 }
 0x330   : > { %v7855_v33 = vsel %vm717_vm2, %v7831_v0, %v1846_v40  ;;  %v7858_v9 = vperm.slane %v1244_v29, %v6472_v52  ;;  %v2441_v36 = vmul.f32 %v7771_v15, %v7611_v38  ;;  %v7866_v58 = vsel %vm717_vm2, %v7841_v46, %v1182_v23 }
 0x331   : > { %v2449_v54 = vsel %vm717_vm2, %v8668_v2, %v7417_v27  ;;  %v1328_v27 = vsel %vm717_vm2, %v1327_v30, %v7751_v1  ;;  %v1340_v53 = vsel %vm717_vm2, %v1339_v24, %v7765_v32  ;;  %1284 = vrot.lane.b32.xlu0 %v7743_v21, %s6227_s24  ;;  %1197 = vrot.lane.b32.xlu1 %v7748_v49, %s6227_s24  ;;  %v2454_v21 = vrot.slane %v7614_v8, 4  ;;  %v8670_v49 = vld [vmem:[#allocation14_spill] sm:$0xff] }
 0x332   : > { %v7877_v56 = vperm.slane %v1256_v55, %v6472_v52  ;;  %v1269_v38 = vrot.slane %v7858_v9, 4  ;;  %v7881_v50 = vperm.slane %v1328_v27, %v6472_v52  ;;  %v7884_v1 = vperm.slane %v2449_v54, %v6460_v42  ;;  %1364 = vrot.lane.b32.xlu2 %v1356_v22, %s6226_s22  ;;  %v8673_v27 = vld [vmem:[#allocation23_spill] sm:$0xff] }
 0x333   : > { %v2522_v32 = vmul.f32 %v7771_v15, %v7620_v10  ;;  %v8671_v14 = vrot.slane %v8670_v49, 4  ;;  %v8672_v20 = vrot.slane %v7518_v57, 4  ;;  %v7903_v10 = vperm.slane %v1340_v53, %v6472_v52 }
 0x334   : > { %v7900_v45 = vsel %vm717_vm2, %v7877_v56, %v1269_v38  ;;  %v1353_v16 = vrot.slane %v7881_v50, 4  ;;  %v2455_v44 = vsel %vm717_vm2, %v2454_v21, %v2441_v36  ;;  %v2474_v57 = vrot.slane %v7884_v1, 4  ;;  %v8677_v38 = vld [vmem:[#allocation27_spill] sm:$0xff] }
 0x335   : > { %v2461_v39 = vsel %vm717_vm2, %v8671_v14, %v8669_v28  ;;  %v2467_v62 = vsel %vm717_vm2, %v8672_v20, %v7677_v59  ;;  %v1901_v59 = vrot.slane %v7782_v25, 4  ;;  %v7920_v22 = vperm.slane %v2455_v44, %v6460_v42 }
 0x336   : > { %v7907_v8 = vperm.slane %v2461_v39, %v6460_v42  ;;  %v7911_v48 = vperm.slane %v2467_v62, %v6460_v42  ;;  %v7917_v51 = vsel %vm717_vm2, %v7903_v10, %v1353_v16  ;;  %v1913_v47 = vrot.slane %v7724_v41, 4  ;;  %v8678_v62 = vld [vmem:[#allocation25_spill] sm:$0xff]  ;;  %v8679_v16 = vld [vmem:[#allocation18_spill] sm:$0xff] }
 0x337   : > { %v1902_v40 = vsel %vm717_vm2, %v1901_v59, %v7717_v60  ;;  %v1982_v35 = vrot.slane %v7779_v13, 4  ;;  %v1994_v30 = vrot.slane %v7713_v31, 4  ;;  %v2534_v25 = vperm.slane %v7425_v17, %v6460_v42 }
 0x338   : > { %v2486_v18 = vrot.slane %v7907_v8, 4  ;;  %v2475_v23 = vsel %vm717_vm2, %v7920_v22, %v2474_v57  ;;  %v7935_v24 = vperm.slane %v1902_v40, %v6472_v52  ;;  %v1914_v41 = vsel %vm717_vm2, %v1913_v47, %v7706_v6  ;;  %v8682_v47 = vld [vmem:[#allocation16_spill] sm:$0xff] }
 0x339   : > { %v2483_v60 = vperm.slane %v2475_v23, %v6472_v52  ;;  %v7942_v31 = vperm.slane %v1914_v41, %v6472_v52  ;;  %v1983_v17 = vsel %vm717_vm2, %v1982_v35, %v7710_v5  ;;  %1942 = vrot.lane.b32.xlu0 %v7814_v19, %s6227_s24  ;;  %1861 = vrot.lane.b32.xlu1 %v1851_v63, %s6227_s24  ;;  %v2555_v39 = vrot.slane %v2534_v25, 4 }
 0x33a   : > { %v2487_v29 = vsel %vm717_vm2, %v7911_v48, %v2486_v18  ;;  %v1927_v37 = vrot.slane %v7935_v24, 4  ;;  %v7951_v2 = vperm.slane %v1983_v17, %v6472_v52  ;;  %v1995_v6 = vsel %vm717_vm2, %v1994_v30, %v7695_v34  ;;  %2023 = vrot.lane.b32.xlu2 %v7825_v43, %s6227_s24  ;;  %v8681_v18 = vld [vmem:[#allocation24_spill] sm:$0xff] }
 0x33b   : > { %v2495_v13 = vperm.slane %v2487_v29, %v6472_v52  ;;  %v2536_v54 = vsel %vm717_vm2, %v2535_v7, %v2522_v32  ;;  %v2603_v55 = vmul.f32 %v7771_v15, %v7640_v11  ;;  %v7961_v19 = vperm.slane %v1995_v6, %v6472_v52  ;;  %v8674_v7 = vld [vmem:[#allocation15_spill] sm:$0xff]  ;;  %v8676_v15 = vld [vmem:[#allocation28_spill] sm:$0xff] }
 0x33c   : > { %v2540_v63 = vperm.slane %v2536_v54, %v6460_v42  ;;  %v7966_v36 = vsel %vm717_vm2, %v7942_v31, %v1927_v37  ;;  %v2008_v34 = vrot.slane %v7951_v2, 4  ;;  %v8675_v53 = vrot.slane %v8674_v7, 4  ;;  %v8684_v37 = vld [vmem:[#allocation26_spill] sm:$0xff]  ;;  %v8685_v7 = vld [vmem:[#allocation29_spill] sm:$0xff] }
 0x33d   : > { %v2500_v5 = vrot.slane %v2495_v13, 4  ;;  %v2548_v43 = vsel %vm717_vm2, %v2547_v61, %v8676_v15  ;;  %v2616_v32 = vrot.slane %v8677_v38, 4  ;;  %v2502_v20 = vrot.slane %v2483_v60, 4 }
 0x33e   : > { %v2542_v11 = vsel %vm717_vm2, %v8675_v53, %v8673_v27  ;;  %v2552_v49 = vperm.slane %v2548_v43, %v6460_v42  ;;  %v7983_v14 = vsel %vm717_vm2, %v7961_v19, %v2008_v34  ;;  %v8680_v44 = vrot.slane %v8679_v16, 4 }
 0x33f   : > { %v2501_v21 = vsel %vm717_vm2, %v2500_v5, %v2483_v60  ;;  %v2546_v28 = vperm.slane %v2542_v11, %v6460_v42  ;;  %v2617_v59 = vsel %vm717_vm2, %v2616_v32, %v2603_v55  ;;  %v8683_v40 = vrot.slane %v8682_v47, 4 }
 0x340   : > { %v2611_v4 = vsel %vm717_vm2, %v8680_v44, %v8678_v62  ;;  %v2556_v30 = vsel %vm717_vm2, %v2540_v63, %v2555_v39  ;;  %v7997_v23 = vsel %vm717_vm2, %v2495_v13, %v2502_v20  ;;  %v2621_v29 = vperm.slane %v2617_v59, %v6460_v42 }
 0x341   : > { %v2567_v61 = vrot.slane %v2546_v28, 4  ;;  %v2615_v57 = vperm.slane %v2611_v4, %v6460_v42  ;;  %v2623_v35 = vsel %vm717_vm2, %v8683_v40, %v8681_v18  ;;  %v2564_v60 = vperm.slane %v2556_v30, %v6472_v52  ;;  %1368 = vrot.lane.b32.xlu0 %v7809_v26, %s6227_s24  ;;  %1853 = vrot.lane.b32.xlu1 %v7855_v33, %s6228_s27 }
 0x342   : > { %v2627_v41 = vperm.slane %v2623_v35, %v6460_v42  ;;  %v2628_v6 = vrot.slane %v8684_v37, 4  ;;  %v2553_v5 = vrot.slane %v2540_v63, 4  ;;  %v2565_v34 = vrot.slane %v2552_v49, 4  ;;  %1189 = vrot.lane.b32.xlu2 %v7866_v58, %s6228_s27 }
 0x343   : > { %v2568_v17 = vsel %vm717_vm2, %v2552_v49, %v2567_v61  ;;  %v2636_v54 = vrot.slane %v2615_v57, 4  ;;  %v2583_v27 = vrot.slane %v2564_v60, 4  ;;  %v2472_v26 = vrot.slane %v7920_v22, 4 }
 0x344   : > { %v2576_v13 = vperm.slane %v2568_v17, %v6472_v52  ;;  %v2648_v55 = vrot.slane %v2627_v41, 4  ;;  %v2629_v53 = vsel %vm717_vm2, %v2628_v6, %v8685_v7  ;;  %v2554_v38 = vsel %vm717_vm2, %v2553_v5, %v2534_v25 }
 0x345   : > { %v2637_v11 = vsel %vm717_vm2, %v2621_v29, %v2636_v54  ;;  %v2633_v43 = vperm.slane %v2629_v53, %v6460_v42  ;;  %v2560_v32 = vperm.slane %v2554_v38, %v6472_v52  ;;  %v2566_v58 = vsel %vm717_vm2, %v2565_v34, %v2546_v28 }
 0x346   : > { %v2581_v15 = vrot.slane %v2576_v13, 4  ;;  %v2645_v33 = vperm.slane %v2637_v11, %v6472_v52  ;;  %v2584_v63 = vsel %vm717_vm2, %v2576_v13, %v2583_v27  ;;  %v2473_v49 = vsel %vm717_vm2, %v2472_v26, %v7884_v1  ;;  %v5736_v11 = vld [vmem:[%s6337_s23 + $0x8] sm:$0xff] }
 0x347   : > { %v2649_v22 = vsel %vm717_vm2, %v2633_v43, %v2648_v55  ;;  %v2572_v42 = vperm.slane %v2566_v58, %v6472_v52  ;;  %v2579_v16 = vrot.slane %v2560_v32, 4  ;;  %v2479_v25 = vperm.slane %v2473_v49, %v6472_v52  ;;  %2717 = vmatpush.bf16.msra.mxu1 %v5736_v11  ;;  %5903 = vmatpush.bf16.msra.mxu3 %v5736_v11 }
 0x348   : > { %v2582_v39 = vsel %vm717_vm2, %v2581_v15, %v2564_v60  ;;  %v2664_v20 = vrot.slane %v2645_v33, 4  ;;  %v2657_v62 = vperm.slane %v2649_v22, %v6472_v52  ;;  %v2484_v44 = vrot.slane %v7911_v48, 4 }
 0x349   : > { %v2580_v28 = vsel %vm717_vm2, %v2572_v42, %v2579_v16  ;;  %v2498_v61 = vrot.slane %v2479_v25, 4  ;;  %1276 = vrot.lane.b32.xlu0 %v7900_v45, %s6228_s27  ;;  %2509 = vrot.lane.b32.xlu1 %v2501_v21, %s6226_s22  ;;  %v2634_v48 = vrot.slane %v2621_v29, 4  ;;  %v2646_v47 = vrot.slane %v2633_v43, 4 }
 0x34a   : > { %v2665_v4 = vsel %vm717_vm2, %v2657_v62, %v2664_v20  ;;  %v2485_v1 = vsel %vm717_vm2, %v2484_v44, %v7907_v8  ;;  %v2662_v18 = vrot.slane %v2657_v62, 4  ;;  %1360 = vrot.lane.b32.xlu2 %v7917_v51, %s6228_s27  ;;  %v1180_v21 = vrot.slane %v7841_v46, 4  ;;  %v8686_v44 = vld [vmem:[#allocation9_spill] sm:$0xff] }
 0x34b   : > { %v2491_v59 = vperm.slane %v2485_v1, %v6472_v52  ;;  %v2635_v8 = vsel %vm717_vm2, %v2634_v48, %v2615_v57  ;;  %v2647_v30 = vsel %vm717_vm2, %v2646_v47, %v2627_v41  ;;  %v1267_v60 = vrot.slane %v7877_v56, 4 }
 0x34c   : > { %v2663_v35 = vsel %vm717_vm2, %v2662_v18, %v2645_v33  ;;  %v2641_v45 = vperm.slane %v2635_v8, %v6472_v52  ;;  %v1351_v17 = vrot.slane %v7903_v10, 4  ;;  %v2653_v51 = vperm.slane %v2647_v30, %v6472_v52  ;;  %v8688_v18 = vld [vmem:[#allocation11_spill] sm:$0xff] }
 0x34d   : > { %v2499_v40 = vsel %vm717_vm2, %v2491_v59, %v2498_v61  ;;  %v1181_v46 = vsel %vm717_vm2, %v1180_v21, %v7834_v3  ;;  %v1268_v52 = vsel %vm717_vm2, %v1267_v60, %v7858_v9  ;;  %v2577_v10 = vrot.slane %v2572_v42, 4 }
 0x34e   : > { %v2660_v29 = vrot.slane %v2641_v45, 4  ;;  %v1352_v56 = vsel %vm717_vm2, %v1351_v17, %v7881_v50  ;;  %v2658_v41 = vrot.slane %v2653_v51, 4  ;;  %v2006_v37 = vrot.slane %v7961_v19, 4 }
 0x34f   : > { %v8067_v3 = vsel %vm717_vm2, %v2577_v10, %v2560_v32 }
 0x350   : > { %v2661_v57 = vsel %vm717_vm2, %v2653_v51, %v2660_v29  ;;  %v8073_v9 = vsel %vm717_vm2, %v2658_v41, %v2641_v45  ;;  %v2007_v6 = vsel %vm717_vm2, %v2006_v37, %v7951_v2 }
 0x351   : > { %1934 = vrot.lane.b32.xlu0 %v7966_v36, %s6228_s27  ;;  %2594 = vrot.lane.b32.xlu1 %v2584_v63, %s6227_s24  ;;  %v2496_v36 = vrot.slane %v2491_v59, 4 }
 0x352   : > { %2015 = vrot.lane.b32.xlu2 %v7983_v14, %s6228_s27  ;;  %v1844_v14 = vrot.slane %v7831_v0, 4 }
 0x353   : > { %v8070_v50 = vsel %vm717_vm2, %v2496_v36, %v2479_v25 }
 0x354   : > { %v1845_v54 = vsel %vm717_vm2, %v1844_v14, %v7828_v12 }
 0x359   : > { %2590 = vrot.lane.b32.xlu0 %v2582_v39, %s6226_s22  ;;  %2675 = vrot.lane.b32.xlu1 %v2665_v4, %s6227_s24 }
 0x35a   : > { %2513 = vrot.lane.b32.xlu2 %v7997_v23, %s6227_s24  ;;  %v1925_v23 = vrot.slane %v7942_v31, 4 }
 0x35c   : > { %v1926_v13 = vsel %vm717_vm2, %v1925_v23, %v7935_v24  ;;  %v5735_v24 = vld [vmem:[%s6337_s23] sm:$0xff] }
 0x35d   : > { %2718 = vmatpush.bf16.msra.mxu1 %v5735_v24  ;;  %5904 = vmatpush.bf16.msra.mxu3 %v5735_v24 }
 0x361   : > { %2505 = vrot.lane.b32.xlu0 %v2499_v40, %s6228_s27 }
 0x362   : > { %2586 = vrot.lane.b32.xlu2 %v2580_v28, %s6228_s27  ;;  %v8687_v28 = vld [vmem:[#allocation10_spill] sm:$0xff] }
 0x369   : > { %2667 = vrot.lane.b32.xlu0 %v2661_v57, %s6228_s27 }
 0x36a   : > { %2671 = vrot.lane.b32.xlu2 %v2663_v35, %s6226_s22 }
 0x370   : > { %v1194_v0 = vpop.permute.xlu2 %1193 }
 0x382   : > { %v1281_v5 = vpop.permute.xlu1 %1280 }
 0x384   : > { %v1939_v55 = vpop.permute.xlu2 %1938 }
 0x38c   : > { %v1365_v31 = vpop.permute.xlu2 %1364 }
 0x394   : > { %v2024_v19 = vpop.permute.xlu2 %2023 }
 0x39b   : > { %v1858_v34 = vpop.permute.xlu0 %1857  ;;  %v2020_v27 = vpop.permute.xlu1 %2019 }
 0x39c   : > { %v1190_v2 = vpop.permute.xlu2 %1189 }
 0x39d   : > { %v1201_v33 = vsel %vm1200_vm4, %v1181_v46, %v1190_v2 }
 0x39e   : > { %v1203_v32 = vsel %vm1202_vm5, %v1201_v33, %v1194_v0  ;;  %v6160_v33 = vld [vmem:[#allocation2] sm:$0xff] }
 0x3a3   : > { %v1285_v7 = vpop.permute.xlu0 %1284  ;;  %v1198_v53 = vpop.permute.xlu1 %1197 }
 0x3a4   : > { %v1361_v26 = vpop.permute.xlu2 %1360  ;;  %v1205_v39 = vsel %vm1204_vm6, %v1203_v32, %v1198_v53 }
 0x3a5   : > { %v1371_v63 = vsel %vm1200_vm4, %v1352_v56, %v1361_v26  ;;  %v1209_v4 = vmul.f32 %v8686_v44, %v1205_v39  ;;  %v5948_v26 = vld [vmem:[%s8689_s28] ss:$0 sm:$0xff] }
 0x3a6   : > { %v1372_v20 = vsel %vm1202_vm5, %v1371_v63, %v1365_v31 }
 0x3ab   : > { %v1943_v12 = vpop.permute.xlu0 %1942  ;;  %v1862_v15 = vpop.permute.xlu1 %1861 }
 0x3ac   : > { %v2016_v38 = vpop.permute.xlu2 %2015 }
 0x3ad   : > { %v2026_v61 = vsel %vm1200_vm4, %v2007_v6, %v2016_v38 }
 0x3ae   : > { %v2027_v40 = vsel %vm1202_vm5, %v2026_v61, %v2020_v27 }
 0x3af   : > { %v2028_v17 = vsel %vm1204_vm6, %v2027_v40, %v2024_v19 }
 0x3b0   : > { %v2029_v46 = vmul.f32 %v2028_v17, %v8688_v18 }
 0x3b3   : > { %v1369_v43 = vpop.permute.xlu0 %1368  ;;  %v1854_v58 = vpop.permute.xlu1 %1853 }
 0x3b4   : > { %v1864_v62 = vsel %vm1200_vm4, %v1845_v54, %v1854_v58  ;;  %v1373_v16 = vsel %vm1204_vm6, %v1372_v20, %v1369_v43  ;;  %v2514_v35 = vpop.permute.xlu2 %2513  ;;  %v6161_v58 = vld [vmem:[#allocation2 + $0x8] sm:$0xff] }
 0x3b5   : > { %v1865_v59 = vsel %vm1202_vm5, %v1864_v62, %v1858_v34  ;;  %v1377_v48 = vmul.f32 %v8688_v18, %v1373_v16 }
 0x3b6   : > { %v1866_v45 = vsel %vm1204_vm6, %v1865_v59, %v1862_v15 }
 0x3b7   : > { %v1867_v29 = vmul.f32 %v1866_v45, %v8686_v44 }
 0x3bb   : > { %v1277_v49 = vpop.permute.xlu0 %1276  ;;  %v2510_v56 = vpop.permute.xlu1 %2509 }
 0x3bc   : > { %v1287_v22 = vsel %vm1200_vm4, %v1268_v52, %v1277_v49  ;;  %v2587_v41 = vpop.permute.xlu2 %2586 }
 0x3bd   : > { %v1288_v42 = vsel %vm1202_vm5, %v1287_v22, %v1281_v5  ;;  %v2597_v23 = vsel %vm1200_vm4, %v8067_v3, %v2587_v41  ;;  %v5118_v41 = vld [vmem:[%s6355_s1 + $0x80] sm:$0xf] }
 0x3be   : > { %v1289_v25 = vsel %vm1204_vm6, %v1288_v42, %v1285_v7  ;;  %v6162_v42 = vld [vmem:[#allocation2 + $0x10] sm:$0xff] }
 0x3bf   : > { %v1293_v1 = vmul.f32 %v8687_v28, %v1289_v25 }
 0x3c1   : > { %v1294_v47 = vadd.f32 %v1293_v1, %v1209_v4 }
 0x3c3   : > { %v1935_v8 = vpop.permute.xlu0 %1934  ;;  %v1378_v30 = vadd.f32 %v1377_v48, %v1294_v47  ;;  %v2595_v6 = vpop.permute.xlu1 %2594 }
 0x3c4   : > { %v1945_v21 = vsel %vm1200_vm4, %v1926_v13, %v1935_v8  ;;  %v2672_v27 = vpop.permute.xlu2 %2671 }
 0x3c5   : > { %v1946_v60 = vsel %vm1202_vm5, %v1945_v21, %v1939_v55 }
 0x3c6   : > { %v1947_v51 = vsel %vm1204_vm6, %v1946_v60, %v1943_v12 }
 0x3c7   : > { %v1948_v57 = vmul.f32 %v1947_v51, %v8687_v28 }
 0x3c9   : > { %v1949_v52 = vadd.f32 %v1948_v57, %v1867_v29 }
 0x3cb   : > { %v2591_v10 = vpop.permute.xlu0 %2590  ;;  %v2030_v36 = vadd.f32 %v2029_v46, %v1949_v52  ;;  %v2676_v2 = vpop.permute.xlu1 %2675 }
 0x3cc   : > { %v2598_v37 = vsel %vm1202_vm5, %v2597_v23, %v2591_v10 }
 0x3cd   : > { %v2683_v14 = vpack.c.bf16 %v2030_v36, %v1378_v30  ;;  %v2599_v13 = vsel %vm1204_vm6, %v2598_v37, %v2595_v6 }
 0x3ce   : > { %v2600_v5 = vmul.f32 %v2599_v13, %v8687_v28 }
 0x3cf   : > { %5050 = vmatmul.msk.bf16.vlgmr.msra.gmra.mxu1 %vm676_vm1, %v2683_v14  ;;  %v5761_v14 = vld [vmem:[%s6355_s1 + $0xbc] sm:$0xf0] }
 0x3d0   : > { %v5119_v23 = vor.u32 %v5761_v14, %v5118_v41  ;;  %v5739_v41 = vld [vmem:[%s6355_s1 + $0x14] sm:$0xf] }
 0x3d1   : > { %v5072_v14 = vld [vmem:[%s6355_s1 + $0x50] sm:$0xf0] }
 0x3d2   : > { %3061 = vmatpush.bf16.msrb.mxu2 %v5119_v23  ;;  %v5756_v23 = vld [vmem:[%s6355_s1 + $0x9c] sm:$0xf] }
 0x3d3   : > { %v2506_v54 = vpop.permute.xlu0 %2505 }
 0x3d4   : > { %v2516_v0 = vsel %vm1200_vm4, %v8070_v50, %v2506_v54 }
 0x3d5   : > { %v2517_v55 = vsel %vm1202_vm5, %v2516_v0, %v2510_v56 }
 0x3d6   : > { %v2518_v31 = vsel %vm1204_vm6, %v2517_v55, %v2514_v35 }
 0x3d7   : > { %v2519_v19 = vmul.f32 %v2518_v31, %v8686_v44  ;;  %v6229_v44 = vmov 32.0  }
 0x3d8   : > { %6146 = vrcp.f32 %v6229_v44 }
 0x3d9   : > { %v2601_v34 = vadd.f32 %v2600_v5, %v2519_v19 }
 0x3db   : > { %v2668_v3 = vpop.permute.xlu0 %2667 }
 0x3dc   : > { %v2678_v7 = vsel %vm1200_vm4, %v8073_v9, %v2668_v3 }
 0x3dd   : > { %v2679_v53 = vsel %vm1202_vm5, %v2678_v7, %v2672_v27 }
 0x3de   : > { %v2680_v50 = vsel %vm1204_vm6, %v2679_v53, %v2676_v2  ;;  %v6147_v4 = vpop.eup %6146  ;;  %v8162_v53 = vld [vmem:[%s8690_s15] ss:$0 sm:$0xff] }
 0x3df   : > { %v2681_v11 = vmul.f32 %v2680_v50, %v8688_v18  ;;  %v2744_v28 = vmul.f32 32.0, %v6147_v4  ;;  %vm2748_vm7 = vweird.f32 %v6147_v4  ;;  %v5753_v50 = vld [vmem:[%s6355_s1 + $0x84] sm:$0xf] }
 0x3e1   : > { %v2682_v12 = vadd.f32 %v2681_v11, %v2601_v34  ;;  %v2745_v1 = vsub.f32 1.0, %v2744_v28  ;;  %v5120_v11 = vld [vmem:[%s6355_s1 + $0xc0] sm:$0xf0]  ;;  %v5746_v28 = vld [vmem:[%s6355_s1 + $0x44] sm:$0xf0] }
 0x3e3   : > { %v2684_v24 = vpack.c.bf16 %v2682_v12, %v2682_v12  ;;  %v2746_v61 = vmul.f32 %v6147_v4, %v2745_v1  ;;  %v5126_v12 = vld [vmem:[%s6355_s1 + $0x88] sm:$0xf]  ;;  %v5738_v1 = vld [vmem:[%s6355_s1 + $0xc] sm:$0xf] }
 0x3e5   : > { %5051 = vmatmul.msk.bf16.vlgmr.msra.gmra.mxu3 %vm676_vm1, %v2684_v24  ;;  %v2747_v59 = vadd.f32 %v6147_v4, %v2746_v61  ;;  %v5064_v61 = vld [vmem:[%s6355_s1 + $0x48] sm:$0xf0] }
 0x3e7   : > { %v8137_v18 = vsel %vm2748_vm7, %v6147_v4, %v2747_v59 }
 0x44c   : > { %v2720_v15 = vpop.f32.mrf.mxu1 }
 0x44d   : > { %v2721_v43 = vadd.f32 %v5948_v26, %v2720_v15  ;;  %v5123_v15 = vor.u32 %v5753_v50, %v5120_v11 }
 0x44f   : > { %v2729_v9 = vadd.f32 %v6160_v33, %v2721_v43  ;;  %v5762_v43 = vld [vmem:[%s6355_s1 + $0xc4] sm:$0xf0]  ;;  %v5754_v33 = vld [vmem:[%s6355_s1 + $0x8c] sm:$0xf]  ;;  %3079 = vmatpush.bf16.msrb.mxu3 %v5123_v15 }
 0x451   : > { %v2734_v38 = vsel %vm676_vm1, %v2729_v9, 0.0 }
 0x452   : > { %2735 = vadd.xlane.f32.xlu0 %v2734_v38  ;;  %v5127_v38 = vor.u32 %v5762_v43, %v5126_v12  ;;  %v5757_v43 = vld [vmem:[%s6355_s1 + $0xa4] sm:$0xf] }
 0x454   : > { %v2722_v63 = vpop.f32.mrf.mxu1  ;;  %3097 = vmatpush.bf16.msrb.mxu0 %v5127_v38 }
 0x455   : > { %v2723_v32 = vadd.f32 %v5948_v26, %v2722_v63  ;;  %v5128_v63 = vld [vmem:[%s6355_s1 + $0xc8] sm:$0xf0] }
 0x457   : > { %v2730_v49 = vadd.f32 %v6161_v58, %v2723_v32  ;;  %v5054_v32 = vld [vmem:[%s6355_s1] sm:$0xf] }
 0x458   : > { %v5745_v58 = vld [vmem:[%s6355_s1 + $0x3c] sm:$0xf0] }
 0x459   : > { %v2737_v39 = vsel %vm676_vm1, %v2730_v49, 0.0 }
 0x45a   : > { %2738 = vadd.xlane.f32.xlu2 %v2737_v39 }
 0x468   : > { %v2725_v22 = vpop.f32.mrf.mxu3 }
 0x469   : > { %v2726_v20 = vadd.f32 %v5948_v26, %v2725_v22  ;;  %v5131_v22 = vor.u32 %v5754_v33, %v5128_v63  ;;  %v5765_v26 = vld [vmem:[%s6355_s1 + $0xdc] sm:$0xf0]  ;;  %v5152_v33 = vld [vmem:[%s6355_s1 + $0xe0] sm:$0xf0] }
 0x46a   : > { %v5155_v38 = vor.u32 %v5757_v43, %v5152_v33  ;;  %v5775_v43 = vld [vmem:[%s6370_s0 + $0x30] sm:$0xff] }
 0x46b   : > { %v2731_v62 = vadd.f32 %v6162_v42, %v2726_v20  ;;  %v5055_v20 = vor.u32 %v5745_v58, %v5054_v32  ;;  %v5737_v42 = vld [vmem:[%s6355_s1 + $0x4] sm:$0xf]  ;;  %3115 = vmatpush.bf16.msrb.mxu1 %v5131_v22  ;;  %v5783_v33 = vld [vmem:[%s6370_s0 + $0x70] sm:$0xff] }
 0x46d   : > { %v2740_v16 = vsel %vm676_vm1, %v2731_v62, 0.0  ;;  %3062 = vmatpush.bf16.msrb.mxu2 %v5055_v20  ;;  %v5158_v20 = vld [vmem:[%s6355_s1 + $0xa8] sm:$0xf] }
 0x46e   : > { %2741 = vadd.xlane.f32.xlu1 %v2740_v16  ;;  %v5062_v16 = vld [vmem:[%s6355_s1 + $0x8] sm:$0xf] }
 0x470   : > { %v2727_v25 = vpop.f32.mrf.mxu3 }
 0x471   : > { %v8184_v25 = vld [vmem:[%s8693_s14] ss:$0 sm:$0xff] }
 0x4c5   : > { %v2736_v48 = vpop.xlane.xlu0 %2735 }
 0x4c6   : > { %v2750_v47 = vmul.f32 %v8137_v18, %v2736_v48  ;;  %v5063_v48 = vor.u32 %v5746_v28, %v5062_v16  ;;  %v5741_v16 = vld [vmem:[%s6355_s1 + $0x24] sm:$0xf]  ;;  %v5758_v28 = vld [vmem:[%s6355_s1 + $0xac] sm:$0xf] }
 0x4c8   : > { %v2753_v40 = vsub.f32 %v2729_v9, %v2750_v47  ;;  %v5067_v47 = vor.u32 %v5738_v1, %v5064_v61  ;;  %3098 = vmatpush.bf16.msrb.mxu0 %v5063_v48  ;;  %v5160_v1 = vld [vmem:[%s6355_s1 + $0xe8] sm:$0xf0]  ;;  %v5094_v61 = vld [vmem:[%s6355_s1 + $0x28] sm:$0xf] }
 0x4c9   : > { %v5750_v48 = vld [vmem:[%s6355_s1 + $0x64] sm:$0xf0] }
 0x4ca   : > { %v2756_v35 = vmul.f32 %v2753_v40, %v2753_v40  ;;  %3116 = vmatpush.bf16.msrb.mxu1 %v5067_v47  ;;  %v5742_v47 = vld [vmem:[%s6355_s1 + $0x2c] sm:$0xf] }
 0x4cc   : > { %v2759_v8 = vsel %vm676_vm1, %v2756_v35, 0.0  ;;  %v5763_v35 = vld [vmem:[%s6355_s1 + $0xcc] sm:$0xf0] }
 0x4cd   : > { %v2739_v30 = vpop.xlane.xlu2 %2738  ;;  %2760 = vadd.xlane.f32.xlu0 %v2759_v8  ;;  %v5755_v8 = vld [vmem:[%s6355_s1 + $0x94] sm:$0xf] }
 0x4ce   : > { %v2751_v45 = vmul.f32 %v8137_v18, %v2739_v30 }
 0x4d0   : > { %v8142_v21 = vsub.f32 %v2730_v49, %v2751_v45 }
 0x4d2   : > { %v2757_v60 = vmul.f32 %v8142_v21, %v8142_v21 }
 0x4d4   : > { %v2762_v17 = vsel %vm676_vm1, %v2757_v60, 0.0 }
 0x4d5   : > { %2763 = vadd.xlane.f32.xlu2 %v2762_v17 }
 0x4e1   : > { %v2742_v51 = vpop.xlane.xlu1 %2741 }
 0x4e2   : > { %v2752_v29 = vmul.f32 %v8137_v18, %v2742_v51  ;;  %v5136_v51 = vld [vmem:[%s6355_s1 + $0xd0] sm:$0xf0] }
 0x4e4   : > { %v8148_v57 = vsub.f32 %v2731_v62, %v2752_v29  ;;  %v5056_v62 = vld [vmem:[%s6355_s1 + $0x40] sm:$0xf0]  ;;  %v5070_v29 = vld [vmem:[%s6355_s1 + $0x10] sm:$0xf] }
 0x4e5   : > { %v5059_v4 = vor.u32 %v5737_v42, %v5056_v62  ;;  %v5766_v62 = vld [vmem:[%s6355_s1 + $0xe4] sm:$0xf0] }
 0x4e6   : > { %v2758_v46 = vmul.f32 %v8148_v57, %v8148_v57 }
 0x4e7   : > { %3080 = vmatpush.bf16.msrb.mxu3 %v5059_v4 }
 0x4e8   : > { %v2765_v56 = vsel %vm676_vm1, %v2758_v46, 0.0  ;;  %v5139_v46 = vor.u32 %v5755_v8, %v5136_v51  ;;  %v5168_v51 = vld [vmem:[%s6355_s1 + $0xf0] sm:$0xf0] }
 0x4e9   : > { %2766 = vadd.xlane.f32.xlu1 %v2765_v56  ;;  %v5747_v56 = vld [vmem:[%s6355_s1 + $0x4c] sm:$0xf0] }
 0x4eb   : > { %3151 = vmatpush.bf16.msra.mxu3 %v5139_v46  ;;  %v5102_v46 = vld [vmem:[%s6355_s1 + $0x30] sm:$0xf] }
 0x540   : > { %v2761_v52 = vpop.xlane.xlu0 %2760 }
 0x541   : > { %v2768_v10 = vmul.f32 %v2761_v52, %v8137_v18  ;;  %v5142_v52 = vld [vmem:[%s6355_s1 + $0x98] sm:$0xf] }
 0x543   : > { %v2771_v36 = vadd.f32 1e-05, %v2768_v10  ;;  %v5764_v10 = vld [vmem:[%s6355_s1 + $0xd4] sm:$0xf0] }
 0x545   : > { %6148 = vrsqrt.f32 %v2771_v36  ;;  %vm2780_vm9 = vweird.f32 %v2771_v36 }
 0x548   : > { %v2764_v37 = vpop.xlane.xlu2 %2763 }
 0x549   : > { %v2769_v6 = vmul.f32 %v2764_v37, %v8137_v18  ;;  %v5143_v37 = vor.u32 %v5764_v10, %v5142_v52  ;;  %v5174_v52 = vld [vmem:[%s6355_s1 + $0xb8] sm:$0xf] }
 0x54b   : > { %v6149_v54 = vpop.eup %6148  ;;  %v2772_v13 = vadd.f32 1e-05, %v2769_v6  ;;  %v5075_v6 = vor.u32 %v5739_v41, %v5072_v14  ;;  %3169 = vmatpush.bf16.msra.mxu0 %v5143_v37  ;;  %v5104_v41 = vld [vmem:[%s6355_s1 + $0x70] sm:$0xf0]  ;;  %v5760_v37 = vld [vmem:[%s6355_s1 + $0xbc] sm:$0xf] }
 0x54c   : > { %v2775_v0 = vmul.f32 %v6149_v54, %v2771_v36  ;;  %vm2781_vm8 = vweird.f32 %v6149_v54 }
 0x54d   : > { %6150 = vrsqrt.f32 %v2772_v13  ;;  %vm2782_vm10 = vmor %vm2780_vm9, %vm2781_vm8  ;;  %vm2790_vm12 = vweird.f32 %v2772_v13  ;;  %3152 = vmatpush.bf16.msra.mxu3 %v5075_v6  ;;  %v5176_v6 = vld [vmem:[%s6355_s1 + $0xf8] sm:$0xf0] }
 0x54e   : > { %v2776_v55 = vmul.f32 %v6149_v54, %v2775_v0  ;;  %v5748_v0 = vld [vmem:[%s6355_s1 + $0x54] sm:$0xf0] }
 0x550   : > { %v2777_v31 = vmul.f32 0.5, %v2776_v55 }
 0x552   : > { %v2778_v5 = vsub.f32 1.5, %v2777_v31 }
 0x553   : > { %v6151_v19 = vpop.eup %6150 }
 0x554   : > { %v2779_v34 = vmul.f32 %v6149_v54, %v2778_v5  ;;  %v2785_v3 = vmul.f32 %v6151_v19, %v2772_v13  ;;  %vm2791_vm11 = vweird.f32 %v6151_v19  ;;  %v5078_v13 = vld [vmem:[%s6355_s1 + $0x18] sm:$0xf] }
 0x555   : > { %vm8167_vm13 = vmor %vm2790_vm12, %vm2791_vm11 }
 0x556   : > { %v2786_v27 = vmul.f32 %v6151_v19, %v2785_v3  ;;  %v2783_v7 = vsel %vm2782_vm10, %v6149_v54, %v2779_v34  ;;  %v5144_v54 = vld [vmem:[%s6355_s1 + $0xd8] sm:$0xf0] }
 0x557   : > { %v2804_v9 = vmul.f32 %v2783_v7, %v2753_v40  ;;  %v5134_v40 = vld [vmem:[%s6355_s1 + $0x90] sm:$0xf]  ;;  %v5147_v5 = vor.u32 %v5756_v23, %v5144_v54  ;;  %v5080_v34 = vld [vmem:[%s6355_s1 + $0x58] sm:$0xf0]  ;;  %v5110_v54 = vld [vmem:[%s6355_s1 + $0x38] sm:$0xf] }
 0x558   : > { %v2787_v2 = vmul.f32 0.5, %v2786_v27  ;;  %v5135_v17 = vor.u32 %v5763_v35, %v5134_v40  ;;  %v5079_v27 = vor.u32 %v5748_v0, %v5078_v13  ;;  %v5096_v40 = vld [vmem:[%s6355_s1 + $0x68] sm:$0xf0]  ;;  %v5095_v35 = vor.u32 %v5750_v48, %v5094_v61  ;;  %v5752_v0 = vld [vmem:[%s6355_s1 + $0x74] sm:$0xf0]  ;;  %v5769_v48 = vld [vmem:[%s6370_s0] sm:$0xff] }
 0x559   : > { %v2810_v30 = vmul.f32 %v8162_v53, %v2804_v9  ;;  %3187 = vmatpush.bf16.msra.mxu1 %v5147_v5  ;;  %v5099_v8 = vor.u32 %v5742_v47, %v5096_v40  ;;  %v5179_v13 = vor.u32 %v5760_v37, %v5176_v6  ;;  %v5744_v5 = vld [vmem:[%s6355_s1 + $0x3c] sm:$0xf]  ;;  %v5770_v61 = vld [vmem:[%s6370_s0 + $0x8] sm:$0xff]  ;;  %v5777_v47 = vld [vmem:[%s6370_s0 + $0x40] sm:$0xff] }
 0x55a   : > { %v2788_v24 = vsub.f32 1.5, %v2787_v2  ;;  %3133 = vmatpush.bf16.msra.mxu2 %v5135_v17  ;;  %3170 = vmatpush.bf16.msra.mxu0 %v5079_v27  ;;  %v5824_v40 = vld [vmem:[%s6370_s0 + $0x1b8] sm:$0xff] }
 0x55b   : > { %v8210_v55 = vadd.f32 %v8184_v25, %v2810_v30  ;;  %v5166_v30 = vld [vmem:[%s6355_s1 + $0xb0] sm:$0xf] }
 0x55c   : > { %v2789_v49 = vmul.f32 %v6151_v19, %v2788_v24  ;;  %v2767_v39 = vpop.xlane.xlu1 %2766  ;;  %v5150_v24 = vld [vmem:[%s6355_s1 + $0xa0] sm:$0xf] }
 0x55d   : > { %v2770_v44 = vmul.f32 %v2767_v39, %v8137_v18  ;;  %v5151_v15 = vor.u32 %v5765_v26, %v5150_v24  ;;  %v5799_v24 = vld [vmem:[%s6370_s0 + $0xf0] sm:$0xff]  ;;  %v5790_v26 = vld [vmem:[%s6370_s0 + $0xa8] sm:$0xff] }
 0x55e   : > { %v2793_v59 = vsel %vm8167_vm13, %v6151_v19, %v2789_v49  ;;  %v5740_v19 = vld [vmem:[%s6355_s1 + $0x1c] sm:$0xf] }
 0x55f   : > { %v2805_v45 = vmul.f32 %v2793_v59, %v8142_v21  ;;  %v2773_v60 = vadd.f32 1e-05, %v2770_v44  ;;  %v5071_v21 = vor.u32 %v5747_v56, %v5070_v29  ;;  %v5083_v7 = vor.u32 %v5740_v19, %v5080_v34  ;;  %v5751_v56 = vld [vmem:[%s6355_s1 + $0x6c] sm:$0xf0]  ;;  %v5112_v19 = vld [vmem:[%s6355_s1 + $0x78] sm:$0xf0] }
 0x560   : > { %v5159_v44 = vor.u32 %v5766_v62, %v5158_v20  ;;  %v5163_v59 = vor.u32 %v5758_v28, %v5160_v1  ;;  %v5103_v10 = vor.u32 %v5751_v56, %v5102_v46  ;;  %v5111_v34 = vor.u32 %v5752_v0, %v5110_v54  ;;  %v5787_v20 = vld [vmem:[%s6370_s0 + $0x90] sm:$0xff]  ;;  %v5772_v62 = vld [vmem:[%s6370_s0 + $0x18] sm:$0xff]  ;;  %v5793_v1 = vld [vmem:[%s6370_s0 + $0xc0] sm:$0xff] }
 0x561   : > { %v2811_v36 = vmul.f32 %v8162_v53, %v2805_v45  ;;  %6152 = vrsqrt.f32 %v2773_v60  ;;  %3134 = vmatpush.bf16.msra.mxu2 %v5071_v21  ;;  %3188 = vmatpush.bf16.msra.mxu1 %v5083_v7  ;;  %vm2800_vm15 = vweird.f32 %v2773_v60  ;;  %v5767_v45 = vld [vmem:[%s6355_s1 + $0xec] sm:$0xf0]  ;;  %v5743_v21 = vld [vmem:[%s6355_s1 + $0x34] sm:$0xf]  ;;  %v5115_v27 = vor.u32 %v5744_v5, %v5112_v19  ;;  %v5792_v7 = vld [vmem:[%s6370_s0 + $0xb8] sm:$0xff] }
 0x562   : > { %v5167_v17 = vor.u32 %v5767_v45, %v5166_v30  ;;  %v5107_v23 = vor.u32 %v5743_v21, %v5104_v41  ;;  %v5779_v28 = vld [vmem:[%s6370_s0 + $0x50] sm:$0xff]  ;;  %v5806_v46 = vld [vmem:[%s6370_s0 + $0x128] sm:$0xff]  ;;  %v8370_v56 = vld [vmem:[%s6360_s3] sm:$0xff] }
 0x563   : > { %v8213_v31 = vadd.f32 %v8184_v25, %v2811_v36  ;;  %v5768_v36 = vld [vmem:[%s6355_s1 + $0xf4] sm:$0xf0]  ;;  %v5823_v30 = vld [vmem:[%s6370_s0 + $0x1b0] sm:$0xff]  ;;  %v5829_v21 = vld [vmem:[%s6370_s0 + $0x1e0] sm:$0xff] }
 0x564   : > { %v5175_v14 = vor.u32 %v5768_v36, %v5174_v52  ;;  %v5831_v45 = vld [vmem:[%s6370_s0 + $0x1f0] sm:$0xff]  ;;  %v5821_v36 = vld [vmem:[%s6370_s0 + $0x1a0] sm:$0xff]  ;;  %v5814_v41 = vld [vmem:[%s6370_s0 + $0x168] sm:$0xff] }
 0x565   : > { %v8219_v3 = vpack.c.bf16 %v8213_v31, %v8210_v55  ;;  %v5820_v0 = vld [vmem:[%s6370_s0 + $0x198] sm:$0xff]  ;;  %v5805_v19 = vld [vmem:[%s6370_s0 + $0x120] sm:$0xff] }
 0x566   : > { %v5828_v5 = vld [vmem:[%s6370_s0 + $0x1d8] sm:$0xff] }
 0x567   : > { %v6153_v2 = vpop.eup %6152  ;;  %5180 = vmatmul.msk.bf16.vlgmr.msrb.gmra.mxu2 %vm676_vm1, %v8219_v3  ;;  %5182 = vmatmul.msk.bf16.vlgmr.msrb.gmra.mxu3 %vm676_vm1, %v8219_v3 }
 0x568   : > { %v2795_v50 = vmul.f32 %v6153_v2, %v2773_v60  ;;  %5184 = vmatmul.msk.bf16.vlgmr.msrb.gmra.mxu0 %vm676_vm1, %v8219_v3  ;;  %5186 = vmatmul.msk.bf16.vlgmr.msrb.gmra.mxu1 %vm676_vm1, %v8219_v3  ;;  %vm2801_vm14 = vweird.f32 %v6153_v2  ;;  %v5759_v60 = vld [vmem:[%s6355_s1 + $0xb4] sm:$0xf] }
 0x569   : > { %3205 = vmatpush.bf16.msrb.mxu2 %v5151_v15  ;;  %3223 = vmatpush.bf16.msrb.mxu3 %v5155_v38  ;;  %vm2802_vm0 = vmor %vm2800_vm15, %vm2801_vm14  ;;  %v5171_v29 = vor.u32 %v5759_v60, %v5168_v51  ;;  %v5798_v15 = vld [vmem:[%s6370_s0 + $0xe8] sm:$0xff]  ;;  %v5797_v38 = vld [vmem:[%s6370_s0 + $0xe0] sm:$0xff] }
 0x56a   : > { %v2796_v11 = vmul.f32 %v6153_v2, %v2795_v50  ;;  %3241 = vmatpush.bf16.msrb.mxu0 %v5159_v44  ;;  %3259 = vmatpush.bf16.msrb.mxu1 %v5163_v59  ;;  %v5776_v50 = vld [vmem:[%s6370_s0 + $0x38] sm:$0xff]  ;;  %v5794_v44 = vld [vmem:[%s6370_s0 + $0xc8] sm:$0xff]  ;;  %v5807_v51 = vld [vmem:[%s6370_s0 + $0x130] sm:$0xff] }
 0x56b   : > { %v5778_v59 = vld [vmem:[%s6370_s0 + $0x48] sm:$0xff]  ;;  %v5816_v60 = vld [vmem:[%s6370_s0 + $0x178] sm:$0xff] }
 0x56c   : > { %v2797_v12 = vmul.f32 0.5, %v2796_v11  ;;  %v5784_v11 = vld [vmem:[%s6370_s0 + $0x78] sm:$0xff] }
 0x56e   : > { %v2798_v9 = vsub.f32 1.5, %v2797_v12  ;;  %3242 = vmatpush.bf16.msrb.mxu0 %v5095_v35  ;;  %3260 = vmatpush.bf16.msrb.mxu1 %v5099_v8  ;;  %v5791_v12 = vld [vmem:[%s6370_s0 + $0xb0] sm:$0xff]  ;;  %v5832_v35 = vld [vmem:[%s6370_s0 + $0x1f8] sm:$0xff] }
 0x56f   : > { %v5808_v8 = vld [vmem:[%s6370_s0 + $0x138] sm:$0xff] }
 0x570   : > { %v2799_v63 = vmul.f32 %v6153_v2, %v2798_v9  ;;  %v5789_v9 = vld [vmem:[%s6370_s0 + $0xa0] sm:$0xff] }
 0x572   : > { %v2803_v32 = vsel %vm2802_vm0, %v6153_v2, %v2799_v63  ;;  %v5800_v2 = vld [vmem:[%s6370_s0 + $0xf8] sm:$0xff]  ;;  %v5774_v63 = vld [vmem:[%s6370_s0 + $0x28] sm:$0xff] }
 0x573   : > { %v2806_v58 = vmul.f32 %v2803_v32, %v8148_v57  ;;  %v5086_v57 = vld [vmem:[%s6355_s1 + $0x20] sm:$0xf]  ;;  %v5782_v32 = vld [vmem:[%s6370_s0 + $0x68] sm:$0xff] }
 0x575   : > { %v2812_v49 = vmul.f32 %v8162_v53, %v2806_v58  ;;  %v5749_v53 = vld [vmem:[%s6355_s1 + $0x5c] sm:$0xf0]  ;;  %v5788_v58 = vld [vmem:[%s6370_s0 + $0x98] sm:$0xff] }
 0x576   : > { %v5087_v42 = vor.u32 %v5749_v53, %v5086_v57  ;;  %v5773_v57 = vld [vmem:[%s6370_s0 + $0x20] sm:$0xff] }
 0x577   : > { %v8236_v39 = vadd.f32 %v8184_v25, %v2812_v49  ;;  %v5088_v25 = vld [vmem:[%s6355_s1 + $0x60] sm:$0xf0]  ;;  %v5796_v49 = vld [vmem:[%s6370_s0 + $0xd8] sm:$0xff] }
 0x578   : > { %v5091_v4 = vor.u32 %v5741_v16, %v5088_v25  ;;  %3206 = vmatpush.bf16.msrb.mxu2 %v5087_v42  ;;  %v5781_v53 = vld [vmem:[%s6370_s0 + $0x60] sm:$0xff]  ;;  %v5795_v42 = vld [vmem:[%s6370_s0 + $0xd0] sm:$0xff]  ;;  %v5780_v16 = vld [vmem:[%s6370_s0 + $0x58] sm:$0xff] }
 0x579   : > { %v8240_v22 = vpack.c.bf16 %v8236_v39, %v8236_v39  ;;  %v5786_v25 = vld [vmem:[%s6370_s0 + $0x88] sm:$0xff] }
 0x57a   : > { %3224 = vmatpush.bf16.msrb.mxu3 %v5091_v4  ;;  %v5771_v4 = vld [vmem:[%s6370_s0 + $0x10] sm:$0xff] }
 0x57b   : > { %5181 = vmatmul.msk.bf16.gmra.mxu2 %vm676_vm1, %v8240_v22  ;;  %5183 = vmatmul.msk.bf16.gmra.mxu3 %vm676_vm1, %v8240_v22 }
 0x57c   : > { %5185 = vmatmul.msk.bf16.gmra.mxu0 %vm676_vm1, %v8240_v22  ;;  %5187 = vmatmul.msk.bf16.gmra.mxu1 %vm676_vm1, %v8240_v22 }
 0x58b   : > { %5188 = vmatmul.msk.bf16.vlgmr.msra.gmra.mxu2 %vm676_vm1, %v8219_v3  ;;  %5190 = vmatmul.msk.bf16.vlgmr.msra.gmra.mxu3 %vm676_vm1, %v8219_v3 }
 0x58c   : > { %5192 = vmatmul.msk.bf16.vlgmr.msra.gmra.mxu0 %vm676_vm1, %v8219_v3  ;;  %5194 = vmatmul.msk.bf16.vlgmr.msra.gmra.mxu1 %vm676_vm1, %v8219_v3 }
 0x58d   : > { %3277 = vmatpush.bf16.msra.mxu2 %v5167_v17  ;;  %3295 = vmatpush.bf16.msra.mxu3 %v5171_v29  ;;  %v5830_v17 = vld [vmem:[%s6370_s0 + $0x1e8] sm:$0xff]  ;;  %v5815_v29 = vld [vmem:[%s6370_s0 + $0x170] sm:$0xff] }
 0x58e   : > { %3313 = vmatpush.bf16.msra.mxu0 %v5175_v14  ;;  %3331 = vmatpush.bf16.msra.mxu1 %v5179_v13  ;;  %v8376_v14 = vperm.slane %v8370_v56, 2 }
 0x591   : > { %3278 = vmatpush.bf16.msra.mxu2 %v5103_v10  ;;  %3296 = vmatpush.bf16.msra.mxu3 %v5107_v23  ;;  %v8379_v23 = vperm.slane %v8370_v56, 3 }
 0x592   : > { %3314 = vmatpush.bf16.msra.mxu0 %v5111_v34  ;;  %3332 = vmatpush.bf16.msra.mxu1 %v5115_v27  ;;  %v8387_v34 = vperm.slane %v8370_v56, 0  ;;  %v8390_v27 = vperm.slane %v8370_v56, 1 }
 0x59b   : > { %5189 = vmatmul.msk.bf16.gmra.mxu2 %vm676_vm1, %v8240_v22  ;;  %5191 = vmatmul.msk.bf16.gmra.mxu3 %vm676_vm1, %v8240_v22 }
 0x59c   : > { %5193 = vmatmul.msk.bf16.gmra.mxu0 %vm676_vm1, %v8240_v22  ;;  %5195 = vmatmul.msk.bf16.gmra.mxu1 %vm676_vm1, %v8240_v22 }
 0x5ab   : > { %5196 = vmatmul.msk.bf16.vlgmr.msrb.gmra.mxu2 %vm676_vm1, %v8219_v3  ;;  %5198 = vmatmul.msk.bf16.vlgmr.msrb.gmra.mxu3 %vm676_vm1, %v8219_v3 }
 0x5ac   : > { %5200 = vmatmul.msk.bf16.vlgmr.msrb.gmra.mxu0 %vm676_vm1, %v8219_v3  ;;  %5202 = vmatmul.msk.bf16.vlgmr.msrb.gmra.mxu1 %vm676_vm1, %v8219_v3 }
 0x5ad   : > { %4487 = vmatpush.bf16.msrb.mxu0 %v5792_v7  ;;  %4505 = vmatpush.bf16.msrb.mxu1 %v5800_v2 }
 0x5ae   : > { %4451 = vmatpush.bf16.msrb.mxu2 %v5776_v50  ;;  %4469 = vmatpush.bf16.msrb.mxu3 %v5784_v11  ;;  %v5813_v50 = vld [vmem:[%s6370_s0 + $0x160] sm:$0xff] }
 0x5b1   : > { %4488 = vmatpush.bf16.msrb.mxu0 %v5791_v12  ;;  %4506 = vmatpush.bf16.msrb.mxu1 %v5799_v24  ;;  %v5819_v24 = vld [vmem:[%s6370_s0 + $0x190] sm:$0xff] }
 0x5b2   : > { %4452 = vmatpush.bf16.msrb.mxu2 %v5775_v43  ;;  %4470 = vmatpush.bf16.msrb.mxu3 %v5783_v33 }
 0x5b5   : > { %4489 = vmatpush.bf16.msrb.mxu0 %v5790_v26  ;;  %4507 = vmatpush.bf16.msrb.mxu1 %v5798_v15  ;;  %v5827_v26 = vld [vmem:[%s6370_s0 + $0x1d0] sm:$0xff]  ;;  %v5804_v15 = vld [vmem:[%s6370_s0 + $0x118] sm:$0xff] }
 0x5b6   : > { %4453 = vmatpush.bf16.msrb.mxu2 %v5774_v63  ;;  %4471 = vmatpush.bf16.msrb.mxu3 %v5782_v32 }
 0x5b9   : > { %4490 = vmatpush.bf16.msrb.mxu0 %v5789_v9  ;;  %4508 = vmatpush.bf16.msrb.mxu1 %v5797_v38 }
 0x5ba   : > { %4454 = vmatpush.bf16.msrb.mxu2 %v5773_v57  ;;  %4472 = vmatpush.bf16.msrb.mxu3 %v5781_v53 }
 0x5bb   : > { %5197 = vmatmul.msk.bf16.gmra.mxu2 %vm676_vm1, %v8240_v22  ;;  %5199 = vmatmul.msk.bf16.gmra.mxu3 %vm676_vm1, %v8240_v22 }
 0x5bc   : > { %5201 = vmatmul.msk.bf16.gmra.mxu0 %vm676_vm1, %v8240_v22  ;;  %5203 = vmatmul.msk.bf16.gmra.mxu1 %vm676_vm1, %v8240_v22 }
 0x5bd   : > { %4491 = vmatpush.bf16.msrb.mxu0 %v5788_v58  ;;  %4509 = vmatpush.bf16.msrb.mxu1 %v5796_v49  ;;  %v5812_v58 = vld [vmem:[%s6370_s0 + $0x158] sm:$0xff] }
 0x5be   : > { %4455 = vmatpush.bf16.msrb.mxu2 %v5772_v62  ;;  %4473 = vmatpush.bf16.msrb.mxu3 %v5780_v16 }
 0x5c1   : > { %4492 = vmatpush.bf16.msrb.mxu0 %v5787_v20  ;;  %4510 = vmatpush.bf16.msrb.mxu1 %v5795_v42 }
 0x5c2   : > { %4456 = vmatpush.bf16.msrb.mxu2 %v5771_v4  ;;  %4474 = vmatpush.bf16.msrb.mxu3 %v5779_v28  ;;  %v5818_v28 = vld [vmem:[%s6370_s0 + $0x188] sm:$0xff] }
 0x5c5   : > { %4493 = vmatpush.bf16.msrb.mxu0 %v5786_v25  ;;  %4511 = vmatpush.bf16.msrb.mxu1 %v5794_v44 }
 0x5c6   : > { %4457 = vmatpush.bf16.msrb.mxu2 %v5770_v61  ;;  %4475 = vmatpush.bf16.msrb.mxu3 %v5778_v59 }
 0x5c9   : > { %4512 = vmatpush.bf16.msrb.mxu1 %v5793_v1  ;;  %v5803_v1 = vld [vmem:[%s6370_s0 + $0x110] sm:$0xff] }
 0x5ca   : > { %4458 = vmatpush.bf16.msrb.mxu2 %v5769_v48  ;;  %4476 = vmatpush.bf16.msrb.mxu3 %v5777_v47  ;;  %v5811_v48 = vld [vmem:[%s6370_s0 + $0x150] sm:$0xff]  ;;  %v5817_v47 = vld [vmem:[%s6370_s0 + $0x180] sm:$0xff] }
 0x5cb   : > { %5204 = vmatmul.msk.bf16.vlgmr.msra.gmra.mxu2 %vm676_vm1, %v8219_v3  ;;  %5206 = vmatmul.msk.bf16.vlgmr.msra.gmra.mxu3 %vm676_vm1, %v8219_v3 }
 0x5cc   : > { %5208 = vmatmul.msk.bf16.vlgmr.msra.gmra.mxu0 %vm676_vm1, %v8219_v3  ;;  %5210 = vmatmul.msk.bf16.vlgmr.msra.gmra.mxu1 %vm676_vm1, %v8219_v3  ;;  %v5785_v3 = vld [vmem:[%s6370_s0 + $0x80] sm:$0xff] }
 0x5cd   : > { %4494 = vmatpush.bf16.msrb.mxu0 %v5785_v3  ;;  %4577 = vmatpush.bf16.msra.mxu1 %v5832_v35  ;;  %v5826_v3 = vld [vmem:[%s6370_s0 + $0x1c8] sm:$0xff] }
 0x5ce   : > { %4523 = vmatpush.bf16.msra.mxu2 %v5808_v8  ;;  %4541 = vmatpush.bf16.msra.mxu3 %v5816_v60  ;;  %v5802_v60 = vld [vmem:[%s6370_s0 + $0x108] sm:$0xff] }
 0x5d1   : > { %4559 = vmatpush.bf16.msra.mxu0 %v5824_v40  ;;  %4578 = vmatpush.bf16.msra.mxu1 %v5831_v45  ;;  %v5825_v40 = vld [vmem:[%s6370_s0 + $0x1c0] sm:$0xff] }
 0x5d2   : > { %4524 = vmatpush.bf16.msra.mxu2 %v5807_v51  ;;  %4542 = vmatpush.bf16.msra.mxu3 %v5815_v29 }
 0x5d5   : > { %4560 = vmatpush.bf16.msra.mxu0 %v5823_v30  ;;  %4579 = vmatpush.bf16.msra.mxu1 %v5830_v17 }
 0x5d6   : > { %4525 = vmatpush.bf16.msra.mxu2 %v5806_v46  ;;  %4543 = vmatpush.bf16.msra.mxu3 %v5814_v41 }
 0x5d9   : > { %4580 = vmatpush.bf16.msra.mxu1 %v5829_v21 }
 0x5da   : > { %4526 = vmatpush.bf16.msra.mxu2 %v5805_v19  ;;  %4544 = vmatpush.bf16.msra.mxu3 %v5813_v50 }
 0x5db   : > { %5205 = vmatmul.msk.bf16.gmra.mxu2 %vm676_vm1, %v8240_v22  ;;  %5207 = vmatmul.msk.bf16.gmra.mxu3 %vm676_vm1, %v8240_v22 }
 0x5dc   : > { %5209 = vmatmul.msk.bf16.gmra.mxu0 %vm676_vm1, %v8240_v22  ;;  %5211 = vmatmul.msk.bf16.gmra.mxu1 %vm676_vm1, %v8240_v22  ;;  %v5822_v22 = vld [vmem:[%s6370_s0 + $0x1a8] sm:$0xff] }
 0x5dd   : > { %4561 = vmatpush.bf16.msra.mxu0 %v5822_v22  ;;  %4581 = vmatpush.bf16.msra.mxu1 %v5828_v5  ;;  %v5810_v22 = vld [vmem:[%s6370_s0 + $0x148] sm:$0xff] }
 0x5de   : > { %4527 = vmatpush.bf16.msra.mxu2 %v5804_v15  ;;  %4545 = vmatpush.bf16.msra.mxu3 %v5812_v58  ;;  %v5847_v15 = vld [vmem:[%s6370_s0 + $0x270] sm:$0xff]  ;;  %v8432_v58 = vperm.slane %v8370_v56, 6 }
 0x5e1   : > { %4562 = vmatpush.bf16.msra.mxu0 %v5821_v36  ;;  %4582 = vmatpush.bf16.msra.mxu1 %v5827_v26  ;;  %v5801_v36 = vld [vmem:[%s6370_s0 + $0x100] sm:$0xff] }
 0x5e2   : > { %4528 = vmatpush.bf16.msra.mxu2 %v5803_v1  ;;  %4546 = vmatpush.bf16.msra.mxu3 %v5811_v48 }
 0x5e5   : > { %v3100_v52 = vpop.f32.mrf.mxu0  ;;  %v3118_v10 = vpop.f32.mrf.mxu1  ;;  %4563 = vmatpush.bf16.msra.mxu0 %v5820_v0  ;;  %4583 = vmatpush.bf16.msra.mxu1 %v5826_v3  ;;  %v8448_v3 = vperm.slane %v8370_v56, 5 }
 0x5e6   : > { %v3101_v54 = vadd.f32 %v3100_v52, %v8376_v14  ;;  %v3119_v13 = vadd.f32 %v3118_v10, %v8379_v23  ;;  %4529 = vmatpush.bf16.msra.mxu2 %v5802_v60  ;;  %4547 = vmatpush.bf16.msra.mxu3 %v5810_v22  ;;  %v5856_v52 = vld [vmem:[%s6370_s0 + $0x2b8] sm:$0xff] }
 0x5e7   : > { %v5864_v10 = vld [vmem:[%s6370_s0 + $0x2f8] sm:$0xff] }
 0x5e8   : > { %v3345_v43 = vmax.f32 %v3101_v54, 0.0  ;;  %v3346_v33 = vmax.f32 %v3119_v13, 0.0  ;;  %v5855_v54 = vld [vmem:[%s6370_s0 + $0x2b0] sm:$0xff] }
 0x5e9   : > { %4564 = vmatpush.bf16.msra.mxu0 %v5819_v24  ;;  %4584 = vmatpush.bf16.msra.mxu1 %v5825_v40  ;;  %v5863_v13 = vld [vmem:[%s6370_s0 + $0x2f0] sm:$0xff] }
 0x5ea   : > { %v3064_v37 = vpop.f32.mrf.mxu2  ;;  %v3082_v6 = vpop.f32.mrf.mxu3  ;;  %4530 = vmatpush.bf16.msra.mxu2 %v5801_v36  ;;  %v5859_v40 = vld [vmem:[%s6370_s0 + $0x2d0] sm:$0xff] }
 0x5eb   : > { %v3065_v63 = vadd.f32 %v3064_v37, %v8387_v34  ;;  %v3083_v32 = vadd.f32 %v3082_v6, %v8390_v27  ;;  %v5835_v36 = vld [vmem:[%s6370_s0 + $0x210] sm:$0xff] }
 0x5ed   : > { %v3102_v7 = vpop.f32.mrf.mxu0  ;;  %v3120_v2 = vpop.f32.mrf.mxu1  ;;  %v3343_v16 = vmax.f32 %v3065_v63, 0.0  ;;  %v3344_v25 = vmax.f32 %v3083_v32, 0.0  ;;  %4565 = vmatpush.bf16.msra.mxu0 %v5818_v28  ;;  %v5861_v63 = vld [vmem:[%s6370_s0 + $0x2e0] sm:$0xff]  ;;  %v5846_v32 = vld [vmem:[%s6370_s0 + $0x268] sm:$0xff]  ;;  %v8445_v28 = vperm.slane %v8370_v56, 4 }
 0x5ee   : > { %v3103_v11 = vadd.f32 %v3102_v7, %v8376_v14  ;;  %v3121_v12 = vadd.f32 %v3120_v2, %v8379_v23  ;;  %v5839_v7 = vld [vmem:[%s6370_s0 + $0x230] sm:$0xff] }
 0x5f0   : > { %v3361_v9 = vmax.f32 %v3103_v11, 0.0  ;;  %v3362_v38 = vmax.f32 %v3121_v12, 0.0  ;;  %v5854_v11 = vld [vmem:[%s6370_s0 + $0x2a8] sm:$0xff] }
 0x5f1   : > { %4566 = vmatpush.bf16.msra.mxu0 %v5817_v47  ;;  %v5862_v12 = vld [vmem:[%s6370_s0 + $0x2e8] sm:$0xff]  ;;  %v5851_v47 = vld [vmem:[%s6370_s0 + $0x290] sm:$0xff] }
 0x5f2   : > { %v3393_v49 = vpack.c.bf16 %v3361_v9, %v3345_v43  ;;  %v3394_v57 = vpack.c.bf16 %v3362_v38, %v3346_v33  ;;  %v3066_v53 = vpop.f32.mrf.mxu2  ;;  %v3084_v20 = vpop.f32.mrf.mxu3  ;;  %v5838_v43 = vld [vmem:[%s6370_s0 + $0x228] sm:$0xff]  ;;  %v5853_v38 = vld [vmem:[%s6370_s0 + $0x2a0] sm:$0xff] }
 0x5f3   : > { %v3067_v42 = vadd.f32 %v3066_v53, %v8387_v34  ;;  %v3085_v62 = vadd.f32 %v3084_v20, %v8390_v27 }
 0x5f4   : > { %4495 = vmatmul.bf16.vlgmr.msrb.gmra.mxu0 %v3393_v49  ;;  %4513 = vmatmul.bf16.vlgmr.msrb.gmra.mxu1 %v3394_v57  ;;  %v8435_v49 = vperm.slane %v8370_v56, 7  ;;  %v5837_v57 = vld [vmem:[%s6370_s0 + $0x220] sm:$0xff] }
 0x5f5   : > { %v3359_v44 = vmax.f32 %v3067_v42, 0.0  ;;  %v3360_v4 = vmax.f32 %v3085_v62, 0.0  ;;  %4631 = vmatpush.bf16.msrb.mxu0 %v5856_v52  ;;  %4649 = vmatpush.bf16.msrb.mxu1 %v5864_v10  ;;  %v5852_v42 = vld [vmem:[%s6370_s0 + $0x298] sm:$0xff]  ;;  %v5850_v52 = vld [vmem:[%s6370_s0 + $0x288] sm:$0xff] }
 0x5f6   : > { %v5860_v62 = vld [vmem:[%s6370_s0 + $0x2d8] sm:$0xff]  ;;  %v5858_v10 = vld [vmem:[%s6370_s0 + $0x2c8] sm:$0xff] }
 0x5f7   : > { %v3391_v61 = vpack.c.bf16 %v3359_v44, %v3343_v16  ;;  %v3392_v59 = vpack.c.bf16 %v3360_v4, %v3344_v25  ;;  %v5845_v16 = vld [vmem:[%s6370_s0 + $0x260] sm:$0xff]  ;;  %v5836_v25 = vld [vmem:[%s6370_s0 + $0x218] sm:$0xff] }
 0x5f9   : > { %v3105_v35 = vpop.f32.mrf.mxu0  ;;  %v3123_v8 = vpop.f32.mrf.mxu1  ;;  %4459 = vmatmul.bf16.vlgmr.msrb.gmra.mxu2 %v3391_v61  ;;  %4477 = vmatmul.bf16.vlgmr.msrb.gmra.mxu3 %v3392_v59 }
 0x5fa   : > { %v3106_v30 = vadd.f32 %v3105_v35, %v8376_v14  ;;  %v3124_v45 = vadd.f32 %v3123_v8, %v8379_v23  ;;  %v5809_v14 = vld [vmem:[%s6370_s0 + $0x140] sm:$0xff]  ;;  %v5840_v23 = vld [vmem:[%s6370_s0 + $0x238] sm:$0xff]  ;;  %4632 = vmatpush.bf16.msrb.mxu0 %v5855_v54  ;;  %4650 = vmatpush.bf16.msrb.mxu1 %v5863_v13 }
 0x5fb   : > { %4548 = vmatpush.bf16.msra.mxu3 %v5809_v14  ;;  %4595 = vmatpush.bf16.msrb.mxu2 %v5840_v23  ;;  %v5844_v35 = vld [vmem:[%s6370_s0 + $0x258] sm:$0xff]  ;;  %v5843_v14 = vld [vmem:[%s6370_s0 + $0x250] sm:$0xff] }
 0x5fc   : > { %v3377_v17 = vmax.f32 %v3106_v30, 0.0  ;;  %v3378_v51 = vmax.f32 %v3124_v45, 0.0 }
 0x5fe   : > { %v3069_v29 = vpop.f32.mrf.mxu2  ;;  %v3087_v46 = vpop.f32.mrf.mxu3  ;;  %v3409_v0 = vpack.c.bf16 %v3377_v17, %v3377_v17  ;;  %v3410_v5 = vpack.c.bf16 %v3378_v51, %v3378_v51  ;;  %4633 = vmatpush.bf16.msrb.mxu0 %v5854_v11  ;;  %4651 = vmatpush.bf16.msrb.mxu1 %v5862_v12 }
 0x5ff   : > { %v3070_v21 = vadd.f32 %v3069_v29, %v8387_v34  ;;  %v3088_v41 = vadd.f32 %v3087_v46, %v8390_v27  ;;  %v5848_v27 = vld [vmem:[%s6370_s0 + $0x278] sm:$0xff]  ;;  %4596 = vmatpush.bf16.msrb.mxu2 %v5839_v7  ;;  %v5834_v7 = vld [vmem:[%s6370_s0 + $0x208] sm:$0xff] }
 0x600   : > { %4613 = vmatpush.bf16.msrb.mxu3 %v5848_v27 }
 0x601   : > { %v3107_v37 = vpop.f32.mrf.mxu0  ;;  %v3125_v6 = vpop.f32.mrf.mxu1  ;;  %v3375_v19 = vmax.f32 %v3070_v21, 0.0  ;;  %v3376_v34 = vmax.f32 %v3088_v41, 0.0 }
 0x602   : > { %4634 = vmatpush.bf16.msrb.mxu0 %v5853_v38  ;;  %4652 = vmatpush.bf16.msrb.mxu1 %v5861_v63  ;;  %v5895_v38 = vld [vmem:[%s6370_s0 + $0x3f0] sm:$0xff] }
 0x603   : > { %v3407_v24 = vpack.c.bf16 %v3375_v19, %v3375_v19  ;;  %v3408_v26 = vpack.c.bf16 %v3376_v34, %v3376_v34  ;;  %4597 = vmatpush.bf16.msrb.mxu2 %v5838_v43  ;;  %v5857_v19 = vld [vmem:[%s6370_s0 + $0x2c0] sm:$0xff] }
 0x604   : > { %4500 = vmatmul.bf16.gmra.mxu0 %v3409_v0  ;;  %4518 = vmatmul.bf16.gmra.mxu1 %v3410_v5  ;;  %v5849_v5 = vld [vmem:[%s6370_s0 + $0x280] sm:$0xff] }
 0x605   : > { %4614 = vmatpush.bf16.msrb.mxu3 %v5847_v15  ;;  %v5896_v15 = vld [vmem:[%s6370_s0 + $0x3f8] sm:$0xff]  ;;  %v5833_v43 = vld [vmem:[%s6370_s0 + $0x200] sm:$0xff] }
 0x606   : > { %v3071_v2 = vpop.f32.mrf.mxu2  ;;  %v3089_v50 = vpop.f32.mrf.mxu3  ;;  %4635 = vmatpush.bf16.msrb.mxu0 %v5852_v42  ;;  %4653 = vmatpush.bf16.msrb.mxu1 %v5860_v62  ;;  %v5880_v42 = vld [vmem:[%s6370_s0 + $0x378] sm:$0xff]  ;;  %v5886_v62 = vld [vmem:[%s6370_s0 + $0x3a8] sm:$0xff] }
 0x607   : > { %4598 = vmatpush.bf16.msrb.mxu2 %v5837_v57  ;;  %v5842_v2 = vld [vmem:[%s6370_s0 + $0x248] sm:$0xff] }
 0x609   : > { %v3172_v33 = vpop.f32.mrf.mxu0  ;;  %v3190_v9 = vpop.f32.mrf.mxu1  ;;  %4464 = vmatmul.bf16.gmra.mxu2 %v3407_v24  ;;  %4482 = vmatmul.bf16.gmra.mxu3 %v3408_v26  ;;  %v5888_v26 = vld [vmem:[%s6370_s0 + $0x3b8] sm:$0xff] }
 0x60a   : > { %4615 = vmatpush.bf16.msrb.mxu3 %v5846_v32  ;;  %v3173_v44 = vadd.f32 %v3172_v33, %v8432_v58  ;;  %v3191_v4 = vadd.f32 %v3190_v9, %v8435_v49  ;;  %4636 = vmatpush.bf16.msrb.mxu0 %v5851_v47  ;;  %v5841_v33 = vld [vmem:[%s6370_s0 + $0x240] sm:$0xff]  ;;  %v5887_v9 = vld [vmem:[%s6370_s0 + $0x3b0] sm:$0xff] }
 0x60b   : > { %4599 = vmatpush.bf16.msrb.mxu2 %v5836_v25  ;;  %4654 = vmatpush.bf16.msrb.mxu1 %v5859_v40 }
 0x60c   : > { %v3349_v8 = vmax.f32 %v3173_v44, 0.0  ;;  %v3350_v30 = vmax.f32 %v3191_v4, 0.0 }
 0x60e   : > { %v3136_v53 = vpop.f32.mrf.mxu2  ;;  %v3154_v20 = vpop.f32.mrf.mxu3  ;;  %4616 = vmatpush.bf16.msrb.mxu3 %v5845_v16  ;;  %4637 = vmatpush.bf16.msrb.mxu0 %v5850_v52  ;;  %v5894_v16 = vld [vmem:[%s6370_s0 + $0x3e8] sm:$0xff]  ;;  %v5892_v52 = vld [vmem:[%s6370_s0 + $0x3d8] sm:$0xff] }
 0x60f   : > { %v3137_v60 = vadd.f32 %v3136_v53, %v8445_v28  ;;  %v3155_v22 = vadd.f32 %v3154_v20, %v8448_v3  ;;  %4600 = vmatpush.bf16.msrb.mxu2 %v5835_v36  ;;  %4655 = vmatpush.bf16.msrb.mxu1 %v5858_v10  ;;  %v5869_v10 = vld [vmem:[%s6370_s0 + $0x320] sm:$0xff] }
 0x610   : > { %v5877_v36 = vld [vmem:[%s6370_s0 + $0x360] sm:$0xff] }
 0x611   : > { %v3174_v1 = vpop.f32.mrf.mxu0  ;;  %v3192_v61 = vpop.f32.mrf.mxu1  ;;  %v3347_v23 = vmax.f32 %v3137_v60, 0.0  ;;  %v3348_v37 = vmax.f32 %v3155_v22, 0.0  ;;  %v5878_v60 = vld [vmem:[%s6370_s0 + $0x368] sm:$0xff] }
 0x612   : > { %v3175_v59 = vadd.f32 %v3174_v1, %v8432_v58  ;;  %v3193_v48 = vadd.f32 %v3192_v61, %v8435_v49  ;;  %4617 = vmatpush.bf16.msrb.mxu3 %v5844_v35  ;;  %4638 = vmatpush.bf16.msrb.mxu0 %v5849_v5  ;;  %v5879_v61 = vld [vmem:[%s6370_s0 + $0x370] sm:$0xff]  ;;  %v5885_v35 = vld [vmem:[%s6370_s0 + $0x3a0] sm:$0xff] }
 0x613   : > { %4656 = vmatpush.bf16.msrb.mxu1 %v5857_v19  ;;  %4601 = vmatpush.bf16.msrb.mxu2 %v5834_v7  ;;  %v5891_v5 = vld [vmem:[%s6370_s0 + $0x3d0] sm:$0xff]  ;;  %v5868_v19 = vld [vmem:[%s6370_s0 + $0x318] sm:$0xff] }
 0x614   : > { %v3365_v56 = vmax.f32 %v3175_v59, 0.0  ;;  %v3366_v45 = vmax.f32 %v3193_v48, 0.0  ;;  %v8484_v48 = vld [vmem:[%s6360_s3 + $0x8] sm:$0xff] }
 0x615   : > { %v8491_v22 = vperm.slane %v8484_v48, 2 }
 0x616   : > { %v3397_v17 = vpack.c.bf16 %v3365_v56, %v3349_v8  ;;  %v3398_v51 = vpack.c.bf16 %v3366_v45, %v3350_v30  ;;  %v3138_v29 = vpop.f32.mrf.mxu2  ;;  %v3156_v46 = vpop.f32.mrf.mxu3  ;;  %4618 = vmatpush.bf16.msrb.mxu3 %v5843_v14  ;;  %v5893_v8 = vld [vmem:[%s6370_s0 + $0x3e0] sm:$0xff]  ;;  %v5870_v45 = vld [vmem:[%s6370_s0 + $0x328] sm:$0xff]  ;;  %v8503_v14 = vperm.slane %v8484_v48, 0 }
 0x617   : > { %v3139_v21 = vadd.f32 %v3138_v29, %v8445_v28  ;;  %v3157_v41 = vadd.f32 %v3156_v46, %v8448_v3  ;;  %4602 = vmatpush.bf16.msrb.mxu2 %v5833_v43  ;;  %v5884_v46 = vld [vmem:[%s6370_s0 + $0x398] sm:$0xff] }
 0x618   : > { %4567 = vmatmul.bf16.vlgmr.msra.gmra.mxu0 %v3397_v17  ;;  %4585 = vmatmul.bf16.vlgmr.msra.gmra.mxu1 %v3398_v51  ;;  %v8494_v17 = vperm.slane %v8484_v48, 3 }
 0x619   : > { %v3363_v6 = vmax.f32 %v3139_v21, 0.0  ;;  %v3364_v54 = vmax.f32 %v3157_v41, 0.0  ;;  %v3177_v13 = vpop.f32.mrf.mxu0  ;;  %v3195_v0 = vpop.f32.mrf.mxu1  ;;  %4703 = vmatpush.bf16.msra.mxu0 %v5888_v26  ;;  %4721 = vmatpush.bf16.msra.mxu1 %v5896_v15 }
 0x61a   : > { %v3178_v50 = vadd.f32 %v3177_v13, %v8432_v58  ;;  %v3196_v11 = vadd.f32 %v3195_v0, %v8435_v49  ;;  %4619 = vmatpush.bf16.msrb.mxu3 %v5842_v2  ;;  %v5872_v58 = vld [vmem:[%s6370_s0 + $0x338] sm:$0xff]  ;;  %v5883_v0 = vld [vmem:[%s6370_s0 + $0x390] sm:$0xff] }
 0x61b   : > { %v3395_v34 = vpack.c.bf16 %v3363_v6, %v3347_v23  ;;  %v3396_v27 = vpack.c.bf16 %v3364_v54, %v3348_v37  ;;  %v8506_v23 = vperm.slane %v8484_v48, 1 }
 0x61c   : > { %v3381_v49 = vmax.f32 %v3178_v50, 0.0  ;;  %v3382_v57 = vmax.f32 %v3196_v11, 0.0 }
 0x61d   : > { %4531 = vmatmul.bf16.vlgmr.msra.gmra.mxu2 %v3395_v34  ;;  %4549 = vmatmul.bf16.vlgmr.msra.gmra.mxu3 %v3396_v27  ;;  %v5876_v34 = vld [vmem:[%s6370_s0 + $0x358] sm:$0xff] }
 0x61e   : > { %v3141_v12 = vpop.f32.mrf.mxu2  ;;  %v3159_v24 = vpop.f32.mrf.mxu3  ;;  %4620 = vmatpush.bf16.msrb.mxu3 %v5841_v33  ;;  %4704 = vmatpush.bf16.msra.mxu0 %v5887_v9  ;;  %v3413_v25 = vpack.c.bf16 %v3381_v49, %v3381_v49  ;;  %v3414_v44 = vpack.c.bf16 %v3382_v57, %v3382_v57  ;;  %v5882_v33 = vld [vmem:[%s6370_s0 + $0x388] sm:$0xff] }
 0x61f   : > { %v3142_v53 = vadd.f32 %v3141_v12, %v8445_v28  ;;  %v3160_v20 = vadd.f32 %v3159_v24, %v8448_v3  ;;  %4722 = vmatpush.bf16.msra.mxu1 %v5895_v38  ;;  %4667 = vmatpush.bf16.msra.mxu2 %v5872_v58  ;;  %v5871_v28 = vld [vmem:[%s6370_s0 + $0x330] sm:$0xff]  ;;  %v5890_v9 = vld [vmem:[%s6370_s0 + $0x3c8] sm:$0xff] }
 0x620   : > { %v5875_v58 = vld [vmem:[%s6370_s0 + $0x350] sm:$0xff] }
 0x621   : > { %v3179_v63 = vpop.f32.mrf.mxu0  ;;  %v3197_v32 = vpop.f32.mrf.mxu1  ;;  %v3379_v3 = vmax.f32 %v3142_v53, 0.0  ;;  %v3380_v59 = vmax.f32 %v3160_v20, 0.0 }
 0x622   : > { %4685 = vmatpush.bf16.msra.mxu3 %v5880_v42  ;;  %4705 = vmatpush.bf16.msra.mxu0 %v5886_v62  ;;  %v5867_v32 = vld [vmem:[%s6370_s0 + $0x310] sm:$0xff] }
 0x623   : > { %4723 = vmatpush.bf16.msra.mxu1 %v5894_v16  ;;  %4668 = vmatpush.bf16.msra.mxu2 %v5871_v28  ;;  %v3411_v30 = vpack.c.bf16 %v3379_v3, %v3379_v3  ;;  %v3412_v56 = vpack.c.bf16 %v3380_v59, %v3380_v59  ;;  %v5881_v16 = vld [vmem:[%s6370_s0 + $0x380] sm:$0xff]  ;;  %v5874_v28 = vld [vmem:[%s6370_s0 + $0x348] sm:$0xff] }
 0x626   : > { %v3143_v4 = vpop.f32.mrf.mxu2  ;;  %v3161_v1 = vpop.f32.mrf.mxu3  ;;  %4686 = vmatpush.bf16.msra.mxu3 %v5879_v61  ;;  %4706 = vmatpush.bf16.msra.mxu0 %v5885_v35  ;;  %v5873_v35 = vld [vmem:[%s6370_s0 + $0x340] sm:$0xff] }
 0x627   : > { %4724 = vmatpush.bf16.msra.mxu1 %v5893_v8  ;;  %4669 = vmatpush.bf16.msra.mxu2 %v5870_v45  ;;  %v5866_v1 = vld [vmem:[%s6370_s0 + $0x308] sm:$0xff] }
 0x628   : > { %4572 = vmatmul.bf16.gmra.mxu0 %v3413_v25  ;;  %4590 = vmatmul.bf16.gmra.mxu1 %v3414_v44  ;;  %v5889_v25 = vld [vmem:[%s6370_s0 + $0x3c0] sm:$0xff] }
 0x629   : > { %v3244_v47 = vpop.f32.mrf.mxu0  ;;  %v3262_v40 = vpop.f32.mrf.mxu1 }
 0x62a   : > { %4687 = vmatpush.bf16.msra.mxu3 %v5878_v60  ;;  %v3245_v21 = vadd.f32 %v3244_v47, %v8491_v22  ;;  %v3263_v41 = vadd.f32 %v3262_v40, %v8494_v17  ;;  %4707 = vmatpush.bf16.msra.mxu0 %v5884_v46  ;;  %v5865_v40 = vld [vmem:[%s6370_s0 + $0x300] sm:$0xff] }
 0x62b   : > { %4725 = vmatpush.bf16.msra.mxu1 %v5892_v52  ;;  %4670 = vmatpush.bf16.msra.mxu2 %v5869_v10 }
 0x62c   : > { %v3353_v27 = vmax.f32 %v3245_v21, 0.0  ;;  %v3354_v7 = vmax.f32 %v3263_v41, 0.0 }
 0x62d   : > { %4536 = vmatmul.bf16.gmra.mxu2 %v3411_v30  ;;  %4554 = vmatmul.bf16.gmra.mxu3 %v3412_v56 }
 0x62e   : > { %v3208_v51 = vpop.f32.mrf.mxu2  ;;  %v3226_v29 = vpop.f32.mrf.mxu3  ;;  %4688 = vmatpush.bf16.msra.mxu3 %v5877_v36  ;;  %4708 = vmatpush.bf16.msra.mxu0 %v5883_v0 }
 0x62f   : > { %v3209_v11 = vadd.f32 %v3208_v51, %v8503_v14  ;;  %v3227_v12 = vadd.f32 %v3226_v29, %v8506_v23  ;;  %4726 = vmatpush.bf16.msra.mxu1 %v5891_v5  ;;  %4671 = vmatpush.bf16.msra.mxu2 %v5868_v19  ;;  %v2869_v5 = vperm.slane %v8484_v48, 4  ;;  %v2870_v19 = vperm.slane %v8484_v48, 5 }
 0x631   : > { %v3246_v37 = vpop.f32.mrf.mxu0  ;;  %v3264_v6 = vpop.f32.mrf.mxu1  ;;  %v3351_v49 = vmax.f32 %v3209_v11, 0.0  ;;  %v3352_v57 = vmax.f32 %v3227_v12, 0.0 }
 0x632   : > { %v3247_v54 = vadd.f32 %v3246_v37, %v8491_v22  ;;  %v3265_v13 = vadd.f32 %v3264_v6, %v8494_v17  ;;  %4689 = vmatpush.bf16.msra.mxu3 %v5876_v34  ;;  %4709 = vmatpush.bf16.msra.mxu0 %v5882_v33  ;;  %v2871_v6 = vperm.slane %v8484_v48, 6 }
 0x633   : > { %4727 = vmatpush.bf16.msra.mxu1 %v5890_v9  ;;  %4672 = vmatpush.bf16.msra.mxu2 %v5867_v32 }
 0x634   : > { %v3369_v2 = vmax.f32 %v3247_v54, 0.0  ;;  %v3370_v50 = vmax.f32 %v3265_v13, 0.0 }
 0x636   : > { %v3401_v24 = vpack.c.bf16 %v3369_v2, %v3353_v27  ;;  %v3402_v26 = vpack.c.bf16 %v3370_v50, %v3354_v7  ;;  %v3210_v15 = vpop.f32.mrf.mxu2  ;;  %v3228_v43 = vpop.f32.mrf.mxu3  ;;  %4690 = vmatpush.bf16.msra.mxu3 %v5875_v58  ;;  %4710 = vmatpush.bf16.msra.mxu0 %v5881_v16 }
 0x637   : > { %v3211_v38 = vadd.f32 %v3210_v15, %v8503_v14  ;;  %v3229_v63 = vadd.f32 %v3228_v43, %v8506_v23  ;;  %4728 = vmatpush.bf16.msra.mxu1 %v5889_v25  ;;  %4673 = vmatpush.bf16.msra.mxu2 %v5866_v1 }
 0x638   : > { %4639 = vmatmul.bf16.vlgmr.msrb.gmra.mxu0 %v3401_v24  ;;  %4657 = vmatmul.bf16.vlgmr.msrb.gmra.mxu1 %v3402_v26 }
 0x639   : > { %v3367_v53 = vmax.f32 %v3211_v38, 0.0  ;;  %v3368_v20 = vmax.f32 %v3229_v63, 0.0  ;;  %v3249_v42 = vpop.f32.mrf.mxu0  ;;  %v3267_v62 = vpop.f32.mrf.mxu1 }
 0x63a   : > { %v3250_v61 = vadd.f32 %v3249_v42, %v8491_v22  ;;  %v3268_v3 = vadd.f32 %v3267_v62, %v8494_v17  ;;  %4691 = vmatpush.bf16.msra.mxu3 %v5874_v28 }
 0x63b   : > { %v3399_v44 = vpack.c.bf16 %v3367_v53, %v3351_v49  ;;  %v3400_v4 = vpack.c.bf16 %v3368_v20, %v3352_v57  ;;  %4674 = vmatpush.bf16.msra.mxu2 %v5865_v40 }
 0x63c   : > { %v3385_v56 = vmax.f32 %v3250_v61, 0.0  ;;  %v3386_v45 = vmax.f32 %v3268_v3, 0.0 }
 0x63d   : > { %4603 = vmatmul.bf16.vlgmr.msrb.gmra.mxu2 %v3399_v44  ;;  %4621 = vmatmul.bf16.vlgmr.msrb.gmra.mxu3 %v3400_v4 }
 0x63e   : > { %v3213_v59 = vpop.f32.mrf.mxu2  ;;  %v3231_v47 = vpop.f32.mrf.mxu3  ;;  %4692 = vmatpush.bf16.msra.mxu3 %v5873_v35  ;;  %v3417_v22 = vpack.c.bf16 %v3385_v56, %v3385_v56  ;;  %v3418_v17 = vpack.c.bf16 %v3386_v45, %v3386_v45 }
 0x63f   : > { %v3214_v60 = vadd.f32 %v3213_v59, %v8503_v14  ;;  %v3232_v51 = vadd.f32 %v3231_v47, %v8506_v23  ;;  %v2872_v14 = vperm.slane %v8484_v48, 7 }
 0x641   : > { %v3251_v8 = vpop.f32.mrf.mxu0  ;;  %v3269_v30 = vpop.f32.mrf.mxu1  ;;  %v3383_v52 = vmax.f32 %v3214_v60, 0.0  ;;  %v3384_v10 = vmax.f32 %v3232_v51, 0.0 }
 0x643   : > { %v3415_v41 = vpack.c.bf16 %v3383_v52, %v3383_v52  ;;  %v3416_v37 = vpack.c.bf16 %v3384_v10, %v3384_v10  ;;  %v5951_v52 = vld [vmem:[%s629_s13] ss:$0 sm:$0xff] }
 0x646   : > { %v3215_v29 = vpop.f32.mrf.mxu2  ;;  %v3233_v46 = vpop.f32.mrf.mxu3 }
 0x648   : > { %4644 = vmatmul.bf16.gmra.mxu0 %v3417_v22  ;;  %4662 = vmatmul.bf16.gmra.mxu1 %v3418_v17 }
 0x649   : > { %v3316_v36 = vpop.f32.mrf.mxu0  ;;  %v3334_v21 = vpop.f32.mrf.mxu1 }
 0x64a   : > { %v3317_v13 = vadd.f32 %v3316_v36, %v2871_v6  ;;  %v3335_v0 = vadd.f32 %v3334_v21, %v2872_v14 }
 0x64c   : > { %v3357_v50 = vmax.f32 %v3317_v13, 0.0  ;;  %v3358_v11 = vmax.f32 %v3335_v0, 0.0 }
 0x64d   : > { %4608 = vmatmul.bf16.gmra.mxu2 %v3415_v41  ;;  %4626 = vmatmul.bf16.gmra.mxu3 %v3416_v37 }
 0x64e   : > { %v3280_v23 = vpop.f32.mrf.mxu2  ;;  %v3298_v54 = vpop.f32.mrf.mxu3 }
 0x64f   : > { %v3281_v26 = vadd.f32 %v3280_v23, %v2869_v5  ;;  %v3299_v15 = vadd.f32 %v3298_v54, %v2870_v19 }
 0x651   : > { %v3318_v34 = vpop.f32.mrf.mxu0  ;;  %v3336_v27 = vpop.f32.mrf.mxu1  ;;  %v3355_v58 = vmax.f32 %v3281_v26, 0.0  ;;  %v3356_v48 = vmax.f32 %v3299_v15, 0.0 }
 0x652   : > { %v3319_v7 = vadd.f32 %v3318_v34, %v2871_v6  ;;  %v3337_v2 = vadd.f32 %v3336_v27, %v2872_v14 }
 0x654   : > { %v3373_v12 = vmax.f32 %v3319_v7, 0.0  ;;  %v3374_v24 = vmax.f32 %v3337_v2, 0.0 }
 0x656   : > { %v3405_v43 = vpack.c.bf16 %v3373_v12, %v3357_v50  ;;  %v3406_v33 = vpack.c.bf16 %v3374_v24, %v3358_v11  ;;  %v3282_v9 = vpop.f32.mrf.mxu2  ;;  %v3300_v38 = vpop.f32.mrf.mxu3 }
 0x657   : > { %v3283_v63 = vadd.f32 %v3282_v9, %v2869_v5  ;;  %v3301_v32 = vadd.f32 %v3300_v38, %v2870_v19 }
 0x658   : > { %4711 = vmatmul.bf16.vlgmr.msra.gmra.mxu0 %v3405_v43  ;;  %4729 = vmatmul.bf16.vlgmr.msra.gmra.mxu1 %v3406_v33 }
 0x659   : > { %v3371_v49 = vmax.f32 %v3283_v63, 0.0  ;;  %v3372_v57 = vmax.f32 %v3301_v32, 0.0  ;;  %v3321_v53 = vpop.f32.mrf.mxu0  ;;  %v3339_v20 = vpop.f32.mrf.mxu1 }
 0x65a   : > { %v3322_v16 = vadd.f32 %v3321_v53, %v2871_v6  ;;  %v3340_v25 = vadd.f32 %v3339_v20, %v2872_v14 }
 0x65b   : > { %v3403_v42 = vpack.c.bf16 %v3371_v49, %v3355_v58  ;;  %v3404_v62 = vpack.c.bf16 %v3372_v57, %v3356_v48 }
 0x65c   : > { %v3389_v61 = vmax.f32 %v3322_v16, 0.0  ;;  %v3390_v3 = vmax.f32 %v3340_v25, 0.0 }
 0x65d   : > { %4675 = vmatmul.bf16.vlgmr.msra.gmra.mxu2 %v3403_v42  ;;  %4693 = vmatmul.bf16.vlgmr.msra.gmra.mxu3 %v3404_v62 }
 0x65e   : > { %v3285_v44 = vpop.f32.mrf.mxu2  ;;  %v3303_v4 = vpop.f32.mrf.mxu3  ;;  %v3421_v40 = vpack.c.bf16 %v3389_v61, %v3389_v61  ;;  %v3422_v35 = vpack.c.bf16 %v3390_v3, %v3390_v3 }
 0x65f   : > { %v3286_v59 = vadd.f32 %v3285_v44, %v2869_v5  ;;  %v3304_v47 = vadd.f32 %v3303_v4, %v2870_v19 }
 0x661   : > { %v3323_v1 = vpop.f32.mrf.mxu0  ;;  %v3341_v28 = vpop.f32.mrf.mxu1  ;;  %v3387_v56 = vmax.f32 %v3286_v59, 0.0  ;;  %v3388_v45 = vmax.f32 %v3304_v47, 0.0 }
 0x663   : > { %v3419_v60 = vpack.c.bf16 %v3387_v56, %v3387_v56  ;;  %v3420_v51 = vpack.c.bf16 %v3388_v45, %v3388_v45 }
 0x666   : > { %v3287_v8 = vpop.f32.mrf.mxu2  ;;  %v3305_v30 = vpop.f32.mrf.mxu3 }
 0x668   : > { %4716 = vmatmul.bf16.gmra.mxu0 %v3421_v40  ;;  %4734 = vmatmul.bf16.gmra.mxu1 %v3422_v35 }
 0x66d   : > { %4680 = vmatmul.bf16.gmra.mxu2 %v3419_v60  ;;  %4698 = vmatmul.bf16.gmra.mxu3 %v3420_v51 }
 0x671   : > { %v4496_v22 = vpop.f32.mrf.mxu0  ;;  %v4514_v17 = vpop.f32.mrf.mxu1 }
 0x679   : > { %v4498_v29 = vpop.f32.mrf.mxu0  ;;  %v4516_v46 = vpop.f32.mrf.mxu1 }
 0x67c   : > { %v4460_v10 = vpop.f32.mrf.mxu2  ;;  %v4478_v36 = vpop.f32.mrf.mxu3 }
 0x67d   : > { %v4461_v21 = vadd.f32 %v5951_v52, %v4460_v10 }
 0x67f   : > { %v4479_v41 = vadd.f32 %v4478_v36, %v4461_v21 }
 0x681   : > { %v4497_v37 = vadd.f32 %v4496_v22, %v4479_v41  ;;  %v4501_v6 = vpop.f32.mrf.mxu0  ;;  %v4519_v14 = vpop.f32.mrf.mxu1 }
 0x683   : > { %v4515_v23 = vadd.f32 %v4514_v17, %v4497_v37 }
 0x684   : > { %v4462_v54 = vpop.f32.mrf.mxu2  ;;  %v4480_v13 = vpop.f32.mrf.mxu3 }
 0x685   : > { %v4463_v0 = vadd.f32 %v5951_v52, %v4462_v54 }
 0x687   : > { %v4481_v5 = vadd.f32 %v4480_v13, %v4463_v0 }
 0x689   : > { %v4499_v19 = vadd.f32 %v4498_v29, %v4481_v5  ;;  %v4503_v34 = vpop.f32.mrf.mxu0  ;;  %v4521_v27 = vpop.f32.mrf.mxu1 }
 0x68b   : > { %v4517_v7 = vadd.f32 %v4516_v46, %v4499_v19 }
 0x68c   : > { %v4465_v2 = vpop.f32.mrf.mxu2  ;;  %v4483_v50 = vpop.f32.mrf.mxu3 }
 0x68d   : > { %v4466_v11 = vadd.f32 %v5951_v52, %v4465_v2 }
 0x68f   : > { %v4484_v12 = vadd.f32 %v4483_v50, %v4466_v11 }
 0x691   : > { %v4502_v24 = vadd.f32 %v4501_v6, %v4484_v12 }
 0x693   : > { %v4520_v26 = vadd.f32 %v4519_v14, %v4502_v24 }
 0x694   : > { %v4467_v15 = vpop.f32.mrf.mxu2  ;;  %v4485_v43 = vpop.f32.mrf.mxu3 }
 0x695   : > { %v4568_v33 = vpop.f32.mrf.mxu0  ;;  %v4586_v9 = vpop.f32.mrf.mxu1 }
 0x69d   : > { %v4570_v38 = vpop.f32.mrf.mxu0  ;;  %v4588_v63 = vpop.f32.mrf.mxu1 }
 0x6a0   : > { %v4532_v32 = vpop.f32.mrf.mxu2  ;;  %v4550_v58 = vpop.f32.mrf.mxu3 }
 0x6a1   : > { %v4533_v48 = vadd.f32 %v4532_v32, %v4515_v23 }
 0x6a3   : > { %v4551_v49 = vadd.f32 %v4550_v58, %v4533_v48 }
 0x6a5   : > { %v4569_v57 = vadd.f32 %v4568_v33, %v4551_v49  ;;  %v4573_v53 = vpop.f32.mrf.mxu0  ;;  %v4591_v20 = vpop.f32.mrf.mxu1 }
 0x6a7   : > { %v4587_v42 = vadd.f32 %v4586_v9, %v4569_v57 }
 0x6a8   : > { %v4534_v62 = vpop.f32.mrf.mxu2  ;;  %v4552_v16 = vpop.f32.mrf.mxu3 }
 0x6a9   : > { %v4535_v25 = vadd.f32 %v4534_v62, %v4517_v7 }
 0x6ab   : > { %v4553_v44 = vadd.f32 %v4552_v16, %v4535_v25 }
 0x6ad   : > { %v4571_v4 = vadd.f32 %v4570_v38, %v4553_v44  ;;  %v4575_v1 = vpop.f32.mrf.mxu0  ;;  %v4593_v28 = vpop.f32.mrf.mxu1 }
 0x6af   : > { %v4589_v61 = vadd.f32 %v4588_v63, %v4571_v4 }
 0x6b0   : > { %v4537_v3 = vpop.f32.mrf.mxu2  ;;  %v4555_v59 = vpop.f32.mrf.mxu3 }
 0x6b1   : > { %v4538_v47 = vadd.f32 %v4537_v3, %v4520_v26 }
 0x6b3   : > { %v4556_v40 = vadd.f32 %v4555_v59, %v4538_v47 }
 0x6b5   : > { %v4574_v35 = vadd.f32 %v4573_v53, %v4556_v40  ;;  %v4640_v8 = vpop.f32.mrf.mxu0  ;;  %v4658_v30 = vpop.f32.mrf.mxu1 }
 0x6b7   : > { %v4592_v56 = vadd.f32 %v4591_v20, %v4574_v35 }
 0x6b8   : > { %v4539_v45 = vpop.f32.mrf.mxu2  ;;  %v4557_v60 = vpop.f32.mrf.mxu3 }
 0x6bd   : > { %v4642_v51 = vpop.f32.mrf.mxu0  ;;  %v4660_v22 = vpop.f32.mrf.mxu1 }
 0x6c0   : > { %v4604_v17 = vpop.f32.mrf.mxu2  ;;  %v4622_v29 = vpop.f32.mrf.mxu3 }
 0x6c1   : > { %v4605_v14 = vadd.f32 %v4604_v17, %v4587_v42 }
 0x6c3   : > { %v4623_v13 = vadd.f32 %v4622_v29, %v4605_v14 }
 0x6c5   : > { %v4645_v46 = vpop.f32.mrf.mxu0  ;;  %v4663_v52 = vpop.f32.mrf.mxu1  ;;  %v4641_v19 = vadd.f32 %v4640_v8, %v4623_v13 }
 0x6c7   : > { %v4659_v50 = vadd.f32 %v4658_v30, %v4641_v19 }
 0x6c8   : > { %v4606_v10 = vpop.f32.mrf.mxu2  ;;  %v4624_v36 = vpop.f32.mrf.mxu3 }
 0x6c9   : > { %v4607_v34 = vadd.f32 %v4606_v10, %v4589_v61 }
 0x6cb   : > { %v4625_v2 = vadd.f32 %v4624_v36, %v4607_v34 }
 0x6cd   : > { %v4647_v21 = vpop.f32.mrf.mxu0  ;;  %v4665_v41 = vpop.f32.mrf.mxu1  ;;  %v4643_v26 = vadd.f32 %v4642_v51, %v4625_v2 }
 0x6cf   : > { %v4661_v32 = vadd.f32 %v4660_v22, %v4643_v26 }
 0x6d0   : > { %v4609_v37 = vpop.f32.mrf.mxu2  ;;  %v4627_v6 = vpop.f32.mrf.mxu3 }
 0x6d1   : > { %v4610_v15 = vadd.f32 %v4609_v37, %v4592_v56 }
 0x6d3   : > { %v4628_v63 = vadd.f32 %v4627_v6, %v4610_v15 }
 0x6d5   : > { %v4712_v23 = vpop.f32.mrf.mxu0  ;;  %v4730_v54 = vpop.f32.mrf.mxu1  ;;  %v4646_v20 = vadd.f32 %v4645_v46, %v4628_v63 }
 0x6d7   : > { %v4664_v4 = vadd.f32 %v4663_v52, %v4646_v20 }
 0x6d8   : > { %v4611_v0 = vpop.f32.mrf.mxu2  ;;  %v4629_v5 = vpop.f32.mrf.mxu3 }
 0x6dd   : > { %v4714_v27 = vpop.f32.mrf.mxu0  ;;  %v4732_v7 = vpop.f32.mrf.mxu1 }
 0x6e0   : > { %v4676_v11 = vpop.f32.mrf.mxu2  ;;  %v4694_v12 = vpop.f32.mrf.mxu3 }
 0x6e1   : > { %v4677_v24 = vadd.f32 %v4676_v11, %v4659_v50 }
 0x6e3   : > { %v4695_v43 = vadd.f32 %v4694_v12, %v4677_v24 }
 0x6e5   : > { %v4713_v33 = vadd.f32 %v4712_v23, %v4695_v43  ;;  %v4717_v9 = vpop.f32.mrf.mxu0  ;;  %v4735_v38 = vpop.f32.mrf.mxu1  ;;  %v5952_v43 = vld [vmem:[%s632_s17] ss:$0 sm:$0xff] }
 0x6e7   : > { %v4731_v58 = vadd.f32 %v4730_v54, %v4713_v33 }
 0x6e8   : > { %v4678_v48 = vpop.f32.mrf.mxu2  ;;  %v4696_v49 = vpop.f32.mrf.mxu3 }
 0x6e9   : > { %v4679_v57 = vadd.f32 %v4678_v48, %v4661_v32  ;;  %v4739_v53 = vadd.f32 %v4731_v58, %v8210_v55 }
 0x6eb   : > { %v4697_v42 = vadd.f32 %v4696_v49, %v4679_v57  ;;  %v4744_v62 = vsel %vm676_vm1, %v4739_v53, 0.0 }
 0x6ec   : > { %4745 = vadd.xlane.f32.xlu0 %v4744_v62 }
 0x6ed   : > { %v4715_v16 = vadd.f32 %v4714_v27, %v4697_v42  ;;  %v4719_v25 = vpop.f32.mrf.mxu0  ;;  %v4737_v44 = vpop.f32.mrf.mxu1 }
 0x6ef   : > { %v4733_v1 = vadd.f32 %v4732_v7, %v4715_v16 }
 0x6f0   : > { %v4681_v28 = vpop.f32.mrf.mxu2  ;;  %v4699_v61 = vpop.f32.mrf.mxu3 }
 0x6f1   : > { %v4682_v3 = vadd.f32 %v4681_v28, %v4664_v4  ;;  %v4740_v59 = vadd.f32 %v4733_v1, %v8213_v31 }
 0x6f3   : > { %v4700_v47 = vadd.f32 %v4699_v61, %v4682_v3  ;;  %v4747_v40 = vsel %vm676_vm1, %v4740_v59, 0.0 }
 0x6f4   : > { %4748 = vadd.xlane.f32.xlu2 %v4747_v40 }
 0x6f5   : > { %v4718_v55 = vadd.f32 %v4717_v9, %v4700_v47 }
 0x6f7   : > { %v4736_v35 = vadd.f32 %v4735_v38, %v4718_v55 }
 0x6f8   : > { %v4683_v8 = vpop.f32.mrf.mxu2  ;;  %v4701_v30 = vpop.f32.mrf.mxu3 }
 0x6f9   : > { %v4741_v56 = vadd.f32 %v4736_v35, %v8236_v39 }
 0x6fb   : > { %v4750_v45 = vsel %vm676_vm1, %v4741_v56, 0.0 }
 0x6fc   : > { %4751 = vadd.xlane.f32.xlu1 %v4750_v45 }
 0x75f   : > { %v4746_v60 = vpop.xlane.xlu0 %4745 }
 0x760   : > { %v4753_v51 = vmul.f32 %v4746_v60, %v8137_v18 }
 0x762   : > { %v4756_v22 = vsub.f32 %v4739_v53, %v4753_v51 }
 0x764   : > { %v4759_v17 = vmul.f32 %v4756_v22, %v4756_v22 }
 0x766   : > { %v4762_v31 = vsel %vm676_vm1, %v4759_v17, 0.0 }
 0x767   : > { %v4749_v29 = vpop.xlane.xlu2 %4748  ;;  %4763 = vadd.xlane.f32.xlu0 %v4762_v31 }
 0x768   : > { %v4754_v46 = vmul.f32 %v4749_v29, %v8137_v18 }
 0x76a   : > { %v4757_v52 = vsub.f32 %v4740_v59, %v4754_v46 }
 0x76c   : > { %v4760_v10 = vmul.f32 %v4757_v52, %v4757_v52 }
 0x76e   : > { %v4765_v36 = vsel %vm676_vm1, %v4760_v10, 0.0 }
 0x76f   : > { %v4752_v21 = vpop.xlane.xlu1 %4751  ;;  %4766 = vadd.xlane.f32.xlu2 %v4765_v36 }
 0x770   : > { %v4755_v39 = vmul.f32 %v4752_v21, %v8137_v18 }
 0x772   : > { %v4758_v41 = vsub.f32 %v4741_v56, %v4755_v39 }
 0x774   : > { %v4761_v37 = vmul.f32 %v4758_v41, %v4758_v41 }
 0x776   : > { %v4768_v6 = vsel %vm676_vm1, %v4761_v37, 0.0 }
 0x777   : > { %4769 = vadd.xlane.f32.xlu1 %v4768_v6 }
 0x7da   : > { %v4764_v14 = vpop.xlane.xlu0 %4763 }
 0x7db   : > { %v4771_v23 = vmul.f32 %v4764_v14, %v8137_v18 }
 0x7dd   : > { %v4774_v54 = vadd.f32 1e-05, %v4771_v23 }
 0x7df   : > { %6154 = vrsqrt.f32 %v4774_v54  ;;  %vm4783_vm3 = vweird.f32 %v4774_v54 }
 0x7e2   : > { %v4767_v13 = vpop.xlane.xlu2 %4766 }
 0x7e3   : > { %v4772_v0 = vmul.f32 %v4767_v13, %v8137_v18 }
 0x7e5   : > { %v6155_v5 = vpop.eup %6154  ;;  %v4775_v19 = vadd.f32 1e-05, %v4772_v0 }
 0x7e6   : > { %v4778_v34 = vmul.f32 %v6155_v5, %v4774_v54  ;;  %vm4784_vm2 = vweird.f32 %v6155_v5 }
 0x7e7   : > { %6156 = vrsqrt.f32 %v4775_v19  ;;  %vm4785_vm4 = vmor %vm4783_vm3, %vm4784_vm2  ;;  %vm4793_vm6 = vweird.f32 %v4775_v19 }
 0x7e8   : > { %v4779_v27 = vmul.f32 %v6155_v5, %v4778_v34 }
 0x7ea   : > { %v4780_v7 = vmul.f32 0.5, %v4779_v27  ;;  %v4770_v2 = vpop.xlane.xlu1 %4769 }
 0x7eb   : > { %v4773_v50 = vmul.f32 %v4770_v2, %v8137_v18  ;;  %v5953_v18 = vld [vmem:[%s635_s21] ss:$0 sm:$0xff] }
 0x7ec   : > { %v4781_v11 = vsub.f32 1.5, %v4780_v7 }
 0x7ed   : > { %v6157_v12 = vpop.eup %6156  ;;  %v4776_v24 = vadd.f32 1e-05, %v4773_v50 }
 0x7ee   : > { %v4782_v26 = vmul.f32 %v6155_v5, %v4781_v11  ;;  %v4788_v15 = vmul.f32 %v6157_v12, %v4775_v19  ;;  %vm4794_vm5 = vweird.f32 %v6157_v12 }
 0x7ef   : > { %6158 = vrsqrt.f32 %v4776_v24  ;;  %vm4795_vm7 = vmor %vm4793_vm6, %vm4794_vm5  ;;  %vm4803_vm9 = vweird.f32 %v4776_v24 }
 0x7f0   : > { %v4786_v33 = vsel %vm4785_vm4, %v6155_v5, %v4782_v26  ;;  %v4789_v9 = vmul.f32 %v6157_v12, %v4788_v15 }
 0x7f1   : > { %v4807_v38 = vmul.f32 %v4786_v33, %v4756_v22 }
 0x7f2   : > { %v4790_v63 = vmul.f32 0.5, %v4789_v9 }
 0x7f3   : > { %v4813_v32 = vmul.f32 %v5952_v43, %v4807_v38 }
 0x7f4   : > { %v4791_v58 = vsub.f32 1.5, %v4790_v63 }
 0x7f5   : > { %v6159_v48 = vpop.eup %6158  ;;  %v4819_v49 = vadd.f32 %v5953_v18, %v4813_v32 }
 0x7f6   : > { %v4792_v57 = vmul.f32 %v6157_v12, %v4791_v58  ;;  %v4798_v53 = vmul.f32 %v6159_v48, %v4776_v24  ;;  %vm4804_vm8 = vweird.f32 %v6159_v48 }
 0x7f7   : > { %4822 = vst.msk [vmem:[#allocation2] sm:$0xff] %vm676_vm1, %v4819_v49  ;;  %vm4805_vm10 = vmor %vm4803_vm9, %vm4804_vm8 }
 0x7f8   : > { %v4796_v20 = vsel %vm4795_vm7, %v6157_v12, %v4792_v57  ;;  %v4799_v42 = vmul.f32 %v6159_v48, %v4798_v53 }
 0x7f9   : > { %v4808_v62 = vmul.f32 %v4796_v20, %v4757_v52 }
 0x7fa   : > { %v4800_v16 = vmul.f32 0.5, %v4799_v42 }
 0x7fb   : > { %v4814_v25 = vmul.f32 %v5952_v43, %v4808_v62 }
 0x7fc   : > { %v4801_v44 = vsub.f32 1.5, %v4800_v16 }
 0x7fd   : > { %v4820_v4 = vadd.f32 %v5953_v18, %v4814_v25 }
 0x7fe   : > { %v4802_v1 = vmul.f32 %v6159_v48, %v4801_v44 }
 0x7ff   : > { %4823 = vst.msk [vmem:[#allocation2 + $0x8] sm:$0xff] %vm676_vm1, %v4820_v4 }
 0x800   : > { %v4806_v28 = vsel %vm4805_vm10, %v6159_v48, %v4802_v1 }
 0x801   : > { %v4809_v61 = vmul.f32 %v4806_v28, %v4758_v41 }
 0x803   : > { %v4815_v3 = vmul.f32 %v5952_v43, %v4809_v61  ;;  %4828 = sbr.rel (%p5724_p6) target bundleno = 2057 (0x809), region = 80 }
 0x805   : > { %v4821_v59 = vadd.f32 %v5953_v18, %v4815_v3 }
 0x807   : > { %4824 = vst.msk [vmem:[#allocation2 + $0x10] sm:$0xff] %vm676_vm1, %v4821_v59 }
 0x808   : > { %4829 = vst.msk [vmem:[#allocation3] sm:$0xff] %vm676_vm1, %v4821_v59 }
 0x809 PF: > { %s8694_s30 = sld [smem:[#allocation7_spill]]  ;;  %s6230_s28 = smov [#allocation3]  }
 0x80a   : > { %s8696_s23 = sld [smem:[#allocation33_spill]]  ;;  %s4838_s26 = sshll.u32 %s6230_s28, 4  ;;  %s4839_s26 = int_to_ptr.vmem [resolvable:$true] %s4838_s26 }
 0x80f   : > { %s8695_s17 = sadd.s32 4294967295, %s8694_s30  }
 0x810   : > { %p5909_p7 = scmp.eq.s32.totalorder %s8695_s17, 1  ;;  %s4840_s16 = sshll.u32 %s8696_s23, 4  ;;  %s4841_s16 = int_to_ptr.hbm [resolvable:$true] %s4840_s16 }
 0x812   : > { %5906 = dma.vmem_to_hbm [thread:$0]  (%p5909_p7), %s4839_s26, 128, %s4841_s16, [#allocation4]  }
 0x813   : > { %6204 = dma.done.wait (%p5909_p7), [#allocation4], 128  }
 0x814   : > { %6206 = vsyncadd (%p5909_p7), [#allocation4], 4294967168 }
 0x815 PF: > { %s8697_s25 = sld [smem:[#allocation7_spill]] }
 0x816   : > { %s8699_s26 = sld [smem:[#allocation8_spill]] }
 0x81b   : > { %s24_s27 = sadd.s32 1, %s8697_s25   ;;  %s8698_s25 = sld [smem:[#allocation6_spill]] }
 0x81c   : > { %p21_p8 = scmp.ge.s32.totalorder %s24_s27, 4  }
 0x81e   :  { %23 = sbr.rel (!%p21_p8) target bundleno = 7 (0x7), region = 144 }
 0x823   :  { %4854 = vsyncpa [#allocation4], 1 }
 0x824   :  { %4856 = vsyncpa [#allocation4 + $0x1], 1 }

</bundles_post_ra>
